<compile_context>
chip_gen: v5e
topology: v5e:2x2
jax: 0.10.0
libtpu: 0.0.40
codegen_flags: <defaults>
</compile_context>

<pallas_src>
import functools

import jax
import jax.numpy as jnp
import numpy as np
from jax import lax
from jax.experimental import pallas as pl
from jax.experimental.pallas import tpu as pltpu

PAD = 9   # conv padding
DIL = 3   # conv dilation
K = 7     # conv kernel size


def _banded_weight(weight, W):
    """Banded matrix (K*2*Wp, W) expressing the dilated 7x7 conv as one matmul.

    Row  kh*2*Wp + c*Wp + (x + kw*DIL), column x  holds  weight[0, c, kh, kw]
    (c = 0: avg-channel taps, c = 1: max-channel taps), matching an lhs whose
    lane block kh holds row (y + kh*DIL) of the zero-padded [avg | max] map.
    """
    Wp = W + 2 * PAD
    sel = np.zeros((K, Wp, W), np.float32)          # sel[kw, x + kw*DIL, x] = 1
    for kw in range(K):
        for x in range(W):
            sel[kw, x + kw * DIL, x] = 1.0
    w2 = jnp.asarray(weight, jnp.float32)[0]                  # (2, K, K)
    wb = jnp.einsum("cij,jrx->icrx", w2, jnp.asarray(sel))    # (K, 2, Wp, W)
    return wb.reshape(K * 2 * Wp, W)


def _bridge_kernel(*refs, groups, n_w, n_t):
    """groups: tuple of (weight_idx, H, W, ((tensor_idx, C, N), ...)) — static."""
    bias_ref = refs[0]
    w_refs = refs[1:1 + n_w]
    x_refs = refs[1 + n_w:1 + n_w + n_t]
    o_refs = refs[1 + n_w + n_t:1 + n_w + 2 * n_t]

    bias = bias_ref[0]                              # SMEM scalar

    for (wi, H, W, members) in groups:
        Wp = W + 2 * PAD
        wb = w_refs[wi][...]                        # (K*2*Wp, W) banded conv taps

        # zero blocks used to pad the reduced map (hoisted, shared by the group)
        z_lane = jnp.zeros((H, PAD), jnp.float32)
        z_mid = jnp.zeros((H, 2 * PAD), jnp.float32)
        z_row = jnp.zeros((PAD, 2 * Wp), jnp.float32)

        lhs_rows = []
        row_spans = []                              # (tensor_idx, row_start, rows)
        r0 = 0
        for (ti, C, N) in members:
            x_ref = x_refs[ti]
            inv_c = np.float32(1.0 / C)
            for n in range(N):                      # N small & static -> unrolled
                xn = x_ref[n].astype(jnp.float32)   # (C, H, W), unpadded
                s = jnp.sum(xn, axis=0) * inv_c     # channel mean (H, W)
                m = jnp.max(xn, axis=0)             # channel max  (H, W)
                # zero-padded [avg | max] map, (Hp, 2*Wp)
                mid = jnp.concatenate([z_lane, s, z_mid, m, z_lane], axis=1)
                pc = jnp.concatenate([z_row, mid, z_row], axis=0)
                # stack the 7 dilated row-shifts along lanes -> (H, K*2*Wp)
                lhs_rows.append(jnp.concatenate(
                    [pc[kh * DIL:kh * DIL + H, :] for kh in range(K)], axis=1))
            row_spans.append((ti, r0, N * H))
            r0 += N * H

        # one MXU contraction + one bias add + one sigmoid for the whole group
        lhs = jnp.concatenate(lhs_rows, axis=0)     # (sum(N*H), K*2*Wp)
        acc = jnp.dot(lhs, wb, preferred_element_type=jnp.float32) + bias
        att = jax.nn.sigmoid(acc)

        for (ti, start, rows) in row_spans:         # static full-block stores
            o_refs[ti][...] = att[start:start + rows, :].astype(o_refs[ti].dtype)


def spatial_att_bridge(t_list, weight, bias):
    """Pallas implementation of Spatial_Att_Bridge.forward (6 outputs)."""
    t_list = list(t_list)
    n_t = len(t_list)

    # one banded weight per distinct spatial size (shared by same-size tensors)
    sizes = []
    for t in t_list:
        hw = (int(t.shape[2]), int(t.shape[3]))
        if hw not in sizes:
            sizes.append(hw)
    w_arrs = [_banded_weight(weight, w) for (_, w) in sizes]

    # group tensors by spatial size so each group is one fused matmul
    groups = []
    for si, (H, W) in enumerate(sizes):
        members = tuple(
            (ti, int(t.shape[1]), int(t.shape[0]))
            for ti, t in enumerate(t_list)
            if (int(t.shape[2]), int(t.shape[3])) == (H, W))
        groups.append((si, H, W, members))
    groups = tuple(groups)

    # 2D (N*H, W) outputs; reshaped to (N, 1, H, W) outside (row-major, free).
    out_shapes = tuple(
        jax.ShapeDtypeStruct((t.shape[0] * t.shape[2], t.shape[3]), t.dtype)
        for t in t_list)

    in_specs = [pl.BlockSpec(memory_space=pltpu.SMEM)]                      # bias
    in_specs += [pl.BlockSpec(w.shape, lambda i: (0, 0)) for w in w_arrs]   # taps
    in_specs += [pl.BlockSpec(t.shape, lambda i: (0, 0, 0, 0)) for t in t_list]
    out_specs = tuple(pl.BlockSpec(s.shape, lambda i: (0, 0)) for s in out_shapes)

    kernel = functools.partial(_bridge_kernel, groups=groups,
                               n_w=len(w_arrs), n_t=n_t)
    outs = pl.pallas_call(
        kernel,
        out_shape=out_shapes,
        grid=(1,),                      # everything fits in VMEM: single step
        in_specs=in_specs,
        out_specs=out_specs,
        compiler_params=pltpu.CompilerParams(dimension_semantics=("arbitrary",)),
    )(bias.reshape(-1).astype(jnp.float32), *w_arrs, *t_list)

    return tuple(
        o.reshape(t.shape[0], 1, t.shape[2], t.shape[3])
        for o, t in zip(outs, t_list))


def spatial_att_bridge_ref(t_list, weight, bias):
    """Pure-JAX reference (mirrors the PyTorch module)."""
    outs = []
    for t in t_list:
        avg = jnp.mean(t, axis=1, keepdims=True)
        mx = jnp.max(t, axis=1, keepdims=True)
        att = jnp.concatenate([avg, mx], axis=1)
        conv = lax.conv_general_dilated(
            att, weight, window_strides=(1, 1),
            padding=((PAD, PAD), (PAD, PAD)),
            rhs_dilation=(DIL, DIL),
            dimension_numbers=("NCHW", "OIHW", "NCHW"),
            precision=lax.Precision.HIGHEST)
        outs.append(jax.nn.sigmoid(conv + bias.reshape(1, -1, 1, 1)))
    return tuple(outs)


if __name__ == "__main__":
    key = jax.random.PRNGKey(0)
    k_w, k_b, *k_ts = jax.random.split(key, 8)

    # deterministic synthetic conv params: Conv2d(2, 1, 7) -> (1, 2, 7, 7), bias (1,)
    fan_in = 2 * K * K
    bound = 1.0 / np.sqrt(fan_in)
    weight = jax.random.uniform(k_w, (1, 2, K, K), jnp.float32, -bound, bound)
    bias = jax.random.uniform(k_b, (1,), jnp.float32, -bound, bound)

    # six inputs with small, varied (C, H, W) as the UNet stages would give
    shapes = [
        (2, 4, 16, 16),
        (2, 6, 16, 16),
        (2, 8, 16, 16),
        (2, 12, 8, 8),
        (2, 16, 8, 8),
        (2, 24, 8, 8),
    ]
    t_list = [jax.random.normal(k, s, jnp.float32) for k, s in zip(k_ts, shapes)]

    outs = jax.block_until_ready(spatial_att_bridge(t_list, weight, bias))
    refs = spatial_att_bridge_ref(t_list, weight, bias)
    for o, r in zip(outs, refs):
        assert o.shape == r.shape and o.dtype == r.dtype
        # tolerance leaves headroom for the MXU's internal multi-pass f32 matmul
        np.testing.assert_allclose(np.asarray(o), np.asarray(r), rtol=5e-3, atol=5e-3)
    print("KERNEL_OK")
</pallas_src>

<mosaic_0001>
module attributes {stable_mosaic.version = 11 : i64} {
  func.func @_bridge_kernel(%arg0: i32, %arg1: memref<1xf32, #tpu.memory_space<smem>>, %arg2: memref<476x16xf32, #tpu.memory_space<vmem>>, %arg3: memref<364x8xf32, #tpu.memory_space<vmem>>, %arg4: memref<2x4x16x16xf32, #tpu.memory_space<vmem>>, %arg5: memref<2x6x16x16xf32, #tpu.memory_space<vmem>>, %arg6: memref<2x8x16x16xf32, #tpu.memory_space<vmem>>, %arg7: memref<2x12x8x8xf32, #tpu.memory_space<vmem>>, %arg8: memref<2x16x8x8xf32, #tpu.memory_space<vmem>>, %arg9: memref<2x24x8x8xf32, #tpu.memory_space<vmem>>, %arg10: memref<32x16xf32, #tpu.memory_space<vmem>>, %arg11: memref<32x16xf32, #tpu.memory_space<vmem>>, %arg12: memref<32x16xf32, #tpu.memory_space<vmem>>, %arg13: memref<16x8xf32, #tpu.memory_space<vmem>>, %arg14: memref<16x8xf32, #tpu.memory_space<vmem>>, %arg15: memref<16x8xf32, #tpu.memory_space<vmem>>) attributes {dimension_semantics = [#tpu.dimension_semantics<arbitrary>], iteration_bounds = array<i64: 1>, scalar_prefetch = 0 : i64, scratch_operands = 0 : i64, tpu.core_type = #tpu.core_type<tc>, window_params = [{transform_indices = @transform_0, window_bounds = array<i64: 1>}, {pipeline_mode = #tpu.pipeline_mode<synchronous>, transform_indices = @transform_1, window_bounds = array<i64: 476, 16>}, {pipeline_mode = #tpu.pipeline_mode<synchronous>, transform_indices = @transform_2, window_bounds = array<i64: 364, 8>}, {pipeline_mode = #tpu.pipeline_mode<synchronous>, transform_indices = @transform_3, window_bounds = array<i64: 2, 4, 16, 16>}, {pipeline_mode = #tpu.pipeline_mode<synchronous>, transform_indices = @transform_4, window_bounds = array<i64: 2, 6, 16, 16>}, {pipeline_mode = #tpu.pipeline_mode<synchronous>, transform_indices = @transform_5, window_bounds = array<i64: 2, 8, 16, 16>}, {pipeline_mode = #tpu.pipeline_mode<synchronous>, transform_indices = @transform_6, window_bounds = array<i64: 2, 12, 8, 8>}, {pipeline_mode = #tpu.pipeline_mode<synchronous>, transform_indices = @transform_7, window_bounds = array<i64: 2, 16, 8, 8>}, {pipeline_mode = #tpu.pipeline_mode<synchronous>, transform_indices = @transform_8, window_bounds = array<i64: 2, 24, 8, 8>}, {pipeline_mode = #tpu.pipeline_mode<synchronous>, transform_indices = @transform_9, window_bounds = array<i64: 32, 16>}, {pipeline_mode = #tpu.pipeline_mode<synchronous>, transform_indices = @transform_10, window_bounds = array<i64: 32, 16>}, {pipeline_mode = #tpu.pipeline_mode<synchronous>, transform_indices = @transform_11, window_bounds = array<i64: 32, 16>}, {pipeline_mode = #tpu.pipeline_mode<synchronous>, transform_indices = @transform_12, window_bounds = array<i64: 16, 8>}, {pipeline_mode = #tpu.pipeline_mode<synchronous>, transform_indices = @transform_13, window_bounds = array<i64: 16, 8>}, {pipeline_mode = #tpu.pipeline_mode<synchronous>, transform_indices = @transform_14, window_bounds = array<i64: 16, 8>}]} {
    %c0 = arith.constant 0 : index
    %0 = memref.load %arg1[%c0] : memref<1xf32, #tpu.memory_space<smem>>
    %c0_0 = arith.constant 0 : index
    %c0_1 = arith.constant 0 : index
    %1 = vector.load %arg2[%c0_0, %c0_1] : memref<476x16xf32, #tpu.memory_space<vmem>>, vector<476x16xf32>
    %cst = arith.constant 0.000000e+00 : f32
    %2 = vector.broadcast %cst : f32 to vector<16x9xf32>
    %cst_2 = arith.constant 0.000000e+00 : f32
    %3 = vector.broadcast %cst_2 : f32 to vector<16x18xf32>
    %cst_3 = arith.constant 0.000000e+00 : f32
    %4 = vector.broadcast %cst_3 : f32 to vector<9x68xf32>
    %c0_4 = arith.constant 0 : index
    %c0_5 = arith.constant 0 : index
    %c0_6 = arith.constant 0 : index
    %c0_7 = arith.constant 0 : index
    %5 = vector.load %arg4[%c0_4, %c0_5, %c0_6, %c0_7] : memref<2x4x16x16xf32, #tpu.memory_space<vmem>>, vector<1x4x16x16xf32>
    %6 = vector.shape_cast %5 : vector<1x4x16x16xf32> to vector<4x16x16xf32>
    %cst_8 = arith.constant dense<0.000000e+00> : vector<16x16xf32>
    %7 = vector.multi_reduction <add>, %6, %cst_8 [0] : vector<4x16x16xf32> to vector<16x16xf32>
    %cst_9 = arith.constant 2.500000e-01 : f32
    %8 = vector.broadcast %cst_9 : f32 to vector<16x16xf32>
    %9 = arith.mulf %7, %8 : vector<16x16xf32>
    %cst_10 = arith.constant dense<0xFF800000> : vector<16x16xf32>
    %10 = vector.multi_reduction <maximumf>, %6, %cst_10 [0] : vector<4x16x16xf32> to vector<16x16xf32>
    %11 = tpu.concatenate %2, %9, %3, %10, %2 in 1 : vector<16x9xf32>, vector<16x16xf32>, vector<16x18xf32>, vector<16x16xf32>, vector<16x9xf32> -> vector<16x68xf32>
    %12 = tpu.concatenate %4, %11, %4 in 0 : vector<9x68xf32>, vector<16x68xf32>, vector<9x68xf32> -> vector<34x68xf32>
    %13 = vector.extract_strided_slice %12 {offsets = [0, 0], sizes = [16, 68], strides = [1, 1]} : vector<34x68xf32> to vector<16x68xf32>
    %14 = vector.extract_strided_slice %12 {offsets = [3, 0], sizes = [16, 68], strides = [1, 1]} : vector<34x68xf32> to vector<16x68xf32>
    %15 = vector.extract_strided_slice %12 {offsets = [6, 0], sizes = [16, 68], strides = [1, 1]} : vector<34x68xf32> to vector<16x68xf32>
    %16 = vector.extract_strided_slice %12 {offsets = [9, 0], sizes = [16, 68], strides = [1, 1]} : vector<34x68xf32> to vector<16x68xf32>
    %17 = vector.extract_strided_slice %12 {offsets = [12, 0], sizes = [16, 68], strides = [1, 1]} : vector<34x68xf32> to vector<16x68xf32>
    %18 = vector.extract_strided_slice %12 {offsets = [15, 0], sizes = [16, 68], strides = [1, 1]} : vector<34x68xf32> to vector<16x68xf32>
    %19 = vector.extract_strided_slice %12 {offsets = [18, 0], sizes = [16, 68], strides = [1, 1]} : vector<34x68xf32> to vector<16x68xf32>
    %20 = tpu.concatenate %13, %14, %15, %16, %17, %18, %19 in 1 : vector<16x68xf32>, vector<16x68xf32>, vector<16x68xf32>, vector<16x68xf32>, vector<16x68xf32>, vector<16x68xf32>, vector<16x68xf32> -> vector<16x476xf32>
    %c1 = arith.constant 1 : index
    %c0_11 = arith.constant 0 : index
    %c0_12 = arith.constant 0 : index
    %c0_13 = arith.constant 0 : index
    %21 = vector.load %arg4[%c1, %c0_11, %c0_12, %c0_13] : memref<2x4x16x16xf32, #tpu.memory_space<vmem>>, vector<1x4x16x16xf32>
    %22 = vector.shape_cast %21 : vector<1x4x16x16xf32> to vector<4x16x16xf32>
    %cst_14 = arith.constant dense<0.000000e+00> : vector<16x16xf32>
    %23 = vector.multi_reduction <add>, %22, %cst_14 [0] : vector<4x16x16xf32> to vector<16x16xf32>
    %cst_15 = arith.constant 2.500000e-01 : f32
    %24 = vector.broadcast %cst_15 : f32 to vector<16x16xf32>
    %25 = arith.mulf %23, %24 : vector<16x16xf32>
    %cst_16 = arith.constant dense<0xFF800000> : vector<16x16xf32>
    %26 = vector.multi_reduction <maximumf>, %22, %cst_16 [0] : vector<4x16x16xf32> to vector<16x16xf32>
    %27 = tpu.concatenate %2, %25, %3, %26, %2 in 1 : vector<16x9xf32>, vector<16x16xf32>, vector<16x18xf32>, vector<16x16xf32>, vector<16x9xf32> -> vector<16x68xf32>
    %28 = tpu.concatenate %4, %27, %4 in 0 : vector<9x68xf32>, vector<16x68xf32>, vector<9x68xf32> -> vector<34x68xf32>
    %29 = vector.extract_strided_slice %28 {offsets = [0, 0], sizes = [16, 68], strides = [1, 1]} : vector<34x68xf32> to vector<16x68xf32>
    %30 = vector.extract_strided_slice %28 {offsets = [3, 0], sizes = [16, 68], strides = [1, 1]} : vector<34x68xf32> to vector<16x68xf32>
    %31 = vector.extract_strided_slice %28 {offsets = [6, 0], sizes = [16, 68], strides = [1, 1]} : vector<34x68xf32> to vector<16x68xf32>
    %32 = vector.extract_strided_slice %28 {offsets = [9, 0], sizes = [16, 68], strides = [1, 1]} : vector<34x68xf32> to vector<16x68xf32>
    %33 = vector.extract_strided_slice %28 {offsets = [12, 0], sizes = [16, 68], strides = [1, 1]} : vector<34x68xf32> to vector<16x68xf32>
    %34 = vector.extract_strided_slice %28 {offsets = [15, 0], sizes = [16, 68], strides = [1, 1]} : vector<34x68xf32> to vector<16x68xf32>
    %35 = vector.extract_strided_slice %28 {offsets = [18, 0], sizes = [16, 68], strides = [1, 1]} : vector<34x68xf32> to vector<16x68xf32>
    %36 = tpu.concatenate %29, %30, %31, %32, %33, %34, %35 in 1 : vector<16x68xf32>, vector<16x68xf32>, vector<16x68xf32>, vector<16x68xf32>, vector<16x68xf32>, vector<16x68xf32>, vector<16x68xf32> -> vector<16x476xf32>
    %c0_17 = arith.constant 0 : index
    %c0_18 = arith.constant 0 : index
    %c0_19 = arith.constant 0 : index
    %c0_20 = arith.constant 0 : index
    %37 = vector.load %arg5[%c0_17, %c0_18, %c0_19, %c0_20] : memref<2x6x16x16xf32, #tpu.memory_space<vmem>>, vector<1x6x16x16xf32>
    %38 = vector.shape_cast %37 : vector<1x6x16x16xf32> to vector<6x16x16xf32>
    %cst_21 = arith.constant dense<0.000000e+00> : vector<16x16xf32>
    %39 = vector.multi_reduction <add>, %38, %cst_21 [0] : vector<6x16x16xf32> to vector<16x16xf32>
    %cst_22 = arith.constant 0.166666672 : f32
    %40 = vector.broadcast %cst_22 : f32 to vector<16x16xf32>
    %41 = arith.mulf %39, %40 : vector<16x16xf32>
    %cst_23 = arith.constant dense<0xFF800000> : vector<16x16xf32>
    %42 = vector.multi_reduction <maximumf>, %38, %cst_23 [0] : vector<6x16x16xf32> to vector<16x16xf32>
    %43 = tpu.concatenate %2, %41, %3, %42, %2 in 1 : vector<16x9xf32>, vector<16x16xf32>, vector<16x18xf32>, vector<16x16xf32>, vector<16x9xf32> -> vector<16x68xf32>
    %44 = tpu.concatenate %4, %43, %4 in 0 : vector<9x68xf32>, vector<16x68xf32>, vector<9x68xf32> -> vector<34x68xf32>
    %45 = vector.extract_strided_slice %44 {offsets = [0, 0], sizes = [16, 68], strides = [1, 1]} : vector<34x68xf32> to vector<16x68xf32>
    %46 = vector.extract_strided_slice %44 {offsets = [3, 0], sizes = [16, 68], strides = [1, 1]} : vector<34x68xf32> to vector<16x68xf32>
    %47 = vector.extract_strided_slice %44 {offsets = [6, 0], sizes = [16, 68], strides = [1, 1]} : vector<34x68xf32> to vector<16x68xf32>
    %48 = vector.extract_strided_slice %44 {offsets = [9, 0], sizes = [16, 68], strides = [1, 1]} : vector<34x68xf32> to vector<16x68xf32>
    %49 = vector.extract_strided_slice %44 {offsets = [12, 0], sizes = [16, 68], strides = [1, 1]} : vector<34x68xf32> to vector<16x68xf32>
    %50 = vector.extract_strided_slice %44 {offsets = [15, 0], sizes = [16, 68], strides = [1, 1]} : vector<34x68xf32> to vector<16x68xf32>
    %51 = vector.extract_strided_slice %44 {offsets = [18, 0], sizes = [16, 68], strides = [1, 1]} : vector<34x68xf32> to vector<16x68xf32>
    %52 = tpu.concatenate %45, %46, %47, %48, %49, %50, %51 in 1 : vector<16x68xf32>, vector<16x68xf32>, vector<16x68xf32>, vector<16x68xf32>, vector<16x68xf32>, vector<16x68xf32>, vector<16x68xf32> -> vector<16x476xf32>
    %c1_24 = arith.constant 1 : index
    %c0_25 = arith.constant 0 : index
    %c0_26 = arith.constant 0 : index
    %c0_27 = arith.constant 0 : index
    %53 = vector.load %arg5[%c1_24, %c0_25, %c0_26, %c0_27] : memref<2x6x16x16xf32, #tpu.memory_space<vmem>>, vector<1x6x16x16xf32>
    %54 = vector.shape_cast %53 : vector<1x6x16x16xf32> to vector<6x16x16xf32>
    %cst_28 = arith.constant dense<0.000000e+00> : vector<16x16xf32>
    %55 = vector.multi_reduction <add>, %54, %cst_28 [0] : vector<6x16x16xf32> to vector<16x16xf32>
    %cst_29 = arith.constant 0.166666672 : f32
    %56 = vector.broadcast %cst_29 : f32 to vector<16x16xf32>
    %57 = arith.mulf %55, %56 : vector<16x16xf32>
    %cst_30 = arith.constant dense<0xFF800000> : vector<16x16xf32>
    %58 = vector.multi_reduction <maximumf>, %54, %cst_30 [0] : vector<6x16x16xf32> to vector<16x16xf32>
    %59 = tpu.concatenate %2, %57, %3, %58, %2 in 1 : vector<16x9xf32>, vector<16x16xf32>, vector<16x18xf32>, vector<16x16xf32>, vector<16x9xf32> -> vector<16x68xf32>
    %60 = tpu.concatenate %4, %59, %4 in 0 : vector<9x68xf32>, vector<16x68xf32>, vector<9x68xf32> -> vector<34x68xf32>
    %61 = vector.extract_strided_slice %60 {offsets = [0, 0], sizes = [16, 68], strides = [1, 1]} : vector<34x68xf32> to vector<16x68xf32>
    %62 = vector.extract_strided_slice %60 {offsets = [3, 0], sizes = [16, 68], strides = [1, 1]} : vector<34x68xf32> to vector<16x68xf32>
    %63 = vector.extract_strided_slice %60 {offsets = [6, 0], sizes = [16, 68], strides = [1, 1]} : vector<34x68xf32> to vector<16x68xf32>
    %64 = vector.extract_strided_slice %60 {offsets = [9, 0], sizes = [16, 68], strides = [1, 1]} : vector<34x68xf32> to vector<16x68xf32>
    %65 = vector.extract_strided_slice %60 {offsets = [12, 0], sizes = [16, 68], strides = [1, 1]} : vector<34x68xf32> to vector<16x68xf32>
    %66 = vector.extract_strided_slice %60 {offsets = [15, 0], sizes = [16, 68], strides = [1, 1]} : vector<34x68xf32> to vector<16x68xf32>
    %67 = vector.extract_strided_slice %60 {offsets = [18, 0], sizes = [16, 68], strides = [1, 1]} : vector<34x68xf32> to vector<16x68xf32>
    %68 = tpu.concatenate %61, %62, %63, %64, %65, %66, %67 in 1 : vector<16x68xf32>, vector<16x68xf32>, vector<16x68xf32>, vector<16x68xf32>, vector<16x68xf32>, vector<16x68xf32>, vector<16x68xf32> -> vector<16x476xf32>
    %c0_31 = arith.constant 0 : index
    %c0_32 = arith.constant 0 : index
    %c0_33 = arith.constant 0 : index
    %c0_34 = arith.constant 0 : index
    %69 = vector.load %arg6[%c0_31, %c0_32, %c0_33, %c0_34] : memref<2x8x16x16xf32, #tpu.memory_space<vmem>>, vector<1x8x16x16xf32>
    %70 = vector.shape_cast %69 : vector<1x8x16x16xf32> to vector<8x16x16xf32>
    %cst_35 = arith.constant dense<0.000000e+00> : vector<16x16xf32>
    %71 = vector.multi_reduction <add>, %70, %cst_35 [0] : vector<8x16x16xf32> to vector<16x16xf32>
    %cst_36 = arith.constant 1.250000e-01 : f32
    %72 = vector.broadcast %cst_36 : f32 to vector<16x16xf32>
    %73 = arith.mulf %71, %72 : vector<16x16xf32>
    %cst_37 = arith.constant dense<0xFF800000> : vector<16x16xf32>
    %74 = vector.multi_reduction <maximumf>, %70, %cst_37 [0] : vector<8x16x16xf32> to vector<16x16xf32>
    %75 = tpu.concatenate %2, %73, %3, %74, %2 in 1 : vector<16x9xf32>, vector<16x16xf32>, vector<16x18xf32>, vector<16x16xf32>, vector<16x9xf32> -> vector<16x68xf32>
    %76 = tpu.concatenate %4, %75, %4 in 0 : vector<9x68xf32>, vector<16x68xf32>, vector<9x68xf32> -> vector<34x68xf32>
    %77 = vector.extract_strided_slice %76 {offsets = [0, 0], sizes = [16, 68], strides = [1, 1]} : vector<34x68xf32> to vector<16x68xf32>
    %78 = vector.extract_strided_slice %76 {offsets = [3, 0], sizes = [16, 68], strides = [1, 1]} : vector<34x68xf32> to vector<16x68xf32>
    %79 = vector.extract_strided_slice %76 {offsets = [6, 0], sizes = [16, 68], strides = [1, 1]} : vector<34x68xf32> to vector<16x68xf32>
    %80 = vector.extract_strided_slice %76 {offsets = [9, 0], sizes = [16, 68], strides = [1, 1]} : vector<34x68xf32> to vector<16x68xf32>
    %81 = vector.extract_strided_slice %76 {offsets = [12, 0], sizes = [16, 68], strides = [1, 1]} : vector<34x68xf32> to vector<16x68xf32>
    %82 = vector.extract_strided_slice %76 {offsets = [15, 0], sizes = [16, 68], strides = [1, 1]} : vector<34x68xf32> to vector<16x68xf32>
    %83 = vector.extract_strided_slice %76 {offsets = [18, 0], sizes = [16, 68], strides = [1, 1]} : vector<34x68xf32> to vector<16x68xf32>
    %84 = tpu.concatenate %77, %78, %79, %80, %81, %82, %83 in 1 : vector<16x68xf32>, vector<16x68xf32>, vector<16x68xf32>, vector<16x68xf32>, vector<16x68xf32>, vector<16x68xf32>, vector<16x68xf32> -> vector<16x476xf32>
    %c1_38 = arith.constant 1 : index
    %c0_39 = arith.constant 0 : index
    %c0_40 = arith.constant 0 : index
    %c0_41 = arith.constant 0 : index
    %85 = vector.load %arg6[%c1_38, %c0_39, %c0_40, %c0_41] : memref<2x8x16x16xf32, #tpu.memory_space<vmem>>, vector<1x8x16x16xf32>
    %86 = vector.shape_cast %85 : vector<1x8x16x16xf32> to vector<8x16x16xf32>
    %cst_42 = arith.constant dense<0.000000e+00> : vector<16x16xf32>
    %87 = vector.multi_reduction <add>, %86, %cst_42 [0] : vector<8x16x16xf32> to vector<16x16xf32>
    %cst_43 = arith.constant 1.250000e-01 : f32
    %88 = vector.broadcast %cst_43 : f32 to vector<16x16xf32>
    %89 = arith.mulf %87, %88 : vector<16x16xf32>
    %cst_44 = arith.constant dense<0xFF800000> : vector<16x16xf32>
    %90 = vector.multi_reduction <maximumf>, %86, %cst_44 [0] : vector<8x16x16xf32> to vector<16x16xf32>
    %91 = tpu.concatenate %2, %89, %3, %90, %2 in 1 : vector<16x9xf32>, vector<16x16xf32>, vector<16x18xf32>, vector<16x16xf32>, vector<16x9xf32> -> vector<16x68xf32>
    %92 = tpu.concatenate %4, %91, %4 in 0 : vector<9x68xf32>, vector<16x68xf32>, vector<9x68xf32> -> vector<34x68xf32>
    %93 = vector.extract_strided_slice %92 {offsets = [0, 0], sizes = [16, 68], strides = [1, 1]} : vector<34x68xf32> to vector<16x68xf32>
    %94 = vector.extract_strided_slice %92 {offsets = [3, 0], sizes = [16, 68], strides = [1, 1]} : vector<34x68xf32> to vector<16x68xf32>
    %95 = vector.extract_strided_slice %92 {offsets = [6, 0], sizes = [16, 68], strides = [1, 1]} : vector<34x68xf32> to vector<16x68xf32>
    %96 = vector.extract_strided_slice %92 {offsets = [9, 0], sizes = [16, 68], strides = [1, 1]} : vector<34x68xf32> to vector<16x68xf32>
    %97 = vector.extract_strided_slice %92 {offsets = [12, 0], sizes = [16, 68], strides = [1, 1]} : vector<34x68xf32> to vector<16x68xf32>
    %98 = vector.extract_strided_slice %92 {offsets = [15, 0], sizes = [16, 68], strides = [1, 1]} : vector<34x68xf32> to vector<16x68xf32>
    %99 = vector.extract_strided_slice %92 {offsets = [18, 0], sizes = [16, 68], strides = [1, 1]} : vector<34x68xf32> to vector<16x68xf32>
    %100 = tpu.concatenate %93, %94, %95, %96, %97, %98, %99 in 1 : vector<16x68xf32>, vector<16x68xf32>, vector<16x68xf32>, vector<16x68xf32>, vector<16x68xf32>, vector<16x68xf32>, vector<16x68xf32> -> vector<16x476xf32>
    %101 = tpu.concatenate %20, %36, %52, %68, %84, %100 in 0 : vector<16x476xf32>, vector<16x476xf32>, vector<16x476xf32>, vector<16x476xf32>, vector<16x476xf32>, vector<16x476xf32> -> vector<96x476xf32>
    %cst_45 = arith.constant dense<0.000000e+00> : vector<96x16xf32>
    %102 = tpu.matmul %101, %1, %cst_45 {dimension_numbers = #tpu.dot_dimension_numbers<[1], [0], [0], [1], [0, 0, 1, 1], [], []>} : vector<96x476xf32>, vector<476x16xf32>, vector<96x16xf32> -> vector<96x16xf32>
    %103 = vector.broadcast %0 : f32 to vector<96x16xf32>
    %104 = arith.addf %102, %103 : vector<96x16xf32>
    %105 = arith.negf %104 : vector<96x16xf32>
    %106 = math.exp %105 : vector<96x16xf32>
    %cst_46 = arith.constant 1.000000e+00 : f32
    %107 = vector.broadcast %cst_46 : f32 to vector<96x16xf32>
    %108 = arith.addf %107, %106 : vector<96x16xf32>
    %109 = arith.divf %107, %108 : vector<96x16xf32>
    %110 = vector.extract_strided_slice %109 {offsets = [0, 0], sizes = [32, 16], strides = [1, 1]} : vector<96x16xf32> to vector<32x16xf32>
    %c0_47 = arith.constant 0 : index
    %c0_48 = arith.constant 0 : index
    %111 = vector.load %arg10[%c0_47, %c0_48] : memref<32x16xf32, #tpu.memory_space<vmem>>, vector<32x16xf32>
    tpu.vector_store %arg10[%c0_47, %c0_48], %110 {strides = array<i32>} : memref<32x16xf32, #tpu.memory_space<vmem>>, vector<32x16xf32>,
    %112 = vector.extract_strided_slice %109 {offsets = [32, 0], sizes = [32, 16], strides = [1, 1]} : vector<96x16xf32> to vector<32x16xf32>
    %c0_49 = arith.constant 0 : index
    %c0_50 = arith.constant 0 : index
    %113 = vector.load %arg11[%c0_49, %c0_50] : memref<32x16xf32, #tpu.memory_space<vmem>>, vector<32x16xf32>
    tpu.vector_store %arg11[%c0_49, %c0_50], %112 {strides = array<i32>} : memref<32x16xf32, #tpu.memory_space<vmem>>, vector<32x16xf32>,
    %114 = vector.extract_strided_slice %109 {offsets = [64, 0], sizes = [32, 16], strides = [1, 1]} : vector<96x16xf32> to vector<32x16xf32>
    %c0_51 = arith.constant 0 : index
    %c0_52 = arith.constant 0 : index
    %115 = vector.load %arg12[%c0_51, %c0_52] : memref<32x16xf32, #tpu.memory_space<vmem>>, vector<32x16xf32>
    tpu.vector_store %arg12[%c0_51, %c0_52], %114 {strides = array<i32>} : memref<32x16xf32, #tpu.memory_space<vmem>>, vector<32x16xf32>,
    %c0_53 = arith.constant 0 : index
    %c0_54 = arith.constant 0 : index
    %116 = vector.load %arg3[%c0_53, %c0_54] : memref<364x8xf32, #tpu.memory_space<vmem>>, vector<364x8xf32>
    %cst_55 = arith.constant 0.000000e+00 : f32
    %117 = vector.broadcast %cst_55 : f32 to vector<8x9xf32>
    %cst_56 = arith.constant 0.000000e+00 : f32
    %118 = vector.broadcast %cst_56 : f32 to vector<8x18xf32>
    %cst_57 = arith.constant 0.000000e+00 : f32
    %119 = vector.broadcast %cst_57 : f32 to vector<9x52xf32>
    %c0_58 = arith.constant 0 : index
    %c0_59 = arith.constant 0 : index
    %c0_60 = arith.constant 0 : index
    %c0_61 = arith.constant 0 : index
    %120 = vector.load %arg7[%c0_58, %c0_59, %c0_60, %c0_61] : memref<2x12x8x8xf32, #tpu.memory_space<vmem>>, vector<1x12x8x8xf32>
    %121 = vector.shape_cast %120 : vector<1x12x8x8xf32> to vector<12x8x8xf32>
    %cst_62 = arith.constant dense<0.000000e+00> : vector<8x8xf32>
    %122 = vector.multi_reduction <add>, %121, %cst_62 [0] : vector<12x8x8xf32> to vector<8x8xf32>
    %cst_63 = arith.constant 0.0833333358 : f32
    %123 = vector.broadcast %cst_63 : f32 to vector<8x8xf32>
    %124 = arith.mulf %122, %123 : vector<8x8xf32>
    %cst_64 = arith.constant dense<0xFF800000> : vector<8x8xf32>
    %125 = vector.multi_reduction <maximumf>, %121, %cst_64 [0] : vector<12x8x8xf32> to vector<8x8xf32>
    %126 = tpu.concatenate %117, %124, %118, %125, %117 in 1 : vector<8x9xf32>, vector<8x8xf32>, vector<8x18xf32>, vector<8x8xf32>, vector<8x9xf32> -> vector<8x52xf32>
    %127 = tpu.concatenate %119, %126, %119 in 0 : vector<9x52xf32>, vector<8x52xf32>, vector<9x52xf32> -> vector<26x52xf32>
    %128 = vector.extract_strided_slice %127 {offsets = [0, 0], sizes = [8, 52], strides = [1, 1]} : vector<26x52xf32> to vector<8x52xf32>
    %129 = vector.extract_strided_slice %127 {offsets = [3, 0], sizes = [8, 52], strides = [1, 1]} : vector<26x52xf32> to vector<8x52xf32>
    %130 = vector.extract_strided_slice %127 {offsets = [6, 0], sizes = [8, 52], strides = [1, 1]} : vector<26x52xf32> to vector<8x52xf32>
    %131 = vector.extract_strided_slice %127 {offsets = [9, 0], sizes = [8, 52], strides = [1, 1]} : vector<26x52xf32> to vector<8x52xf32>
    %132 = vector.extract_strided_slice %127 {offsets = [12, 0], sizes = [8, 52], strides = [1, 1]} : vector<26x52xf32> to vector<8x52xf32>
    %133 = vector.extract_strided_slice %127 {offsets = [15, 0], sizes = [8, 52], strides = [1, 1]} : vector<26x52xf32> to vector<8x52xf32>
    %134 = vector.extract_strided_slice %127 {offsets = [18, 0], sizes = [8, 52], strides = [1, 1]} : vector<26x52xf32> to vector<8x52xf32>
    %135 = tpu.concatenate %128, %129, %130, %131, %132, %133, %134 in 1 : vector<8x52xf32>, vector<8x52xf32>, vector<8x52xf32>, vector<8x52xf32>, vector<8x52xf32>, vector<8x52xf32>, vector<8x52xf32> -> vector<8x364xf32>
    %c1_65 = arith.constant 1 : index
    %c0_66 = arith.constant 0 : index
    %c0_67 = arith.constant 0 : index
    %c0_68 = arith.constant 0 : index
    %136 = vector.load %arg7[%c1_65, %c0_66, %c0_67, %c0_68] : memref<2x12x8x8xf32, #tpu.memory_space<vmem>>, vector<1x12x8x8xf32>
    %137 = vector.shape_cast %136 : vector<1x12x8x8xf32> to vector<12x8x8xf32>
    %cst_69 = arith.constant dense<0.000000e+00> : vector<8x8xf32>
    %138 = vector.multi_reduction <add>, %137, %cst_69 [0] : vector<12x8x8xf32> to vector<8x8xf32>
    %cst_70 = arith.constant 0.0833333358 : f32
    %139 = vector.broadcast %cst_70 : f32 to vector<8x8xf32>
    %140 = arith.mulf %138, %139 : vector<8x8xf32>
    %cst_71 = arith.constant dense<0xFF800000> : vector<8x8xf32>
    %141 = vector.multi_reduction <maximumf>, %137, %cst_71 [0] : vector<12x8x8xf32> to vector<8x8xf32>
    %142 = tpu.concatenate %117, %140, %118, %141, %117 in 1 : vector<8x9xf32>, vector<8x8xf32>, vector<8x18xf32>, vector<8x8xf32>, vector<8x9xf32> -> vector<8x52xf32>
    %143 = tpu.concatenate %119, %142, %119 in 0 : vector<9x52xf32>, vector<8x52xf32>, vector<9x52xf32> -> vector<26x52xf32>
    %144 = vector.extract_strided_slice %143 {offsets = [0, 0], sizes = [8, 52], strides = [1, 1]} : vector<26x52xf32> to vector<8x52xf32>
    %145 = vector.extract_strided_slice %143 {offsets = [3, 0], sizes = [8, 52], strides = [1, 1]} : vector<26x52xf32> to vector<8x52xf32>
    %146 = vector.extract_strided_slice %143 {offsets = [6, 0], sizes = [8, 52], strides = [1, 1]} : vector<26x52xf32> to vector<8x52xf32>
    %147 = vector.extract_strided_slice %143 {offsets = [9, 0], sizes = [8, 52], strides = [1, 1]} : vector<26x52xf32> to vector<8x52xf32>
    %148 = vector.extract_strided_slice %143 {offsets = [12, 0], sizes = [8, 52], strides = [1, 1]} : vector<26x52xf32> to vector<8x52xf32>
    %149 = vector.extract_strided_slice %143 {offsets = [15, 0], sizes = [8, 52], strides = [1, 1]} : vector<26x52xf32> to vector<8x52xf32>
    %150 = vector.extract_strided_slice %143 {offsets = [18, 0], sizes = [8, 52], strides = [1, 1]} : vector<26x52xf32> to vector<8x52xf32>
    %151 = tpu.concatenate %144, %145, %146, %147, %148, %149, %150 in 1 : vector<8x52xf32>, vector<8x52xf32>, vector<8x52xf32>, vector<8x52xf32>, vector<8x52xf32>, vector<8x52xf32>, vector<8x52xf32> -> vector<8x364xf32>
    %c0_72 = arith.constant 0 : index
    %c0_73 = arith.constant 0 : index
    %c0_74 = arith.constant 0 : index
    %c0_75 = arith.constant 0 : index
    %152 = vector.load %arg8[%c0_72, %c0_73, %c0_74, %c0_75] : memref<2x16x8x8xf32, #tpu.memory_space<vmem>>, vector<1x16x8x8xf32>
    %153 = vector.shape_cast %152 : vector<1x16x8x8xf32> to vector<16x8x8xf32>
    %cst_76 = arith.constant dense<0.000000e+00> : vector<8x8xf32>
    %154 = vector.multi_reduction <add>, %153, %cst_76 [0] : vector<16x8x8xf32> to vector<8x8xf32>
    %cst_77 = arith.constant 6.250000e-02 : f32
    %155 = vector.broadcast %cst_77 : f32 to vector<8x8xf32>
    %156 = arith.mulf %154, %155 : vector<8x8xf32>
    %cst_78 = arith.constant dense<0xFF800000> : vector<8x8xf32>
    %157 = vector.multi_reduction <maximumf>, %153, %cst_78 [0] : vector<16x8x8xf32> to vector<8x8xf32>
    %158 = tpu.concatenate %117, %156, %118, %157, %117 in 1 : vector<8x9xf32>, vector<8x8xf32>, vector<8x18xf32>, vector<8x8xf32>, vector<8x9xf32> -> vector<8x52xf32>
    %159 = tpu.concatenate %119, %158, %119 in 0 : vector<9x52xf32>, vector<8x52xf32>, vector<9x52xf32> -> vector<26x52xf32>
    %160 = vector.extract_strided_slice %159 {offsets = [0, 0], sizes = [8, 52], strides = [1, 1]} : vector<26x52xf32> to vector<8x52xf32>
    %161 = vector.extract_strided_slice %159 {offsets = [3, 0], sizes = [8, 52], strides = [1, 1]} : vector<26x52xf32> to vector<8x52xf32>
    %162 = vector.extract_strided_slice %159 {offsets = [6, 0], sizes = [8, 52], strides = [1, 1]} : vector<26x52xf32> to vector<8x52xf32>
    %163 = vector.extract_strided_slice %159 {offsets = [9, 0], sizes = [8, 52], strides = [1, 1]} : vector<26x52xf32> to vector<8x52xf32>
    %164 = vector.extract_strided_slice %159 {offsets = [12, 0], sizes = [8, 52], strides = [1, 1]} : vector<26x52xf32> to vector<8x52xf32>
    %165 = vector.extract_strided_slice %159 {offsets = [15, 0], sizes = [8, 52], strides = [1, 1]} : vector<26x52xf32> to vector<8x52xf32>
    %166 = vector.extract_strided_slice %159 {offsets = [18, 0], sizes = [8, 52], strides = [1, 1]} : vector<26x52xf32> to vector<8x52xf32>
    %167 = tpu.concatenate %160, %161, %162, %163, %164, %165, %166 in 1 : vector<8x52xf32>, vector<8x52xf32>, vector<8x52xf32>, vector<8x52xf32>, vector<8x52xf32>, vector<8x52xf32>, vector<8x52xf32> -> vector<8x364xf32>
    %c1_79 = arith.constant 1 : index
    %c0_80 = arith.constant 0 : index
    %c0_81 = arith.constant 0 : index
    %c0_82 = arith.constant 0 : index
    %168 = vector.load %arg8[%c1_79, %c0_80, %c0_81, %c0_82] : memref<2x16x8x8xf32, #tpu.memory_space<vmem>>, vector<1x16x8x8xf32>
    %169 = vector.shape_cast %168 : vector<1x16x8x8xf32> to vector<16x8x8xf32>
    %cst_83 = arith.constant dense<0.000000e+00> : vector<8x8xf32>
    %170 = vector.multi_reduction <add>, %169, %cst_83 [0] : vector<16x8x8xf32> to vector<8x8xf32>
    %cst_84 = arith.constant 6.250000e-02 : f32
    %171 = vector.broadcast %cst_84 : f32 to vector<8x8xf32>
    %172 = arith.mulf %170, %171 : vector<8x8xf32>
    %cst_85 = arith.constant dense<0xFF800000> : vector<8x8xf32>
    %173 = vector.multi_reduction <maximumf>, %169, %cst_85 [0] : vector<16x8x8xf32> to vector<8x8xf32>
    %174 = tpu.concatenate %117, %172, %118, %173, %117 in 1 : vector<8x9xf32>, vector<8x8xf32>, vector<8x18xf32>, vector<8x8xf32>, vector<8x9xf32> -> vector<8x52xf32>
    %175 = tpu.concatenate %119, %174, %119 in 0 : vector<9x52xf32>, vector<8x52xf32>, vector<9x52xf32> -> vector<26x52xf32>
    %176 = vector.extract_strided_slice %175 {offsets = [0, 0], sizes = [8, 52], strides = [1, 1]} : vector<26x52xf32> to vector<8x52xf32>
    %177 = vector.extract_strided_slice %175 {offsets = [3, 0], sizes = [8, 52], strides = [1, 1]} : vector<26x52xf32> to vector<8x52xf32>
    %178 = vector.extract_strided_slice %175 {offsets = [6, 0], sizes = [8, 52], strides = [1, 1]} : vector<26x52xf32> to vector<8x52xf32>
    %179 = vector.extract_strided_slice %175 {offsets = [9, 0], sizes = [8, 52], strides = [1, 1]} : vector<26x52xf32> to vector<8x52xf32>
    %180 = vector.extract_strided_slice %175 {offsets = [12, 0], sizes = [8, 52], strides = [1, 1]} : vector<26x52xf32> to vector<8x52xf32>
    %181 = vector.extract_strided_slice %175 {offsets = [15, 0], sizes = [8, 52], strides = [1, 1]} : vector<26x52xf32> to vector<8x52xf32>
    %182 = vector.extract_strided_slice %175 {offsets = [18, 0], sizes = [8, 52], strides = [1, 1]} : vector<26x52xf32> to vector<8x52xf32>
    %183 = tpu.concatenate %176, %177, %178, %179, %180, %181, %182 in 1 : vector<8x52xf32>, vector<8x52xf32>, vector<8x52xf32>, vector<8x52xf32>, vector<8x52xf32>, vector<8x52xf32>, vector<8x52xf32> -> vector<8x364xf32>
    %c0_86 = arith.constant 0 : index
    %c0_87 = arith.constant 0 : index
    %c0_88 = arith.constant 0 : index
    %c0_89 = arith.constant 0 : index
    %184 = vector.load %arg9[%c0_86, %c0_87, %c0_88, %c0_89] : memref<2x24x8x8xf32, #tpu.memory_space<vmem>>, vector<1x24x8x8xf32>
    %185 = vector.shape_cast %184 : vector<1x24x8x8xf32> to vector<24x8x8xf32>
    %cst_90 = arith.constant dense<0.000000e+00> : vector<8x8xf32>
    %186 = vector.multi_reduction <add>, %185, %cst_90 [0] : vector<24x8x8xf32> to vector<8x8xf32>
    %cst_91 = arith.constant 0.0416666679 : f32
    %187 = vector.broadcast %cst_91 : f32 to vector<8x8xf32>
    %188 = arith.mulf %186, %187 : vector<8x8xf32>
    %cst_92 = arith.constant dense<0xFF800000> : vector<8x8xf32>
    %189 = vector.multi_reduction <maximumf>, %185, %cst_92 [0] : vector<24x8x8xf32> to vector<8x8xf32>
    %190 = tpu.concatenate %117, %188, %118, %189, %117 in 1 : vector<8x9xf32>, vector<8x8xf32>, vector<8x18xf32>, vector<8x8xf32>, vector<8x9xf32> -> vector<8x52xf32>
    %191 = tpu.concatenate %119, %190, %119 in 0 : vector<9x52xf32>, vector<8x52xf32>, vector<9x52xf32> -> vector<26x52xf32>
    %192 = vector.extract_strided_slice %191 {offsets = [0, 0], sizes = [8, 52], strides = [1, 1]} : vector<26x52xf32> to vector<8x52xf32>
    %193 = vector.extract_strided_slice %191 {offsets = [3, 0], sizes = [8, 52], strides = [1, 1]} : vector<26x52xf32> to vector<8x52xf32>
    %194 = vector.extract_strided_slice %191 {offsets = [6, 0], sizes = [8, 52], strides = [1, 1]} : vector<26x52xf32> to vector<8x52xf32>
    %195 = vector.extract_strided_slice %191 {offsets = [9, 0], sizes = [8, 52], strides = [1, 1]} : vector<26x52xf32> to vector<8x52xf32>
    %196 = vector.extract_strided_slice %191 {offsets = [12, 0], sizes = [8, 52], strides = [1, 1]} : vector<26x52xf32> to vector<8x52xf32>
    %197 = vector.extract_strided_slice %191 {offsets = [15, 0], sizes = [8, 52], strides = [1, 1]} : vector<26x52xf32> to vector<8x52xf32>
    %198 = vector.extract_strided_slice %191 {offsets = [18, 0], sizes = [8, 52], strides = [1, 1]} : vector<26x52xf32> to vector<8x52xf32>
    %199 = tpu.concatenate %192, %193, %194, %195, %196, %197, %198 in 1 : vector<8x52xf32>, vector<8x52xf32>, vector<8x52xf32>, vector<8x52xf32>, vector<8x52xf32>, vector<8x52xf32>, vector<8x52xf32> -> vector<8x364xf32>
    %c1_93 = arith.constant 1 : index
    %c0_94 = arith.constant 0 : index
    %c0_95 = arith.constant 0 : index
    %c0_96 = arith.constant 0 : index
    %200 = vector.load %arg9[%c1_93, %c0_94, %c0_95, %c0_96] : memref<2x24x8x8xf32, #tpu.memory_space<vmem>>, vector<1x24x8x8xf32>
    %201 = vector.shape_cast %200 : vector<1x24x8x8xf32> to vector<24x8x8xf32>
    %cst_97 = arith.constant dense<0.000000e+00> : vector<8x8xf32>
    %202 = vector.multi_reduction <add>, %201, %cst_97 [0] : vector<24x8x8xf32> to vector<8x8xf32>
    %cst_98 = arith.constant 0.0416666679 : f32
    %203 = vector.broadcast %cst_98 : f32 to vector<8x8xf32>
    %204 = arith.mulf %202, %203 : vector<8x8xf32>
    %cst_99 = arith.constant dense<0xFF800000> : vector<8x8xf32>
    %205 = vector.multi_reduction <maximumf>, %201, %cst_99 [0] : vector<24x8x8xf32> to vector<8x8xf32>
    %206 = tpu.concatenate %117, %204, %118, %205, %117 in 1 : vector<8x9xf32>, vector<8x8xf32>, vector<8x18xf32>, vector<8x8xf32>, vector<8x9xf32> -> vector<8x52xf32>
    %207 = tpu.concatenate %119, %206, %119 in 0 : vector<9x52xf32>, vector<8x52xf32>, vector<9x52xf32> -> vector<26x52xf32>
    %208 = vector.extract_strided_slice %207 {offsets = [0, 0], sizes = [8, 52], strides = [1, 1]} : vector<26x52xf32> to vector<8x52xf32>
    %209 = vector.extract_strided_slice %207 {offsets = [3, 0], sizes = [8, 52], strides = [1, 1]} : vector<26x52xf32> to vector<8x52xf32>
    %210 = vector.extract_strided_slice %207 {offsets = [6, 0], sizes = [8, 52], strides = [1, 1]} : vector<26x52xf32> to vector<8x52xf32>
    %211 = vector.extract_strided_slice %207 {offsets = [9, 0], sizes = [8, 52], strides = [1, 1]} : vector<26x52xf32> to vector<8x52xf32>
    %212 = vector.extract_strided_slice %207 {offsets = [12, 0], sizes = [8, 52], strides = [1, 1]} : vector<26x52xf32> to vector<8x52xf32>
    %213 = vector.extract_strided_slice %207 {offsets = [15, 0], sizes = [8, 52], strides = [1, 1]} : vector<26x52xf32> to vector<8x52xf32>
    %214 = vector.extract_strided_slice %207 {offsets = [18, 0], sizes = [8, 52], strides = [1, 1]} : vector<26x52xf32> to vector<8x52xf32>
    %215 = tpu.concatenate %208, %209, %210, %211, %212, %213, %214 in 1 : vector<8x52xf32>, vector<8x52xf32>, vector<8x52xf32>, vector<8x52xf32>, vector<8x52xf32>, vector<8x52xf32>, vector<8x52xf32> -> vector<8x364xf32>
    %216 = tpu.concatenate %135, %151, %167, %183, %199, %215 in 0 : vector<8x364xf32>, vector<8x364xf32>, vector<8x364xf32>, vector<8x364xf32>, vector<8x364xf32>, vector<8x364xf32> -> vector<48x364xf32>
    %cst_100 = arith.constant dense<0.000000e+00> : vector<48x8xf32>
    %217 = tpu.matmul %216, %116, %cst_100 {dimension_numbers = #tpu.dot_dimension_numbers<[1], [0], [0], [1], [0, 0, 1, 1], [], []>} : vector<48x364xf32>, vector<364x8xf32>, vector<48x8xf32> -> vector<48x8xf32>
    %218 = vector.broadcast %0 : f32 to vector<48x8xf32>
    %219 = arith.addf %217, %218 : vector<48x8xf32>
    %220 = arith.negf %219 : vector<48x8xf32>
    %221 = math.exp %220 : vector<48x8xf32>
    %cst_101 = arith.constant 1.000000e+00 : f32
    %222 = vector.broadcast %cst_101 : f32 to vector<48x8xf32>
    %223 = arith.addf %222, %221 : vector<48x8xf32>
    %224 = arith.divf %222, %223 : vector<48x8xf32>
    %225 = vector.extract_strided_slice %224 {offsets = [0, 0], sizes = [16, 8], strides = [1, 1]} : vector<48x8xf32> to vector<16x8xf32>
    %c0_102 = arith.constant 0 : index
    %c0_103 = arith.constant 0 : index
    %226 = vector.load %arg13[%c0_102, %c0_103] : memref<16x8xf32, #tpu.memory_space<vmem>>, vector<16x8xf32>
    tpu.vector_store %arg13[%c0_102, %c0_103], %225 {strides = array<i32>} : memref<16x8xf32, #tpu.memory_space<vmem>>, vector<16x8xf32>,
    %227 = vector.extract_strided_slice %224 {offsets = [16, 0], sizes = [16, 8], strides = [1, 1]} : vector<48x8xf32> to vector<16x8xf32>
    %c0_104 = arith.constant 0 : index
    %c0_105 = arith.constant 0 : index
    %228 = vector.load %arg14[%c0_104, %c0_105] : memref<16x8xf32, #tpu.memory_space<vmem>>, vector<16x8xf32>
    tpu.vector_store %arg14[%c0_104, %c0_105], %227 {strides = array<i32>} : memref<16x8xf32, #tpu.memory_space<vmem>>, vector<16x8xf32>,
    %229 = vector.extract_strided_slice %224 {offsets = [32, 0], sizes = [16, 8], strides = [1, 1]} : vector<48x8xf32> to vector<16x8xf32>
    %c0_106 = arith.constant 0 : index
    %c0_107 = arith.constant 0 : index
    %230 = vector.load %arg15[%c0_106, %c0_107] : memref<16x8xf32, #tpu.memory_space<vmem>>, vector<16x8xf32>
    tpu.vector_store %arg15[%c0_106, %c0_107], %229 {strides = array<i32>} : memref<16x8xf32, #tpu.memory_space<vmem>>, vector<16x8xf32>,
    return
  }
  func.func @transform_0(%arg0: i32) -> i32 {
    %c0_i32 = arith.constant 0 : i32
    %c0_i32_0 = arith.constant 0 : i32
    return %c0_i32 : i32
  }
  func.func @transform_1(%arg0: i32) -> (i32, i32) {
    %c0_i32 = arith.constant 0 : i32
    %c0_i32_0 = arith.constant 0 : i32
    %c0_i32_1 = arith.constant 0 : i32
    return %c0_i32, %c0_i32_0 : i32, i32
  }
  func.func @transform_2(%arg0: i32) -> (i32, i32) {
    %c0_i32 = arith.constant 0 : i32
    %c0_i32_0 = arith.constant 0 : i32
    %c0_i32_1 = arith.constant 0 : i32
    return %c0_i32, %c0_i32_0 : i32, i32
  }
  func.func @transform_3(%arg0: i32) -> (i32, i32, i32, i32) {
    %c0_i32 = arith.constant 0 : i32
    %c0_i32_0 = arith.constant 0 : i32
    %c0_i32_1 = arith.constant 0 : i32
    %c0_i32_2 = arith.constant 0 : i32
    %c0_i32_3 = arith.constant 0 : i32
    return %c0_i32, %c0_i32_0, %c0_i32_1, %c0_i32_2 : i32, i32, i32, i32
  }
  func.func @transform_4(%arg0: i32) -> (i32, i32, i32, i32) {
    %c0_i32 = arith.constant 0 : i32
    %c0_i32_0 = arith.constant 0 : i32
    %c0_i32_1 = arith.constant 0 : i32
    %c0_i32_2 = arith.constant 0 : i32
    %c0_i32_3 = arith.constant 0 : i32
    return %c0_i32, %c0_i32_0, %c0_i32_1, %c0_i32_2 : i32, i32, i32, i32
  }
  func.func @transform_5(%arg0: i32) -> (i32, i32, i32, i32) {
    %c0_i32 = arith.constant 0 : i32
    %c0_i32_0 = arith.constant 0 : i32
    %c0_i32_1 = arith.constant 0 : i32
    %c0_i32_2 = arith.constant 0 : i32
    %c0_i32_3 = arith.constant 0 : i32
    return %c0_i32, %c0_i32_0, %c0_i32_1, %c0_i32_2 : i32, i32, i32, i32
  }
  func.func @transform_6(%arg0: i32) -> (i32, i32, i32, i32) {
    %c0_i32 = arith.constant 0 : i32
    %c0_i32_0 = arith.constant 0 : i32
    %c0_i32_1 = arith.constant 0 : i32
    %c0_i32_2 = arith.constant 0 : i32
    %c0_i32_3 = arith.constant 0 : i32
    return %c0_i32, %c0_i32_0, %c0_i32_1, %c0_i32_2 : i32, i32, i32, i32
  }
  func.func @transform_7(%arg0: i32) -> (i32, i32, i32, i32) {
    %c0_i32 = arith.constant 0 : i32
    %c0_i32_0 = arith.constant 0 : i32
    %c0_i32_1 = arith.constant 0 : i32
    %c0_i32_2 = arith.constant 0 : i32
    %c0_i32_3 = arith.constant 0 : i32
    return %c0_i32, %c0_i32_0, %c0_i32_1, %c0_i32_2 : i32, i32, i32, i32
  }
  func.func @transform_8(%arg0: i32) -> (i32, i32, i32, i32) {
    %c0_i32 = arith.constant 0 : i32
    %c0_i32_0 = arith.constant 0 : i32
    %c0_i32_1 = arith.constant 0 : i32
    %c0_i32_2 = arith.constant 0 : i32
    %c0_i32_3 = arith.constant 0 : i32
    return %c0_i32, %c0_i32_0, %c0_i32_1, %c0_i32_2 : i32, i32, i32, i32
  }
  func.func @transform_9(%arg0: i32) -> (i32, i32) {
    %c0_i32 = arith.constant 0 : i32
    %c0_i32_0 = arith.constant 0 : i32
    %c0_i32_1 = arith.constant 0 : i32
    return %c0_i32, %c0_i32_0 : i32, i32
  }
  func.func @transform_10(%arg0: i32) -> (i32, i32) {
    %c0_i32 = arith.constant 0 : i32
    %c0_i32_0 = arith.constant 0 : i32
    %c0_i32_1 = arith.constant 0 : i32
    return %c0_i32, %c0_i32_0 : i32, i32
  }
  func.func @transform_11(%arg0: i32) -> (i32, i32) {
    %c0_i32 = arith.constant 0 : i32
    %c0_i32_0 = arith.constant 0 : i32
    %c0_i32_1 = arith.constant 0 : i32
    return %c0_i32, %c0_i32_0 : i32, i32
  }
  func.func @transform_12(%arg0: i32) -> (i32, i32) {
    %c0_i32 = arith.constant 0 : i32
    %c0_i32_0 = arith.constant 0 : i32
    %c0_i32_1 = arith.constant 0 : i32
    return %c0_i32, %c0_i32_0 : i32, i32
  }
  func.func @transform_13(%arg0: i32) -> (i32, i32) {
    %c0_i32 = arith.constant 0 : i32
    %c0_i32_0 = arith.constant 0 : i32
    %c0_i32_1 = arith.constant 0 : i32
    return %c0_i32, %c0_i32_0 : i32, i32
  }
  func.func @transform_14(%arg0: i32) -> (i32, i32) {
    %c0_i32 = arith.constant 0 : i32
    %c0_i32_0 = arith.constant 0 : i32
    %c0_i32_1 = arith.constant 0 : i32
    return %c0_i32, %c0_i32_0 : i32, i32
  }
}

</mosaic_0001>

<bundles_post_ra>
// kernel: tpu_custom_call.1
= control target key start
LH: loop header
LB: loop body
LE: loop exit
PB: predicated region body
PF: predicated region fallthrough
CT: control target
= control target key end

     0   :  { %vm108_vm0 = vcmask 130048   ;;  %s3215_s23 = smov 43   ;;  %s3216_s17 = smov 9   ;;  %vm254_vm1 = vcmask 64512   ;;  %vm155_vm2 = vcmask 72704   ;;  %vm158_vm3 = vcmask 203776   ;;  %s6416_s3 = inlined_call_operand.vmem [shape: f32[2,4,16,16], index: 3, kind: input, shape index: {}]   ;;  %s6417_s4 = inlined_call_operand.vmem [shape: f32[2,6,16,16], index: 4, kind: input, shape index: {}]   ;;  %s6418_s5 = inlined_call_operand.vmem [shape: f32[2,8,16,16], index: 5, kind: input, shape index: {}]   ;;  %s6419_s6 = inlined_call_operand.vmem [shape: f32[2,12,8,8], index: 6, kind: input, shape index: {}]   ;;  %s6420_s1 = inlined_call_operand.vmem [shape: f32[476,16], index: 1, kind: input, shape index: {}]   ;;  %s6421_s7 = inlined_call_operand.vmem [shape: f32[2,16,8,8], index: 7, kind: input, shape index: {}]   ;;  %s6422_s8 = inlined_call_operand.vmem [shape: f32[2,24,8,8], index: 8, kind: input, shape index: {}]   ;;  %s6423_s0 = inlined_call_operand.<no memory space> [shape: f32[1], index: 0, kind: input, shape index: {}]   ;;  %s6424_s2 = inlined_call_operand.vmem [shape: f32[364,8], index: 2, kind: input, shape index: {}]   ;;  %s6425_s9 = inlined_call_operand.vmem [shape: f32[32,16], index: 9, kind: output, shape index: {0}]   ;;  %s6426_s10 = inlined_call_operand.vmem [shape: f32[32,16], index: 10, kind: output, shape index: {1}]   ;;  %s6427_s11 = inlined_call_operand.vmem [shape: f32[32,16], index: 11, kind: output, shape index: {2}]   ;;  %s6428_s12 = inlined_call_operand.vmem [shape: f32[16,8], index: 12, kind: output, shape index: {3}]   ;;  %s6429_s13 = inlined_call_operand.vmem [shape: f32[16,8], index: 13, kind: output, shape index: {4}]   ;;  %s6430_s14 = inlined_call_operand.vmem [shape: f32[16,8], index: 14, kind: output, shape index: {5}]  }
   0x1   :  { %v100_v0 = vld [vmem:[%s6416_s3] sm:$0xff]  ;;  %v102_v1 = vld [vmem:[%s6416_s3 + $0x10] sm:$0xff]  ;;  %v101_v8 = vld [vmem:[%s6416_s3 + $0x8] sm:$0xff]  ;;  %vm6452_vm4 = vcmask 351232   ;;  %vm164_vm5 = vcmask 482304   ;;  %vm169_vm6 = vcmask 1040384  }
   0x2   :  { %v104_v2 = vld [vmem:[%s6416_s3 + $0x20] sm:$0xff]  ;;  %v106_v3 = vld [vmem:[%s6416_s3 + $0x30] sm:$0xff]  ;;  %v110_v4 = vsel %vm108_vm0, %v102_v1, 0.0  ;;  %v125_v5 = vsel %vm108_vm0, %v100_v0, -inf  ;;  %v126_v6 = vsel %vm108_vm0, %v102_v1, -inf  ;;  %v109_v11 = vsel %vm108_vm0, %v100_v0, 0.0 }
   0x3   :  { %v127_v7 = vsel %vm108_vm0, %v104_v2, -inf  ;;  %v129_v10 = vsel %vm108_vm0, %v106_v3, -inf  ;;  %v112_v12 = vsel %vm108_vm0, %v104_v2, 0.0  ;;  %v103_v13 = vld [vmem:[%s6416_s3 + $0x18] sm:$0xff]  ;;  %v105_v14 = vld [vmem:[%s6416_s3 + $0x28] sm:$0xff]  ;;  %v111_v17 = vadd.f32 %v110_v4, %v109_v11  ;;  %v2814_v20 = vld [vmem:[%s6416_s3 + $0x40] sm:$0xff] }
   0x4   :  { %v128_v9 = vmax.f32 %v125_v5, %v127_v7  ;;  %v107_v15 = vld [vmem:[%s6416_s3 + $0x38] sm:$0xff]  ;;  %v130_v16 = vmax.f32 %v126_v6, %v129_v10  ;;  %v114_v18 = vsel %vm108_vm0, %v106_v3, 0.0  ;;  %v116_v19 = vsel %vm108_vm0, %v101_v8, 0.0  ;;  %v2816_v25 = vld [vmem:[%s6416_s3 + $0x50] sm:$0xff]  ;;  %v2818_v26 = vld [vmem:[%s6416_s3 + $0x60] sm:$0xff]  ;;  %s3219_s24 = smov 68  }
   0x5   :  { %v117_v21 = vsel %vm108_vm0, %v103_v13, 0.0  ;;  %v132_v22 = vsel %vm108_vm0, %v101_v8, -inf  ;;  %v133_v23 = vsel %vm108_vm0, %v103_v13, -inf  ;;  %v134_v24 = vsel %vm108_vm0, %v105_v14, -inf  ;;  %v2820_v35 = vld [vmem:[%s6416_s3 + $0x70] sm:$0xff]  ;;  %v3361_v36 = vld [vmem:[%s6416_s3 + $0x48] sm:$0xff] }
   0x6   :  { %v131_v27 = vmax.f32 %v128_v9, %v130_v16  ;;  %v113_v28 = vadd.f32 %v112_v12, %v111_v17  ;;  %v135_v29 = vmax.f32 %v132_v22, %v134_v24  ;;  %v136_v30 = vsel %vm108_vm0, %v107_v15, -inf  ;;  %v3370_v41 = vld [vmem:[%s6416_s3 + $0x58] sm:$0xff]  ;;  %v3375_v42 = vld [vmem:[%s6416_s3 + $0x68] sm:$0xff]  ;;  %v3419_v1 = vld [vmem:[%s6417_s4] sm:$0xff]  ;;  %s3220_s25 = smov 76   ;;  %s3221_s26 = smov 8  }
   0x7   :  { %v137_v31 = vmax.f32 %v133_v23, %v136_v30  ;;  %v118_v32 = vadd.f32 %v117_v21, %v116_v19  ;;  %v119_v33 = vsel %vm108_vm0, %v105_v14, 0.0  ;;  %v121_v34 = vsel %vm108_vm0, %v107_v15, 0.0  ;;  %v3380_v45 = vld [vmem:[%s6416_s3 + $0x78] sm:$0xff]  ;;  %v418_v54 = vld [vmem:[%s6417_s4 + $0x8] sm:$0xff]  ;;  %v3429_v6 = vld [vmem:[%s6417_s4 + $0x10] sm:$0xff]  ;;  %s3223_s27 = smov 84  }
   0x8   :  { %149 = vrot.lane.b32.xlu1 %v131_v27, %s3215_s23  ;;  %v115_v37 = vadd.f32 %v114_v18, %v113_v28  ;;  %v277_v38 = vsel %vm108_vm0, %v2814_v20, 0.0  ;;  %v278_v39 = vsel %vm108_vm0, %v2816_v25, 0.0  ;;  %v280_v40 = vsel %vm108_vm0, %v2818_v26, 0.0  ;;  %v420_v55 = vld [vmem:[%s6417_s4 + $0x18] sm:$0xff]  ;;  %v422_v60 = vld [vmem:[%s6417_s4 + $0x28] sm:$0xff]  ;;  %v3434_v7 = vld [vmem:[%s6417_s4 + $0x20] sm:$0xff] }
   0x9   :  { %v120_v43 = vadd.f32 %v119_v33, %v118_v32  ;;  %v279_v44 = vadd.f32 %v278_v39, %v277_v38  ;;  %v138_v47 = vmax.f32 %v135_v29, %v137_v31  ;;  %v282_v48 = vsel %vm108_vm0, %v2820_v35, 0.0  ;;  %v424_v0 = vld [vmem:[%s6417_s4 + $0x38] sm:$0xff]  ;;  %v426_v3 = vld [vmem:[%s6417_s4 + $0x48] sm:$0xff]  ;;  %v3447_v13 = vld [vmem:[%s6417_s4 + $0x30] sm:$0xff]  ;;  %s3224_s19 = smov 24  }
   0xa   :  { %v123_v46 = vmul.f32 0.25, %v115_v37  ;;  %v3385_v49 = vsel %vm108_vm0, %v3361_v36, -inf  ;;  %v3389_v52 = vsel %vm108_vm0, %v3370_v41, -inf  ;;  %v3393_v53 = vsel %vm108_vm0, %v3375_v42, -inf  ;;  %v428_v10 = vld [vmem:[%s6417_s4 + $0x58] sm:$0xff]  ;;  %v3452_v14 = vld [vmem:[%s6417_s4 + $0x60] sm:$0xff] }
   0xb   :  { %v122_v50 = vadd.f32 %v121_v34, %v120_v43  ;;  %v281_v51 = vadd.f32 %v280_v40, %v279_v44  ;;  %v3404_v56 = vsel %vm108_vm0, %v3380_v45, -inf  ;;  %v293_v57 = vsel %vm108_vm0, %v2814_v20, -inf  ;;  %v3461_v19 = vld [vmem:[%s6417_s4 + $0x70] sm:$0xff]  ;;  %v3466_v20 = vld [vmem:[%s6417_s4 + $0x80] sm:$0xff] }
   0xc   :  { %141 = vrot.lane.b32.xlu0 %v123_v46, %s3216_s17  ;;  %v294_v58 = vsel %vm108_vm0, %v2816_v25, -inf  ;;  %v295_v59 = vsel %vm108_vm0, %v2818_v26, -inf  ;;  %v297_v63 = vsel %vm108_vm0, %v2820_v35, -inf  ;;  %v440_v4 = vsel %vm108_vm0, %v418_v54, 0.0  ;;  %v3471_v23 = vld [vmem:[%s6417_s4 + $0x40] sm:$0xff]  ;;  %v3480_v26 = vld [vmem:[%s6417_s4 + $0x90] sm:$0xff] }
   0xd   :  { %v283_v61 = vadd.f32 %v282_v48, %v281_v51  ;;  %v296_v62 = vmax.f32 %v293_v57, %v295_v59  ;;  %v298_v2 = vmax.f32 %v294_v58, %v297_v63  ;;  %v441_v5 = vsel %vm108_vm0, %v420_v55, 0.0  ;;  %v3489_v32 = vld [vmem:[%s6417_s4 + $0x50] sm:$0xff] }
   0xe   :  { %v303_v8 = vmax.f32 %v3385_v49, %v3393_v53  ;;  %v305_v9 = vmax.f32 %v3389_v52, %v3404_v56  ;;  %v442_v11 = vadd.f32 %v441_v5, %v440_v4  ;;  %v443_v12 = vsel %vm108_vm0, %v422_v60, 0.0  ;;  %v2823_v4 = vld [vmem:[%s6417_s4 + $0x68] sm:$0xff] }
   0xf   :  { %v124_v15 = vmul.f32 0.25, %v122_v50  ;;  %v291_v16 = vmul.f32 0.25, %v283_v61  ;;  %v445_v17 = vsel %vm108_vm0, %v424_v0, 0.0  ;;  %v429_v18 = vsel %vm108_vm0, %v3419_v1, 0.0  ;;  %v3510_v50 = vld [vmem:[%s6417_s4 + $0xa0] sm:$0xff]  ;;  %v2832_v61 = vld [vmem:[%s6417_s4 + $0xb0] sm:$0xff] }
  0x10   :  { %151 = vrot.lane.b32.xlu1 %v138_v47, %s3215_s23  ;;  %v299_v21 = vmax.f32 %v296_v62, %v298_v2  ;;  %v444_v22 = vadd.f32 %v443_v12, %v442_v11  ;;  %v430_v24 = vsel %vm108_vm0, %v3429_v6, 0.0  ;;  %v432_v25 = vsel %vm108_vm0, %v3434_v7, 0.0 }
  0x11   :  { %v447_v27 = vsel %vm108_vm0, %v426_v3, 0.0  ;;  %v449_v28 = vsel %vm108_vm0, %v428_v10, 0.0  ;;  %v431_v29 = vadd.f32 %v430_v24, %v429_v18  ;;  %v598_v30 = vsel %vm108_vm0, %v3452_v14, 0.0 }
  0x12   :  { %v446_v31 = vadd.f32 %v445_v17, %v444_v22  ;;  %v434_v33 = vsel %vm108_vm0, %v3447_v13, 0.0  ;;  %v599_v34 = vsel %vm108_vm0, %v3461_v19, 0.0  ;;  %v601_v35 = vsel %vm108_vm0, %v3466_v20, 0.0  ;;  %v2831_v17 = vld [vmem:[%s6417_s4 + $0xa8] sm:$0xff] }
  0x13   :  { %v433_v37 = vadd.f32 %v432_v25, %v431_v29  ;;  %v436_v38 = vsel %vm108_vm0, %v3471_v23, 0.0  ;;  %v600_v39 = vadd.f32 %v599_v34, %v598_v30  ;;  %v603_v40 = vsel %vm108_vm0, %v3480_v26, 0.0 }
  0x14   :  { %143 = vrot.lane.b32.xlu0 %v124_v15, %s3216_s17  ;;  %v448_v43 = vadd.f32 %v447_v27, %v446_v31  ;;  %v464_v44 = vsel %vm108_vm0, %v418_v54, -inf  ;;  %v465_v46 = vsel %vm108_vm0, %v420_v55, -inf  ;;  %v466_v47 = vsel %vm108_vm0, %v422_v60, -inf }
  0x15   :  { %v435_v48 = vadd.f32 %v434_v33, %v433_v37  ;;  %v438_v49 = vsel %vm108_vm0, %v3489_v32, 0.0  ;;  %v602_v51 = vadd.f32 %v601_v35, %v600_v39  ;;  %v468_v52 = vsel %vm108_vm0, %v424_v0, -inf }
  0x16   :  { %v450_v53 = vadd.f32 %v449_v28, %v448_v43  ;;  %v467_v56 = vmax.f32 %v464_v44, %v466_v47  ;;  %v469_v57 = vmax.f32 %v465_v46, %v468_v52  ;;  %v470_v54 = vsel %vm108_vm0, %v426_v3, -inf }
  0x17   :  { %v437_v55 = vadd.f32 %v436_v38, %v435_v48  ;;  %v604_v58 = vadd.f32 %v603_v40, %v602_v51  ;;  %v472_v59 = vsel %vm108_vm0, %v428_v10, -inf  ;;  %v284_v60 = vsel %vm108_vm0, %v3361_v36, 0.0  ;;  %v2827_v36 = vld [vmem:[%s6417_s4 + $0x88] sm:$0xff] }
  0x18   :  { %309 = vrot.lane.b32.xlu1 %v291_v16, %s3216_s17  ;;  %v605_v62 = vsel %vm108_vm0, %v3510_v50, 0.0  ;;  %v285_v63 = vsel %vm108_vm0, %v3370_v41, 0.0  ;;  %v287_v0 = vsel %vm108_vm0, %v3375_v42, 0.0  ;;  %v306_v2 = vmax.f32 %v303_v8, %v305_v9  ;;  %v2825_v42 = vld [vmem:[%s6417_s4 + $0x78] sm:$0xff] }
  0x19   :  { %v286_v3 = vadd.f32 %v285_v63, %v284_v60  ;;  %v439_v5 = vadd.f32 %v438_v49, %v437_v55  ;;  %v3533_v10 = vmax.f32 %v467_v56, %v470_v54  ;;  %v3535_v11 = vmax.f32 %v469_v57, %v472_v59  ;;  %v2829_v8 = vld [vmem:[%s6417_s4 + $0x98] sm:$0xff] }
  0x1a   :  { %v289_v41 = vsel %vm108_vm0, %v3380_v45, 0.0  ;;  %v452_v9 = vmul.f32 0.16666667, %v450_v53  ;;  %v606_v12 = vadd.f32 %v605_v62, %v604_v58  ;;  %v607_v15 = vsel %vm108_vm0, %v2832_v61, 0.0  ;;  %v3614_v59 = vld [vmem:[%s6418_s5 + $0x38] sm:$0xff]  ;;  %v754_v62 = vld [vmem:[%s6418_s5] sm:$0xff] }
  0x1b   :  { %v288_v16 = vadd.f32 %v287_v0, %v286_v3  ;;  %v609_v45 = vsel %vm108_vm0, %v2823_v4, 0.0  ;;  %v610_v18 = vsel %vm108_vm0, %v2825_v42, 0.0  ;;  %v633_v22 = vsel %vm108_vm0, %v2823_v4, -inf  ;;  %v756_v3 = vld [vmem:[%s6418_s5 + $0x10] sm:$0xff]  ;;  %v758_v4 = vld [vmem:[%s6418_s5 + $0x20] sm:$0xff] }
  0x1c   :  { %317 = vrot.lane.b32.xlu0 %v299_v21, %s3215_s23  ;;  %v635_v24 = vsel %vm108_vm0, %v2827_v36, -inf  ;;  %v2833_v21 = vld [vmem:[%s6417_s4 + $0xb8] sm:$0xff]  ;;  %v634_v27 = vsel %vm108_vm0, %v2825_v42, -inf  ;;  %v637_v29 = vsel %vm108_vm0, %v2829_v8, -inf  ;;  %v451_v30 = vmul.f32 0.16666667, %v439_v5 }
  0x1d   :  { %v290_v25 = vadd.f32 %v289_v41, %v288_v16  ;;  %v636_v28 = vmax.f32 %v633_v22, %v635_v24  ;;  %v474_v31 = vmax.f32 %v3533_v10, %v3535_v11  ;;  %v612_v33 = vsel %vm108_vm0, %v2827_v36, 0.0  ;;  %v3640_v42 = vld [vmem:[%s6418_s5 + $0x48] sm:$0xff] }
  0x1e   :  { %v639_v34 = vsel %vm108_vm0, %v2831_v17, -inf  ;;  %v3564_v35 = vadd.f32 %v607_v15, %v606_v12  ;;  %v622_v38 = vsel %vm108_vm0, %v3452_v14, -inf  ;;  %v624_v39 = vsel %vm108_vm0, %v3466_v20, -inf }
  0x1f   :  { %v292_v37 = vmul.f32 0.25, %v290_v25  ;;  %v611_v40 = vadd.f32 %v610_v18, %v609_v45  ;;  %v638_v43 = vmax.f32 %v634_v27, %v637_v29  ;;  %v641_v44 = vsel %vm108_vm0, %v2833_v21, -inf  ;;  %v3652_v45 = vld [vmem:[%s6418_s5 + $0x58] sm:$0xff] }
  0x20   :  { %319 = vrot.lane.b32.xlu1 %v306_v2, %s3215_s23  ;;  %v623_v46 = vsel %vm108_vm0, %v3461_v19, -inf  ;;  %v3574_v47 = vmax.f32 %v636_v28, %v639_v34  ;;  %v626_v48 = vsel %vm108_vm0, %v3480_v26, -inf  ;;  %v453_v14 = vsel %vm108_vm0, %v3419_v1, -inf  ;;  %v3591_v26 = vld [vmem:[%s6418_s5 + $0x8] sm:$0xff]  ;;  %v762_v28 = vld [vmem:[%s6418_s5 + $0x40] sm:$0xff] }
  0x21   :  { %311 = vrot.lane.b32.xlu2 %v292_v37, %s3216_s17  ;;  %v454_v20 = vsel %vm108_vm0, %v3429_v6, -inf  ;;  %v625_v49 = vmax.f32 %v622_v38, %v624_v39  ;;  %v455_v51 = vsel %vm108_vm0, %v3434_v7, -inf  ;;  %v457_v19 = vsel %vm108_vm0, %v3447_v13, -inf  ;;  %v3601_v13 = vld [vmem:[%s6418_s5 + $0x18] sm:$0xff]  ;;  %v764_v37 = vld [vmem:[%s6418_s5 + $0x50] sm:$0xff] }
  0x22   :  { %v459_v52 = vsel %vm108_vm0, %v3471_v23, -inf  ;;  %v628_v1 = vsel %vm108_vm0, %v3510_v50, -inf  ;;  %v456_v6 = vmax.f32 %v453_v14, %v455_v51  ;;  %v458_v53 = vmax.f32 %v454_v20, %v457_v19  ;;  %v3606_v23 = vld [vmem:[%s6418_s5 + $0x28] sm:$0xff]  ;;  %v3708_v20 = vld [vmem:[%s6418_s5 + $0x60] sm:$0xff] }
  0x23   :  { %v461_v7 = vsel %vm108_vm0, %v3489_v32, -inf  ;;  %v627_v56 = vmax.f32 %v623_v46, %v626_v48  ;;  %v630_v57 = vsel %vm108_vm0, %v2832_v61, -inf  ;;  %v613_v54 = vadd.f32 %v612_v33, %v611_v40  ;;  %v3674_v33 = vld [vmem:[%s6418_s5 + $0x78] sm:$0xff]  ;;  %v3701_v48 = vld [vmem:[%s6418_s5 + $0xa8] sm:$0xff] }
  0x24   :  { %477 = vrot.lane.b32.xlu0 %v451_v30, %s3216_s17  ;;  %v614_v50 = vsel %vm108_vm0, %v2829_v8, 0.0  ;;  %v460_v55 = vmax.f32 %v456_v6, %v459_v52  ;;  %v462_v58 = vmax.f32 %v458_v53, %v461_v7  ;;  %v616_v32 = vsel %vm108_vm0, %v2831_v17, 0.0  ;;  %v3723_v7 = vld [vmem:[%s6418_s5 + $0xb8] sm:$0xff] }
  0x25   :  { %v785_v60 = vsel %vm108_vm0, %v3591_v26, 0.0  ;;  %v3621_v61 = vmax.f32 %v638_v43, %v641_v44  ;;  %v615_v63 = vadd.f32 %v614_v50, %v613_v54  ;;  %v786_v0 = vsel %vm108_vm0, %v3601_v13, 0.0  ;;  %v3731_v50 = vld [vmem:[%s6418_s5 + $0xc8] sm:$0xff] }
  0x26   :  { %v788_v2 = vsel %vm108_vm0, %v3606_v23, 0.0  ;;  %v3634_v36 = vmax.f32 %v625_v49, %v628_v1  ;;  %v463_v5 = vmax.f32 %v460_v55, %v462_v58  ;;  %v618_v41 = vsel %vm108_vm0, %v2833_v21, 0.0  ;;  %v3659_v21 = vld [vmem:[%s6418_s5 + $0x68] sm:$0xff]  ;;  %v3713_v49 = vld [vmem:[%s6418_s5 + $0x70] sm:$0xff] }
  0x27   :  { %v787_v8 = vadd.f32 %v786_v0, %v785_v60  ;;  %v631_v12 = vmax.f32 %v627_v56, %v630_v57  ;;  %v617_v15 = vadd.f32 %v616_v32, %v615_v63  ;;  %v790_v16 = vsel %vm108_vm0, %v3614_v59, 0.0 }
  0x28   :  { %479 = vrot.lane.b32.xlu1 %v452_v9, %s3216_s17  ;;  %v760_v9 = vld [vmem:[%s6418_s5 + $0x30] sm:$0xff]  ;;  %v770_v17 = vsel %vm108_vm0, %v754_v62, 0.0  ;;  %v771_v22 = vsel %vm108_vm0, %v756_v3, 0.0  ;;  %v773_v24 = vsel %vm108_vm0, %v758_v4, 0.0  ;;  %v792_v27 = vsel %vm108_vm0, %v3640_v42, 0.0 }
  0x29   :  { %485 = vrot.lane.b32.xlu2 %v463_v5, %s3215_s23  ;;  %v789_v18 = vadd.f32 %v788_v2, %v787_v8  ;;  %v619_v25 = vadd.f32 %v618_v41, %v617_v15  ;;  %v772_v29 = vadd.f32 %v771_v22, %v770_v17  ;;  %v620_v30 = vmul.f32 0.16666667, %v3564_v35 }
  0x2a   :  { %v775_v38 = vsel %vm108_vm0, %v760_v9, 0.0  ;;  %v643_v35 = vmax.f32 %v3574_v47, %v3621_v61  ;;  %v632_v39 = vmax.f32 %v3634_v36, %v631_v12  ;;  %v794_v10 = vsel %vm108_vm0, %v3652_v45, 0.0  ;;  %v3696_v47 = vld [vmem:[%s6418_s5 + $0x98] sm:$0xff] }
  0x2b   :  { %v791_v34 = vadd.f32 %v790_v16, %v789_v18  ;;  %v774_v11 = vadd.f32 %v773_v24, %v772_v29  ;;  %v621_v40 = vmul.f32 0.16666667, %v619_v25  ;;  %v796_v44 = vsel %vm108_vm0, %v3659_v21, 0.0  ;;  %v3745_v61 = vld [vmem:[%s6418_s5 + $0xd8] sm:$0xff]  ;;  %v3763_v18 = vld [vmem:[%s6418_s5 + $0xe8] sm:$0xff] }
  0x2c   :  { %487 = vrot.lane.b32.xlu0 %v474_v31, %s3215_s23  ;;  %v3688_v31 = vld [vmem:[%s6418_s5 + $0x88] sm:$0xff]  ;;  %v777_v46 = vsel %vm108_vm0, %v762_v28, 0.0  ;;  %v798_v14 = vsel %vm108_vm0, %v3674_v33, 0.0  ;;  %v779_v19 = vsel %vm108_vm0, %v764_v37, 0.0  ;;  %v802_v52 = vsel %vm108_vm0, %v754_v62, -inf }
  0x2d   :  { %v793_v43 = vadd.f32 %v792_v27, %v791_v34  ;;  %v776_v51 = vadd.f32 %v775_v38, %v774_v11  ;;  %v803_v6 = vsel %vm108_vm0, %v756_v3, -inf  ;;  %v804_v53 = vsel %vm108_vm0, %v758_v4, -inf }
  0x2e   :  { %v974_v56 = vsel %vm108_vm0, %v3688_v31, 0.0  ;;  %v806_v54 = vsel %vm108_vm0, %v760_v9, -inf  ;;  %v975_v55 = vsel %vm108_vm0, %v3696_v47, 0.0  ;;  %v977_v58 = vsel %vm108_vm0, %v3701_v48, 0.0 }
  0x2f   :  { %v795_v1 = vadd.f32 %v794_v10, %v793_v43  ;;  %v778_v57 = vadd.f32 %v777_v46, %v776_v51  ;;  %v781_v60 = vsel %vm108_vm0, %v3708_v20, 0.0  ;;  %v783_v62 = vsel %vm108_vm0, %v3713_v49, 0.0 }
  0x30   :  { %646 = vrot.lane.b32.xlu1 %v620_v30, %s3216_s17  ;;  %v976_v63 = vadd.f32 %v975_v55, %v974_v56  ;;  %v805_v2 = vmax.f32 %v802_v52, %v804_v53  ;;  %v808_v3 = vsel %vm108_vm0, %v762_v28, -inf  ;;  %v979_v4 = vsel %vm108_vm0, %v3723_v7, 0.0 }
  0x31   :  { %648 = vrot.lane.b32.xlu2 %v621_v40, %s3216_s17  ;;  %v797_v32 = vadd.f32 %v796_v44, %v795_v1  ;;  %v780_v0 = vadd.f32 %v779_v19, %v778_v57  ;;  %v807_v36 = vmax.f32 %v803_v6, %v806_v54  ;;  %v810_v5 = vsel %vm108_vm0, %v764_v37, -inf  ;;  %v3813_v57 = vld [vmem:[%s6419_s6 + $0x10] sm:$0xff] }
  0x32   :  { %v978_v41 = vadd.f32 %v977_v58, %v976_v63  ;;  %v981_v8 = vsel %vm108_vm0, %v3731_v50, 0.0  ;;  %v983_v15 = vsel %vm108_vm0, %v3745_v61, 0.0  ;;  %v817_v16 = vsel %vm108_vm0, %v3591_v26, -inf  ;;  %v3820_v58 = vld [vmem:[%s6419_s6 + $0x18] sm:$0xff]  ;;  %v2836_v63 = vld [vmem:[%s6418_s5 + $0x90] sm:$0xff] }
  0x33   :  { %v782_v12 = vadd.f32 %v781_v60, %v780_v0  ;;  %v818_v9 = vsel %vm108_vm0, %v3601_v13, -inf  ;;  %v799_v17 = vadd.f32 %v798_v14, %v797_v32  ;;  %v819_v24 = vsel %vm108_vm0, %v3606_v23, -inf  ;;  %v3775_v13 = vld [vmem:[%s6418_s5 + $0xf8] sm:$0xff]  ;;  %v3833_v0 = vld [vmem:[%s6419_s6 + $0x20] sm:$0xff] }
  0x34   :  { %654 = vrot.lane.b32.xlu0 %v632_v39, %s3215_s23  ;;  %v980_v22 = vadd.f32 %v979_v4, %v978_v41  ;;  %v821_v25 = vsel %vm108_vm0, %v3614_v59, -inf  ;;  %v820_v28 = vmax.f32 %v817_v16, %v819_v24  ;;  %v823_v26 = vsel %vm108_vm0, %v3640_v42, -inf  ;;  %v2840_v41 = vld [vmem:[%s6418_s5 + $0xb0] sm:$0xff] }
  0x35   :  { %v784_v27 = vadd.f32 %v783_v62, %v782_v12  ;;  %v822_v29 = vmax.f32 %v818_v9, %v821_v25  ;;  %v825_v23 = vsel %vm108_vm0, %v3652_v45, -inf  ;;  %v827_v59 = vsel %vm108_vm0, %v3659_v21, -inf  ;;  %v2834_v62 = vld [vmem:[%s6418_s5 + $0x80] sm:$0xff] }
  0x36   :  { %v982_v30 = vadd.f32 %v981_v8, %v980_v22  ;;  %v829_v34 = vsel %vm108_vm0, %v3674_v33, -inf  ;;  %v985_v42 = vsel %vm108_vm0, %v3763_v18, 0.0  ;;  %v824_v38 = vmax.f32 %v820_v28, %v823_v26  ;;  %v2844_v22 = vld [vmem:[%s6418_s5 + $0xd0] sm:$0xff] }
  0x37   :  { %v800_v37 = vmul.f32 0.125, %v784_v27  ;;  %v987_v10 = vsel %vm108_vm0, %v3775_v13, 0.0  ;;  %v801_v43 = vmul.f32 0.125, %v799_v17  ;;  %v809_v45 = vmax.f32 %v805_v2, %v808_v3  ;;  %v2842_v17 = vld [vmem:[%s6418_s5 + $0xc0] sm:$0xff] }
  0x38   :  { %656 = vrot.lane.b32.xlu1 %v643_v35, %s3215_s23  ;;  %v826_v35 = vmax.f32 %v822_v29, %v825_v23  ;;  %v984_v39 = vadd.f32 %v983_v15, %v982_v30  ;;  %v828_v11 = vmax.f32 %v824_v38, %v827_v59  ;;  %v811_v21 = vmax.f32 %v807_v36, %v810_v5  ;;  %v2838_v5 = vld [vmem:[%s6418_s5 + $0xa0] sm:$0xff]  ;;  %v2848_v59 = vld [vmem:[%s6418_s5 + $0xf0] sm:$0xff] }
  0x39   :  { %v812_v33 = vsel %vm108_vm0, %v3708_v20, -inf  ;;  %v814_v46 = vsel %vm108_vm0, %v3713_v49, -inf  ;;  %v3799_v20 = vld [vmem:[%s6419_s6] sm:$0xff]  ;;  %v3804_v49 = vld [vmem:[%s6419_s6 + $0x8] sm:$0xff]  ;;  %v1685_v55 = vsel %vm254_vm1, %v3813_v57, 0.0  ;;  %v1687_v60 = vsel %vm254_vm1, %v3820_v58, 0.0 }
  0x3a   :  { %v830_v40 = vmax.f32 %v826_v35, %v829_v34  ;;  %v986_v44 = vadd.f32 %v985_v42, %v984_v39  ;;  %v813_v19 = vmax.f32 %v809_v45, %v812_v33  ;;  %v815_v52 = vmax.f32 %v811_v21, %v814_v46  ;;  %v2846_v23 = vld [vmem:[%s6418_s5 + $0xe0] sm:$0xff]  ;;  %s3222_s5 = smov 16  }
  0x3b   :  { %v1682_v53 = vsel %vm254_vm1, %v3799_v20, 0.0  ;;  %v1683_v56 = vsel %vm254_vm1, %v3804_v49, 0.0  ;;  %v959_v3 = vsel %vm108_vm0, %v2834_v62, 0.0  ;;  %v960_v4 = vsel %vm108_vm0, %v2836_v63, 0.0 }
  0x3c   :  { %834 = vrot.lane.b32.xlu0 %v800_v37, %s3216_s17  ;;  %v831_v14 = vmax.f32 %v828_v11, %v830_v40  ;;  %v988_v51 = vadd.f32 %v987_v10, %v986_v44  ;;  %v816_v6 = vmax.f32 %v813_v19, %v815_v52  ;;  %v1684_v54 = vadd.f32 %v1683_v56, %v1682_v53  ;;  %v1676_v52 = vld [vmem:[%s6419_s6 + $0x30] sm:$0xff] }
  0x3d   :  { %v1689_v36 = vsel %vm254_vm1, %v3833_v0, 0.0  ;;  %v961_v8 = vadd.f32 %v960_v4, %v959_v3  ;;  %v962_v12 = vsel %vm108_vm0, %v2838_v5, 0.0  ;;  %v991_v15 = vsel %vm108_vm0, %v2834_v62, -inf }
  0x3e   :  { %844 = vrot.lane.b32.xlu2 %v831_v14, %s3215_s23  ;;  %v990_v1 = vmul.f32 0.125, %v988_v51  ;;  %v1686_v32 = vadd.f32 %v1685_v55, %v1684_v54  ;;  %v992_v16 = vsel %vm108_vm0, %v2836_v63, -inf  ;;  %v993_v9 = vsel %vm108_vm0, %v2838_v5, -inf  ;;  %v1678_v54 = vld [vmem:[%s6419_s6 + $0x40] sm:$0xff]  ;;  %v1679_v63 = vld [vmem:[%s6419_s6 + $0x48] sm:$0xff] }
  0x3f   :  { %v994_v24 = vmax.f32 %v991_v15, %v993_v9  ;;  %v995_v25 = vsel %vm108_vm0, %v2840_v41, -inf  ;;  %v963_v28 = vadd.f32 %v962_v12, %v961_v8  ;;  %v997_v26 = vsel %vm108_vm0, %v2842_v17, -inf  ;;  %v1681_v8 = vld [vmem:[%s6419_s6 + $0x58] sm:$0xff] }
  0x40   :  { %836 = vrot.lane.b32.xlu1 %v801_v43, %s3216_s17  ;;  %v1688_v2 = vadd.f32 %v1687_v60, %v1686_v32  ;;  %v996_v29 = vmax.f32 %v992_v16, %v995_v25  ;;  %v999_v30 = vsel %vm108_vm0, %v2844_v22, -inf  ;;  %v1006_v37 = vsel %vm108_vm0, %v3688_v31, -inf }
  0x41   :  { %v998_v34 = vmax.f32 %v994_v24, %v997_v26  ;;  %v1007_v42 = vsel %vm108_vm0, %v3696_v47, -inf  ;;  %v1008_v38 = vsel %vm108_vm0, %v3701_v48, -inf  ;;  %v964_v35 = vsel %vm108_vm0, %v2840_v41, 0.0  ;;  %v1675_v47 = vld [vmem:[%s6419_s6 + $0x28] sm:$0xff]  ;;  %v1680_v41 = vld [vmem:[%s6419_s6 + $0x50] sm:$0xff] }
  0x42   :  { %v1690_v27 = vadd.f32 %v1689_v36, %v1688_v2  ;;  %v1000_v39 = vmax.f32 %v996_v29, %v999_v30  ;;  %v1001_v10 = vsel %vm108_vm0, %v2846_v23, -inf  ;;  %v1003_v11 = vsel %vm108_vm0, %v2848_v59, -inf }
  0x43   :  { %v1002_v40 = vmax.f32 %v998_v34, %v1001_v10  ;;  %v1009_v43 = vmax.f32 %v1006_v37, %v1008_v38  ;;  %v1010_v45 = vsel %vm108_vm0, %v3723_v7, -inf  ;;  %v1012_v31 = vsel %vm108_vm0, %v3731_v50, -inf }
  0x44   :  { %1025 = vrot.lane.b32.xlu0 %v990_v1, %s3216_s17  ;;  %v1004_v48 = vmax.f32 %v1000_v39, %v1003_v11  ;;  %v1011_v21 = vmax.f32 %v1007_v42, %v1010_v45  ;;  %v1014_v44 = vsel %vm108_vm0, %v3745_v61, -inf  ;;  %v1016_v33 = vsel %vm108_vm0, %v3763_v18, -inf  ;;  %v1677_v18 = vld [vmem:[%s6419_s6 + $0x38] sm:$0xff] }
  0x45   :  { %v966_v46 = vsel %vm108_vm0, %v2842_v17, 0.0  ;;  %v1013_v14 = vmax.f32 %v1009_v43, %v1012_v31  ;;  %v1018_v7 = vsel %vm108_vm0, %v3775_v13, -inf  ;;  %v965_v51 = vadd.f32 %v964_v35, %v963_v28 }
  0x46   :  { %v1005_v50 = vmax.f32 %v1002_v40, %v1004_v48  ;;  %v1015_v19 = vmax.f32 %v1011_v21, %v1014_v44  ;;  %v1691_v1 = vsel %vm254_vm1, %v1675_v47, 0.0  ;;  %v968_v61 = vsel %vm108_vm0, %v2844_v22, 0.0 }
  0x47   :  { %v967_v13 = vadd.f32 %v966_v46, %v965_v51  ;;  %v970_v56 = vsel %vm108_vm0, %v2846_v23, 0.0  ;;  %v1692_v55 = vadd.f32 %v1691_v1, %v1690_v27  ;;  %v1693_v32 = vsel %vm254_vm1, %v1676_v52, 0.0 }
  0x48   :  { %842 = vrot.lane.b32.xlu1 %v816_v6, %s3215_s23  ;;  %v1017_v6 = vmax.f32 %v1013_v14, %v1016_v33  ;;  %v1019_v53 = vmax.f32 %v1015_v19, %v1018_v7  ;;  %v1695_v2 = vsel %vm254_vm1, %v1677_v18, 0.0  ;;  %v972_v3 = vsel %vm108_vm0, %v2848_v59, 0.0 }
  0x49   :  { %v969_v62 = vadd.f32 %v968_v61, %v967_v13  ;;  %v1694_v4 = vadd.f32 %v1693_v32, %v1692_v55  ;;  %v1697_v5 = vsel %vm254_vm1, %v1678_v54, 0.0  ;;  %v1699_v15 = vsel %vm254_vm1, %v1679_v63, 0.0 }
  0x4a   :  { %v1020_v60 = vmax.f32 %v1017_v6, %v1019_v53  ;;  %v1706_v9 = vsel %vm254_vm1, %v3799_v20, -inf  ;;  %v1707_v17 = vsel %vm254_vm1, %v3804_v49, -inf  ;;  %v1708_v22 = vsel %vm254_vm1, %v3813_v57, -inf }
  0x4b   :  { %v971_v36 = vadd.f32 %v970_v56, %v969_v62  ;;  %v1696_v12 = vadd.f32 %v1695_v2, %v1694_v4  ;;  %v1709_v25 = vsel %vm254_vm1, %v3820_v58, -inf  ;;  %v1710_v27 = vsel %vm254_vm1, %v3833_v0, -inf }
  0x4c   :  { %1031 = vrot.lane.b32.xlu0 %v1005_v50, %s3215_s23  ;;  %v1712_v28 = vsel %vm254_vm1, %v1675_v47, -inf  ;;  %v1701_v26 = vsel %vm254_vm1, %v1680_v41, 0.0  ;;  %v1703_v20 = vsel %vm254_vm1, %v1681_v8, 0.0  ;;  %v1711_v30 = vmax.f32 %v1706_v9, %v1710_v27 }
  0x4d   :  { %v973_v16 = vadd.f32 %v972_v3, %v971_v36  ;;  %v1698_v24 = vadd.f32 %v1697_v5, %v1696_v12  ;;  %v1713_v49 = vmax.f32 %v1707_v17, %v1712_v28  ;;  %v1714_v59 = vsel %vm254_vm1, %v1676_v52, -inf }
  0x4e   :  { %v1716_v57 = vsel %vm254_vm1, %v1677_v18, -inf  ;;  %v1724_v58 = vsel %vm254_vm1, %v1681_v8, -inf  ;;  %v1715_v34 = vmax.f32 %v1708_v22, %v1714_v59  ;;  %v1718_v37 = vsel %vm254_vm1, %v1678_v54, -inf }
  0x4f   :  { %v989_v29 = vmul.f32 0.125, %v973_v16  ;;  %v1700_v23 = vadd.f32 %v1699_v15, %v1698_v24  ;;  %v1717_v0 = vmax.f32 %v1709_v25, %v1716_v57  ;;  %v1720_v38 = vsel %vm254_vm1, %v1679_v63, -inf }
  0x50   :  { %1033 = vrot.lane.b32.xlu1 %v1020_v60, %s3215_s23  ;;  %v1719_v35 = vmax.f32 %v1711_v30, %v1718_v37  ;;  %v1722_v39 = vsel %vm254_vm1, %v1680_v41, -inf  ;;  %v1721_v11 = vmax.f32 %v1713_v49, %v1720_v38  ;;  %s3217_s23 = smov 35   ;;  %v3218_v19 = vmov 0.0  }
  0x51   :  { %1023 = vrot.lane.b32.xlu2 %v989_v29, %s3216_s17  ;;  %v1702_v42 = vadd.f32 %v1701_v26, %v1700_v23  ;;  %v1723_v40 = vmax.f32 %v1715_v34, %v1722_v39  ;;  %v1725_v43 = vmax.f32 %v1717_v0, %v1724_v58  ;;  %v3942_v52 = vrot.slane %v3218_v19, 3 }
  0x52   :  { %v1726_v31 = vmax.f32 %v1719_v35, %v1721_v11  ;;  %vm179_vm7 = vcmask 1044480   ;;  %vm6451_vm8 = vcmask 1041408   ;;  %vm6454_vm9 = vcmask 1046528  }
  0x53   :  { %v1704_v10 = vadd.f32 %v1703_v20, %v1702_v42  ;;  %v1727_v47 = vmax.f32 %v1723_v40, %v1725_v43  ;;  %6455 = vst [vmem:[#allocation3_spill] sm:$0xff] %v3942_v52  ;;  %v3959_v3 = vrot.slane %v3218_v19, 6  ;;  %vm216_vm10 = vcmask 1043456  }
  0x54   :  { %vm6453_vm11 = vcmask 1045504   ;;  %vm251_vm12 = vcmask 556032   ;;  %vm1738_vm14 = vcmask 138240   ;;  %vm1740_vm15 = vcmask 285696  }
  0x55   :  { %v1705_v45 = vmul.f32 0.083333336, %v1704_v10  ;;  %v1728_v48 = vmax.f32 %v1726_v31, %v1727_v47  ;;  %vm4789_vm13 = vmneg %vm251_vm12 }
  0x57   :  { %1730 = vrot.lane.b32.xlu0 %v1705_v45, %s3216_s17 }
  0x5f   :  { %1734 = vrot.lane.b32.xlu0 %v1728_v48, %s3217_s23 }
  0x7a   :  { %v150_v21 = vpop.permute.xlu1 %149 }
  0x7b   :  { %v312_v18 = vpop.permute.xlu2 %311 }
  0x7c   :  { %v324_v2 = vsel %vm155_vm2, 0.0, %v312_v18 }
  0x7d   :  { %v326_v22 = vsel %vm158_vm3, %v324_v2, 0.0 }
  0x7e   :  { %v142_v44 = vpop.permute.xlu0 %141 }
  0x7f   :  { %v156_v33 = vsel %vm155_vm2, 0.0, %v142_v44 }
  0x80   :  { %v159_v46 = vsel %vm158_vm3, %v156_v33, 0.0 }
  0x81   :  { %v162_v14 = vsel %vm6452_vm4, %v159_v46, %v150_v21 }
  0x82   :  { %v165_v7 = vsel %vm164_vm5, %v162_v14, 0.0  ;;  %v152_v51 = vpop.permute.xlu1 %151 }
  0x83   :  { %v170_v50 = vrot.slane %v165_v7, 7  ;;  %v486_v17 = vpop.permute.xlu2 %485 }
  0x85   :  { %v3945_v1 = vsel %vm169_vm6, 0.0, %v170_v50 }
  0x86   :  { %v144_v6 = vpop.permute.xlu0 %143  ;;  %v181_v61 = vrot.slane %v3945_v1, 3  ;;  %v205_v5 = vrot.slane %v3945_v1, 1  ;;  %v193_v41 = vrot.slane %v3945_v1, 6  ;;  %v217_v58 = vrot.slane %v3945_v1, 4 }
  0x87   :  { %v157_v53 = vsel %vm155_vm2, 0.0, %v144_v6  ;;  %v228_v21 = vrot.slane %v3945_v1, 7 }
  0x88   :  { %v160_v13 = vsel %vm158_vm3, %v157_v53, 0.0  ;;  %v182_v56 = vsel %vm179_vm7, %v3942_v52, %v181_v61  ;;  %v194_v23 = vsel %vm6451_vm8, %v3959_v3, %v193_v41 }
  0x89   :  { %v163_v54 = vsel %vm6452_vm4, %v160_v13, %v152_v51  ;;  %185 = vrot.lane.b32.xlu2 %v182_v56, %s3219_s24  ;;  %v4017_v13 = vrot.slane %v3218_v19, 2  ;;  %v4022_v56 = vld [vmem:[%s6419_s6 + $0x60] sm:$0xff] }
  0x8a   :  { %v166_v55 = vsel %vm164_vm5, %v163_v54, 0.0  ;;  %v310_v32 = vpop.permute.xlu1 %309  ;;  %v4027_v54 = vld [vmem:[%s6419_s6 + $0x68] sm:$0xff] }
  0x8b   :  { %v171_v60 = vrot.slane %v166_v55, 7  ;;  %v323_v62 = vsel %vm155_vm2, 0.0, %v310_v32  ;;  %v649_v47 = vpop.permute.xlu2 %648  ;;  %6457 = vst [vmem:[#allocation5_spill] sm:$0xff] %v4017_v13 }
  0x8c   :  { %v325_v63 = vsel %vm158_vm3, %v323_v62, 0.0 }
  0x8d   :  { %v3962_v4 = vsel %vm169_vm6, %v170_v50, %v171_v60  ;;  %v3965_v36 = vsel %vm169_vm6, %v171_v60, 0.0  ;;  %v661_v50 = vsel %vm155_vm2, 0.0, %v649_v47 }
  0x8e   :  { %v183_v8 = vrot.slane %v3962_v4, 3  ;;  %v318_v12 = vpop.permute.xlu0 %317  ;;  %v206_v15 = vrot.slane %v3962_v4, 1  ;;  %v208_v16 = vrot.slane %v3965_v36, 1  ;;  %v195_v9 = vrot.slane %v3962_v4, 6 }
  0x8f   :  { %v327_v24 = vsel %vm6452_vm4, %v325_v63, %v318_v12  ;;  %v218_v25 = vrot.slane %v3962_v4, 4  ;;  %v220_v27 = vrot.slane %v3965_v36, 4  ;;  %v229_v10 = vrot.slane %v3962_v4, 7  ;;  %v4039_v63 = vld [vmem:[%s6419_s6 + $0x70] sm:$0xff] }
  0x90   :  { %v184_v28 = vsel %vm179_vm7, %v181_v61, %v183_v8  ;;  %v329_v29 = vsel %vm164_vm5, %v327_v24, 0.0  ;;  %v207_v26 = vsel %vm6454_vm9, %v205_v5, %v206_v15  ;;  %v209_v20 = vsel %vm6454_vm9, %v206_v15, %v208_v16 }
  0x91   :  { %187 = vrot.lane.b32.xlu2 %v184_v28, %s3219_s24  ;;  %v3003_v30 = vpack.i.bf16 %v209_v20, %v207_v26  ;;  %v196_v49 = vsel %vm6451_vm8, %v193_v41, %v195_v9  ;;  %v333_v0 = vrot.slane %v329_v29, 7  ;;  %v219_v42 = vsel %vm216_vm10, %v217_v58, %v218_v25  ;;  %v4050_v41 = vld [vmem:[%s6419_s6 + $0x78] sm:$0xff]  ;;  %v4068_v26 = vld [vmem:[%s6419_s6 + $0x80] sm:$0xff] }
  0x92   :  { %v320_v59 = vpop.permute.xlu1 %319  ;;  %v2998_v57 = vpack.i.bf16 %v196_v49, %v194_v23  ;;  %v221_v38 = vsel %vm216_vm10, %v218_v25, %v220_v27  ;;  %v231_v11 = vrot.slane %v3965_v36, 7  ;;  %v230_v51 = vsel %vm169_vm6, %v228_v21, %v229_v10  ;;  %v4105_v21 = vld [vmem:[%s6419_s6 + $0x90] sm:$0xff] }
  0x93   :  { %v328_v34 = vsel %vm6452_vm4, %v326_v22, %v320_v59  ;;  %3004 = vrot.lane.b32.xlu1 %v3003_v30, %s3220_s25  ;;  %v3998_v43 = vsel %vm169_vm6, 0.0, %v333_v0  ;;  %v3008_v45 = vpack.i.bf16 %v221_v38, %v219_v42  ;;  %v240_v18 = vrot.slane %v3962_v4, 2  ;;  %v4088_v42 = vld [vmem:[%s6419_s6 + $0x88] sm:$0xff] }
  0x94   :  { %v330_v37 = vsel %vm164_vm5, %v328_v34, 0.0  ;;  %2999 = vrot.lane.b32.xlu0 %v2998_v57, %s3221_s26  ;;  %6456 = vst [vmem:[#allocation4_spill] sm:$0xff] %v3998_v43  ;;  %v232_v33 = vsel %vm169_vm6, %v229_v10, %v231_v11  ;;  %v351_v46 = vrot.slane %v3998_v43, 6  ;;  %v241_v53 = vrot.slane %v3965_v36, 2 }
  0x95   :  { %v334_v35 = vrot.slane %v330_v37, 7  ;;  %v4033_v62 = vsel %vm158_vm3, %v661_v50, 0.0  ;;  %v341_v19 = vrot.slane %v3998_v43, 3  ;;  %v362_v5 = vrot.slane %v3998_v43, 1  ;;  %v54_v37 = vld [vmem:[%s6420_s1 + $0x70] sm:$0xff] }
  0x96   :  { %v478_v39 = vpop.permute.xlu0 %477  ;;  %v352_v32 = vsel %vm6451_vm8, %v3959_v3, %v351_v46  ;;  %v242_v8 = vsel %vm6453_vm11, %v240_v18, %v241_v53  ;;  %v1808_v15 = vsel %vm254_vm1, %v4022_v56, 0.0  ;;  %v1809_v16 = vsel %vm254_vm1, %v4027_v54, 0.0 }
  0x97   :  { %v3995_v40 = vsel %vm169_vm6, %v333_v0, %v334_v35  ;;  %v491_v31 = vsel %vm155_vm2, 0.0, %v478_v39  ;;  %v4042_v2 = vsel %vm169_vm6, %v334_v35, 0.0  ;;  %v244_v9 = vsel %vm6453_vm11, %v241_v53, %v4017_v13  ;;  %v55_v0 = vld [vmem:[%s6420_s1 + $0x78] sm:$0xff] }
  0x98   :  { %v493_v48 = vsel %vm158_vm3, %v491_v31, 0.0  ;;  %v353_v14 = vrot.slane %v3995_v40, 6  ;;  %v1810_v22 = vadd.f32 %v1809_v16, %v1808_v15  ;;  %v1811_v24 = vsel %vm254_vm1, %v4039_v63, 0.0  ;;  %1172 = vmatpush.msra.mxu0 %v55_v0 }
  0x99   :  { %3009 = vrot.lane.b32.xlu2 %v3008_v45, %s3222_s5  ;;  %v495_v61 = vsel %vm6452_vm4, %v493_v48, %v486_v17  ;;  %v365_v25 = vrot.slane %v4042_v2, 1  ;;  %v373_v29 = vrot.slane %v3998_v43, 4  ;;  %v1813_v20 = vsel %vm254_vm1, %v4050_v41, 0.0 }
  0x9a   :  { %v480_v44 = vpop.permute.xlu1 %479  ;;  %v354_v60 = vsel %vm6451_vm8, %v351_v46, %v353_v14  ;;  %v497_v4 = vsel %vm164_vm5, %v495_v61, 0.0  ;;  %v343_v49 = vrot.slane %v3995_v40, 3  ;;  %v1812_v59 = vadd.f32 %v1811_v24, %v1810_v22  ;;  %1173 = vmatpush.msra.mxu0 %v54_v37 }
  0x9b   :  { %v492_v7 = vsel %vm155_vm2, 0.0, %v480_v44  ;;  %235 = vrot.lane.b32.xlu1 %v232_v33, %s3223_s27  ;;  %v3013_v17 = vpack.i.bf16 %v354_v60, %v352_v32  ;;  %v501_v27 = vrot.slane %v497_v4, 7  ;;  %v396_v57 = vrot.slane %v4042_v2, 2  ;;  %v4133_v32 = vld [vmem:[%s6419_s6 + $0x98] sm:$0xff] }
  0x9c   :  { %v494_v6 = vsel %vm158_vm3, %v492_v7, 0.0  ;;  %233 = vrot.lane.b32.xlu0 %v230_v51, %s3223_s27  ;;  %v363_v58 = vrot.slane %v3995_v40, 1  ;;  %v374_v34 = vrot.slane %v3995_v40, 4  ;;  %v376_v38 = vrot.slane %v4042_v2, 4 }
  0x9d   :  { %v342_v35 = vsel %vm179_vm7, %v3942_v52, %v341_v19  ;;  %v1814_v39 = vadd.f32 %v1813_v20, %v1812_v59  ;;  %v1815_v10 = vsel %vm254_vm1, %v4068_v26, 0.0  ;;  %v4096_v11 = vsel %vm169_vm6, 0.0, %v501_v27 }
  0x9e   :  { %v488_v55 = vpop.permute.xlu0 %487  ;;  %6458 = vst [vmem:[#allocation6_spill] sm:$0xff] %v4096_v11  ;;  %v398_v47 = vsel %vm6453_vm11, %v396_v57, %v4017_v13  ;;  %v395_v48 = vrot.slane %v3995_v40, 2  ;;  %v344_v46 = vsel %vm179_vm7, %v341_v19, %v343_v49  ;;  %v1817_v14 = vsel %vm254_vm1, %v4088_v42, 0.0 }
  0x9f   :  { %v496_v36 = vsel %vm6452_vm4, %v494_v6, %v488_v55  ;;  %v364_v7 = vsel %vm6454_vm9, %v362_v5, %v363_v58  ;;  %v366_v51 = vsel %vm6454_vm9, %v363_v58, %v365_v25  ;;  %v4119_v50 = vsel %vm216_vm10, %v373_v29, %v374_v34  ;;  %v53_v55 = vld [vmem:[%s6420_s1 + $0x68] sm:$0xff]  ;;  %v50_v58 = vld [vmem:[%s6420_s1 + $0x50] sm:$0xff] }
  0xa0   :  { %v498_v12 = vsel %vm164_vm5, %v496_v36, 0.0  ;;  %v1816_v6 = vadd.f32 %v1815_v10, %v1814_v39  ;;  %v552_v18 = vrot.slane %v4096_v11, 7  ;;  %v4125_v53 = vsel %vm216_vm10, %v374_v34, %v376_v38  ;;  %1174 = vmatpush.msra.mxu0 %v53_v55  ;;  %v4194_v38 = vld [vmem:[%s6419_s6 + $0xb0] sm:$0xff] }
  0xa1   :  { %245 = vrot.lane.b32.xlu2 %v242_v8, %s3224_s19  ;;  %v502_v23 = vrot.slane %v498_v12, 7  ;;  %v1819_v60 = vsel %vm254_vm1, %v4105_v21, 0.0  ;;  %v530_v36 = vrot.slane %v4096_v11, 1  ;;  %v385_v12 = vrot.slane %v3995_v40, 7  ;;  %v52_v40 = vld [vmem:[%s6420_s1 + $0x60] sm:$0xff] }
  0xa2   :  { %v647_v28 = vpop.permute.xlu1 %646  ;;  %v1818_v8 = vadd.f32 %v1817_v14, %v1816_v6  ;;  %v387_v15 = vrot.slane %v4042_v2, 7  ;;  %v384_v16 = vrot.slane %v3998_v43, 7  ;;  %v1821_v25 = vsel %vm254_vm1, %v4133_v32, 0.0  ;;  %v51_v2 = vld [vmem:[%s6420_s1 + $0x58] sm:$0xff]  ;;  %1175 = vmatpush.msra.mxu0 %v52_v40 }
  0xa3   :  { %v660_v30 = vsel %vm155_vm2, 0.0, %v647_v28  ;;  %3014 = vrot.lane.b32.xlu1 %v3013_v17, %s3221_s26  ;;  %v4108_v44 = vsel %vm169_vm6, %v501_v27, %v502_v23  ;;  %v4111_v33 = vsel %vm169_vm6, %v502_v23, 0.0  ;;  %v3018_v27 = vpack.i.bf16 %v366_v51, %v364_v7  ;;  %v49_v51 = vld [vmem:[%s6420_s1 + $0x48] sm:$0xff] }
  0xa4   :  { %247 = vrot.lane.b32.xlu0 %v244_v9, %s3224_s19  ;;  %v662_v45 = vsel %vm158_vm3, %v660_v30, 0.0  ;;  %v533_v19 = vrot.slane %v4111_v33, 1  ;;  %v531_v5 = vrot.slane %v4108_v44, 1  ;;  %v509_v9 = vrot.slane %v4096_v11, 3  ;;  %v4165_v30 = vld [vmem:[%s6419_s6 + $0xa0] sm:$0xff]  ;;  %1176 = vmatpush.msra.mxu0 %v51_v2 }
  0xa5   :  { %v553_v22 = vrot.slane %v4108_v44, 7  ;;  %v1820_v24 = vadd.f32 %v1819_v60, %v1818_v8  ;;  %v397_v28 = vsel %vm6453_vm11, %v395_v48, %v396_v57  ;;  %v3023_v29 = vpack.i.bf16 %v4125_v53, %v4119_v50 }
  0xa6   :  { %v655_v31 = vpop.permute.xlu0 %654  ;;  %v564_v20 = vrot.slane %v4111_v33, 2  ;;  %v4170_v49 = vsel %vm6454_vm9, %v530_v36, %v531_v5  ;;  %v4173_v59 = vsel %vm6454_vm9, %v531_v5, %v533_v19  ;;  %v563_v57 = vrot.slane %v4108_v44, 2  ;;  %1177 = vmatpush.msra.mxu0 %v50_v58 }
  0xa7   :  { %v664_v61 = vsel %vm6452_vm4, %v662_v45, %v655_v31  ;;  %v4181_v0 = vsel %vm169_vm6, %v385_v12, %v387_v15  ;;  %v4184_v37 = vsel %vm169_vm6, %v384_v16, %v385_v12  ;;  %v1822_v39 = vadd.f32 %v1821_v25, %v1820_v24  ;;  %v48_v12 = vld [vmem:[%s6420_s1 + $0x40] sm:$0xff]  ;;  %v47_v15 = vld [vmem:[%s6420_s1 + $0x38] sm:$0xff] }
  0xa8   :  { %v4146_v17 = vsel %vm164_vm5, %v664_v61, 0.0  ;;  %v544_v10 = vrot.slane %v4111_v33, 4  ;;  %v554_v45 = vsel %vm169_vm6, %v552_v18, %v553_v22  ;;  %v1823_v31 = vsel %vm254_vm1, %v4165_v30, 0.0  ;;  %1178 = vmatpush.msra.mxu0 %v49_v51 }
  0xa9   :  { %345 = vrot.lane.b32.xlu2 %v342_v35, %s3219_s24  ;;  %v670_v34 = vrot.slane %v4146_v17, 7  ;;  %v2898_v35 = vld [vmem:[%s6419_s6 + $0xb8] sm:$0xff]  ;;  %v4217_v14 = vsel %vm6453_vm11, %v564_v20, %v4017_v13  ;;  %v555_v7 = vrot.slane %v4111_v33, 7  ;;  %v4224_v6 = vsel %vm6453_vm11, %v563_v57, %v564_v20  ;;  %v845_v57 = vpop.permute.xlu2 %844  ;;  %v4321_v17 = vld [vmem:[%s6421_s7 + $0x10] sm:$0xff] }
  0xaa   :  { %v657_v4 = vpop.permute.xlu1 %656  ;;  %v1827_v18 = vsel %vm254_vm1, %v4194_v38, 0.0  ;;  %v4231_v55 = vsel %vm254_vm1, %v2898_v35, 0.0  ;;  %v1824_v19 = vadd.f32 %v1823_v31, %v1822_v39  ;;  %v541_v16 = vrot.slane %v4096_v11, 4  ;;  %1179 = vmatpush.msra.mxu0 %v48_v12 }
  0xab   :  { %401 = vrot.lane.b32.xlu1 %v398_v47, %s3224_s19  ;;  %v665_v23 = vsel %vm6452_vm4, %v4033_v62, %v657_v4  ;;  %v4189_v62 = vld [vmem:[%s6419_s6 + $0xa8] sm:$0xff]  ;;  %v4207_v47 = vsel %vm179_vm7, %v3942_v52, %v509_v9  ;;  %v4236_v33 = vsel %vm169_vm6, 0.0, %v670_v34  ;;  %v4240_v4 = vsel %vm254_vm1, %v2898_v35, -inf }
  0xac   :  { %347 = vrot.lane.b32.xlu0 %v344_v46, %s3219_s24  ;;  %v4210_v48 = vsel %vm164_vm5, %v665_v23, 0.0  ;;  %v3028_v46 = vpack.i.bf16 %v4173_v59, %v4170_v49  ;;  %v1825_v61 = vsel %vm254_vm1, %v4189_v62, 0.0  ;;  %6459 = vst [vmem:[#allocation7_spill] sm:$0xff] %v4236_v33  ;;  %v721_v8 = vrot.slane %v4236_v33, 7  ;;  %1180 = vmatpush.msra.mxu0 %v47_v15  ;;  %v4344_v15 = vld [vmem:[%s6421_s7 + $0x18] sm:$0xff] }
  0xad   :  { %v671_v5 = vrot.slane %v4210_v48, 7  ;;  %v542_v24 = vrot.slane %v4108_v44, 4  ;;  %v4255_v25 = vsel %vm169_vm6, %v553_v22, %v555_v7  ;;  %v1832_v40 = vsel %vm254_vm1, %v4022_v56, -inf  ;;  %v46_v56 = vld [vmem:[%s6420_s1 + $0x30] sm:$0xff] }
  0xae   :  { %v1833_v2 = vsel %vm254_vm1, %v4027_v54, -inf  ;;  %v1834_v23 = vsel %vm254_vm1, %v4039_v63, -inf  ;;  %v1838_v22 = vsel %vm254_vm1, %v4088_v42, -inf  ;;  %v1840_v49 = vsel %vm254_vm1, %v4105_v21, -inf  ;;  %1181 = vmatpush.msra.mxu0 %v46_v56 }
  0xaf   :  { %v1826_v54 = vadd.f32 %v1825_v61, %v1824_v19  ;;  %v1842_v59 = vsel %vm254_vm1, %v4133_v32, -inf  ;;  %v710_v63 = vrot.slane %v4236_v33, 4  ;;  %v4280_v21 = vsel %vm216_vm10, %v541_v16, %v542_v24  ;;  %v44_v19 = vld [vmem:[%s6420_s1 + $0x20] sm:$0xff] }
  0xb0   :  { %v4283_v35 = vsel %vm216_vm10, %v542_v24, %v544_v10  ;;  %v1839_v32 = vmax.f32 %v1833_v2, %v1838_v22  ;;  %v1841_v39 = vmax.f32 %v1834_v23, %v1840_v49  ;;  %v511_v31 = vrot.slane %v4108_v44, 3  ;;  %v42_v2 = vld [vmem:[%s6420_s1 + $0x10] sm:$0xff] }
  0xb1   :  { %3019 = vrot.lane.b32.xlu2 %v3018_v27, %s3220_s25  ;;  %v1836_v27 = vsel %vm254_vm1, %v4068_v26, -inf  ;;  %v1835_v26 = vsel %vm254_vm1, %v4050_v41, -inf  ;;  %v1844_v10 = vsel %vm254_vm1, %v4165_v30, -inf  ;;  %v1846_v7 = vsel %vm254_vm1, %v4189_v62, -inf }
  0xb2   :  { %v837_v60 = vpop.permute.xlu1 %836  ;;  %v1837_v58 = vmax.f32 %v1832_v40, %v1836_v27  ;;  %v1843_v48 = vmax.f32 %v1835_v26, %v1842_v59  ;;  %v4307_v51 = vsel %vm169_vm6, %v670_v34, %v671_v5  ;;  %v1828_v61 = vadd.f32 %v1827_v18, %v1826_v54 }
  0xb3   :  { %557 = vrot.lane.b32.xlu1 %v554_v45, %s3223_s27  ;;  %v849_v36 = vsel %vm155_vm2, 0.0, %v837_v60  ;;  %v45_v45 = vld [vmem:[%s6420_s1 + $0x28] sm:$0xff]  ;;  %v1848_v30 = vsel %vm254_vm1, %v4194_v38, -inf  ;;  %v6431_v62 = vrot.slane %v4236_v33, 3  ;;  %v4324_v34 = vsel %vm169_vm6, %v671_v5, 0.0 }
  0xb4   :  { %399 = vrot.lane.b32.xlu0 %v397_v28, %s3224_s19  ;;  %v835_v28 = vpop.permute.xlu0 %834  ;;  %v851_v20 = vsel %vm158_vm3, %v849_v36, 0.0  ;;  %1182 = vmatpush.msra.mxu0 %v45_v45  ;;  %v4316_v60 = vld [vmem:[%s6421_s7 + $0x8] sm:$0xff]  ;;  %v722_v38 = vrot.slane %v4307_v51, 7  ;;  %v3033_v18 = vpack.i.bf16 %v4283_v35, %v4280_v21  ;;  %v43_v36 = vld [vmem:[%s6420_s1 + $0x18] sm:$0xff]  ;;  %v1845_v5 = vmax.f32 %v1837_v58, %v1844_v10 }
  0xb5   :  { %v848_v42 = vsel %vm155_vm2, 0.0, %v835_v28  ;;  %v853_v41 = vsel %vm6452_vm4, %v851_v20, %v845_v57  ;;  %v1847_v12 = vmax.f32 %v1839_v32, %v1846_v7  ;;  %v1849_v24 = vmax.f32 %v1841_v39, %v1848_v30  ;;  %v41_v58 = vld [vmem:[%s6420_s1 + $0x8] sm:$0xff]  ;;  %v4400_v7 = vld [vmem:[%s6421_s7 + $0x30] sm:$0xff]  ;;  %v40_v30 = vld [vmem:[%s6420_s1] sm:$0xff] }
  0xb6   :  { %v850_v50 = vsel %vm158_vm3, %v848_v42, 0.0  ;;  %1183 = vmatpush.msra.mxu0 %v44_v19  ;;  %v1851_v40 = vmax.f32 %v1843_v48, %v4240_v4  ;;  %v1930_v27 = vsel %vm254_vm1, %v4316_v60, 0.0  ;;  %v1932_v28 = vsel %vm254_vm1, %v4321_v17, 0.0  ;;  %v4366_v4 = vld [vmem:[%s6421_s7 + $0x20] sm:$0xff]  ;;  %v4384_v42 = vld [vmem:[%s6421_s7 + $0x28] sm:$0xff] }
  0xb7   :  { %v1830_v20 = vadd.f32 %v4231_v55, %v1828_v61  ;;  %v711_v23 = vrot.slane %v4307_v51, 4  ;;  %v4361_v22 = vsel %vm179_vm7, %v509_v9, %v511_v31  ;;  %v713_v54 = vrot.slane %v4324_v34, 4 }
  0xb8   :  { %1184 = vmatpush.msra.mxu0 %v43_v36  ;;  %v1934_v26 = vsel %vm254_vm1, %v4344_v15, 0.0  ;;  %v724_v59 = vrot.slane %v4324_v34, 7  ;;  %v680_v57 = vrot.slane %v4307_v51, 3  ;;  %v1852_v32 = vmax.f32 %v1845_v5, %v1847_v12  ;;  %v1920_v36 = vld [vmem:[%s6421_s7 + $0x38] sm:$0xff] }
  0xb9   :  { %3024 = vrot.lane.b32.xlu2 %v3023_v29, %s3222_s5  ;;  %v4302_v29 = vld [vmem:[%s6421_s7] sm:$0xff]  ;;  %v1853_v39 = vmax.f32 %v1849_v24, %v1851_v40  ;;  %v1936_v45 = vsel %vm254_vm1, %v4366_v4, 0.0  ;;  %v1831_v31 = vmul.f32 0.083333336, %v1830_v20  ;;  %v4395_v10 = vsel %vm216_vm10, %v710_v63, %v711_v23  ;;  %v1024_v24 = vpop.permute.xlu2 %1023  ;;  %v4440_v40 = vld [vmem:[%s6421_s7 + $0x48] sm:$0xff] }
  0xba   :  { %v843_v53 = vpop.permute.xlu1 %842  ;;  %v1929_v16 = vsel %vm254_vm1, %v4302_v29, 0.0  ;;  %1185 = vmatpush.msra.mxu0 %v42_v2  ;;  %v6433_v61 = vrot.slane %v4324_v34, 2  ;;  %v1938_v63 = vsel %vm254_vm1, %v4384_v42, 0.0  ;;  %v4418_v19 = vsel %vm169_vm6, %v722_v38, %v724_v59  ;;  %v4445_v2 = vld [vmem:[%s6421_s7 + $0x50] sm:$0xff]  ;;  %v4473_v59 = vld [vmem:[%s6421_s7 + $0x60] sm:$0xff] }
  0xbb   :  { %3029 = vrot.lane.b32.xlu1 %v3028_v46, %s3220_s25  ;;  %v4330_v46 = vsel %vm164_vm5, %v853_v41, 0.0  ;;  %v1931_v49 = vadd.f32 %v1930_v27, %v1929_v16  ;;  %v4430_v16 = vmax.f32 %v1852_v32, %v1853_v39  ;;  %v1940_v27 = vsel %vm254_vm1, %v4400_v7, 0.0 }
  0xbc   :  { %391 = vrot.lane.b32.xlu0 %v4181_v0, %s3223_s27  ;;  %v852_v0 = vsel %vm6452_vm4, %v850_v50, %v843_v53  ;;  %v859_v9 = vrot.slane %v4330_v46, 7  ;;  %1186 = vmatpush.msra.mxu0 %v41_v58  ;;  %v4405_v50 = vsel %vm216_vm10, %v711_v23, %v713_v54  ;;  %v732_v53 = vrot.slane %v4307_v51, 2  ;;  %v4481_v58 = vld [vmem:[%s6421_s7 + $0x68] sm:$0xff] }
  0xbd   :  { %v854_v55 = vsel %vm164_vm5, %v852_v0, 0.0  ;;  %v1933_v41 = vadd.f32 %v1932_v28, %v1931_v49  ;;  %v1037_v20 = vsel %vm155_vm2, 0.0, %v1024_v24  ;;  %v4458_v49 = vld [vmem:[%s6421_s7 + $0x58] sm:$0xff]  ;;  %v1026_v24 = vpop.permute.xlu0 %1025  ;;  %v1965_v0 = vsel %vm254_vm1, %v4366_v4, -inf }
  0xbe   :  { %v858_v48 = vrot.slane %v854_v55, 7  ;;  %v4415_v46 = vsel %vm169_vm6, %v859_v9, 0.0  ;;  %1187 = vmatpush.msra.mxu0 %v40_v30  ;;  %v1967_v56 = vsel %vm254_vm1, %v4384_v42, -inf  ;;  %v1963_v4 = vsel %vm254_vm1, %v4321_v17, -inf  ;;  %v4563_v17 = vld [vmem:[%s6421_s7 + $0x80] sm:$0xff] }
  0xbf   :  { %v1969_v42 = vsel %vm254_vm1, %v4400_v7, -inf  ;;  %v1971_v23 = vsel %vm254_vm1, %v1920_v36, -inf  ;;  %v4568_v7 = vld [vmem:[%s6421_s7 + $0x88] sm:$0xff] }
  0xc0   :  { %v4450_v28 = vsel %vm169_vm6, %v858_v48, %v859_v9  ;;  %v4461_v55 = vsel %vm169_vm6, 0.0, %v858_v48  ;;  %v4468_v9 = vsel %vm6453_vm11, %v732_v53, %v6433_v61  ;;  %v4498_v48 = vsel %vm158_vm3, %v1037_v20, 0.0  ;;  %v68_v61 = vld [vmem:[%s6420_s1 + $0xe0] sm:$0xff] }
  0xc1   :  { %389 = vrot.lane.b32.xlu2 %v4184_v37, %s3223_s27  ;;  %v723_v37 = vsel %vm169_vm6, %v721_v8, %v722_v38  ;;  %v1935_v8 = vadd.f32 %v1934_v26, %v1933_v41  ;;  %v4435_v38 = vld [vmem:[%s6421_s7 + $0x40] sm:$0xff]  ;;  %6460 = vst [vmem:[#allocation8_spill] sm:$0xff] %v4461_v55  ;;  %v4486_v41 = vld [vmem:[%s6421_s7 + $0x70] sm:$0xff]  ;;  %v920_v53 = vrot.slane %v4450_v28, 2  ;;  %v521_v20 = vrot.slane %v4108_v44, 6  ;;  %v71_v44 = vld [vmem:[%s6420_s1 + $0xf8] sm:$0xff] }
  0xc2   :  { %v1944_v39 = vsel %vm254_vm1, %v4435_v38, 0.0  ;;  %v4517_v12 = vsel %vm254_vm1, %v4486_v41, 0.0  ;;  %1225 = vmatpush.msra.mxu1 %v71_v44  ;;  %v4552_v44 = vsel %vm155_vm2, 0.0, %v1026_v24  ;;  %v876_v43 = vrot.slane %v4461_v55, 6 }
  0xc3   :  { %726 = vrot.lane.b32.xlu1 %v723_v37, %s3223_s27  ;;  %v1937_v5 = vadd.f32 %v1936_v45, %v1935_v8  ;;  %v1928_v37 = vld [vmem:[%s6421_s7 + $0x78] sm:$0xff]  ;;  %v1948_v45 = vsel %vm254_vm1, %v4445_v2, 0.0  ;;  %v1950_v8 = vsel %vm254_vm1, %v4458_v49, 0.0  ;;  %v1040_v21 = vsel %vm158_vm3, %v4552_v44, 0.0 }
  0xc4   :  { %569 = vrot.lane.b32.xlu0 %v4217_v14, %s3224_s19  ;;  %v4423_v14 = vsel %vm179_vm7, %v6431_v62, %v680_v57  ;;  %v1942_v57 = vsel %vm254_vm1, %v1920_v36, 0.0  ;;  %v70_v62 = vld [vmem:[%s6420_s1 + $0xf0] sm:$0xff]  ;;  %vm257_vm3 = vcmask 621568  }
  0xc5   :  { %v1939_v54 = vadd.f32 %v1938_v63, %v1937_v5  ;;  %v3043_v26 = vpack.i.bf16 %v4423_v14, %v4361_v22  ;;  %v6432_v63 = vrot.slane %v4415_v46, 2  ;;  %v1952_v5 = vsel %vm254_vm1, %v4473_v59, 0.0  ;;  %1226 = vmatpush.msra.mxu1 %v70_v62  ;;  %v64_v14 = vld [vmem:[%s6420_s1 + $0xc0] sm:$0xff] }
  0xc7   :  { %v1941_v32 = vadd.f32 %v1940_v27, %v1939_v54  ;;  %v519_v27 = vrot.slane %v4096_v11, 6  ;;  %v4513_v54 = vsel %vm254_vm1, %v4481_v58, 0.0 }
  0xc9   :  { %567 = vrot.lane.b32.xlu2 %v4224_v6, %s3224_s19  ;;  %v1946_v6 = vsel %vm254_vm1, %v4440_v40, 0.0  ;;  %v1943_v30 = vadd.f32 %v1942_v57, %v1941_v32  ;;  %v1961_v57 = vsel %vm254_vm1, %v4302_v29, -inf  ;;  %v87_v29 = vld [vmem:[%s6420_s1 + $0x178] sm:$0xff] }
  0xca   :  { %1278 = vmatpush.msra.mxu2 %v87_v29  ;;  %v1966_v36 = vmax.f32 %v1961_v57, %v1965_v0  ;;  %v1973_v29 = vsel %vm254_vm1, %v4435_v38, -inf  ;;  %v1977_v38 = vsel %vm254_vm1, %v4445_v2, -inf  ;;  %v690_v2 = vrot.slane %v4307_v51, 6 }
  0xcb   :  { %513 = vrot.lane.b32.xlu1 %v4207_v47, %s3219_s24  ;;  %v4520_v47 = vsel %vm254_vm1, %v1928_v37, 0.0  ;;  %v1945_v32 = vadd.f32 %v1944_v39, %v1943_v30  ;;  %v4540_v39 = vsel %vm254_vm1, %v1928_v37, -inf  ;;  %v1964_v37 = vsel %vm254_vm1, %v4344_v15, -inf }
  0xcc   :  { %1856 = vrot.lane.b32.xlu0 %v1831_v31, %s3216_s17  ;;  %v1962_v31 = vsel %vm254_vm1, %v4316_v60, -inf  ;;  %v4545_v60 = vsel %vm6453_vm11, %v920_v53, %v6432_v63  ;;  %v69_v53 = vld [vmem:[%s6420_s1 + $0xe8] sm:$0xff]  ;;  %v4572_v15 = vsel %vm6451_vm8, %v3959_v3, %v519_v27  ;;  %v1975_v63 = vsel %vm254_vm1, %v4440_v40, -inf }
  0xcd   :  { %v1947_v30 = vadd.f32 %v1946_v6, %v1945_v32  ;;  %v1968_v62 = vmax.f32 %v1962_v31, %v1967_v56  ;;  %v688_v6 = vrot.slane %v4236_v33, 6  ;;  %v1970_v32 = vmax.f32 %v1963_v4, %v1969_v42  ;;  %v86_v56 = vld [vmem:[%s6420_s1 + $0x170] sm:$0xff]  ;;  %1227 = vmatpush.msra.mxu1 %v69_v53  ;;  %v4609_v4 = vld [vmem:[%s6421_s7 + $0x98] sm:$0xff]  ;;  %v1032_v53 = vpop.permute.xlu0 %1031 }
  0xce   :  { %v1972_v0 = vmax.f32 %v1964_v37, %v1971_v23  ;;  %1279 = vmatpush.msra.mxu2 %v86_v56  ;;  %v2067_v40 = vsel %vm254_vm1, %v4563_v17, 0.0  ;;  %v4601_v31 = vsel %vm6451_vm8, %v519_v27, %v521_v20  ;;  %v1979_v23 = vsel %vm254_vm1, %v4458_v49, -inf  ;;  %v4622_v49 = vld [vmem:[%s6421_s7 + $0xa0] sm:$0xff] }
  0xcf   :  { %v1949_v24 = vadd.f32 %v1948_v45, %v1947_v30  ;;  %v2068_v45 = vsel %vm254_vm1, %v4568_v7, 0.0  ;;  %v4613_v42 = vmax.f32 %v1966_v36, %v1973_v29  ;;  %1228 = vmatpush.msra.mxu1 %v68_v61  ;;  %v1976_v30 = vmax.f32 %v1968_v62, %v1975_v63 }
  0xd0   :  { %v4626_v37 = vmax.f32 %v1970_v32, %v1977_v38  ;;  %v1980_v36 = vmax.f32 %v1972_v0, %v1979_v23  ;;  %v1983_v61 = vsel %vm254_vm1, %v4481_v58, -inf  ;;  %v1985_v62 = vsel %vm254_vm1, %v4486_v41, -inf  ;;  %v67_v58 = vld [vmem:[%s6420_s1 + $0xd8] sm:$0xff]  ;;  %v85_v32 = vld [vmem:[%s6420_s1 + $0x168] sm:$0xff]  ;;  %v4658_v41 = vld [vmem:[%s6421_s7 + $0xb0] sm:$0xff] }
  0xd1   :  { %559 = vrot.lane.b32.xlu2 %v4255_v25, %s3223_s27  ;;  %v4590_v25 = vld [vmem:[%s6421_s7 + $0x90] sm:$0xff]  ;;  %v1951_v57 = vadd.f32 %v1950_v8, %v1949_v24  ;;  %v2069_v8 = vadd.f32 %v2068_v45, %v2067_v40  ;;  %v4635_v24 = vld [vmem:[%s6421_s7 + $0xa8] sm:$0xff]  ;;  %v699_v56 = vrot.slane %v4236_v33, 1  ;;  %1229 = vmatpush.msra.mxu1 %v67_v58  ;;  %v84_v45 = vld [vmem:[%s6420_s1 + $0x160] sm:$0xff]  ;;  %v1984_v23 = vmax.f32 %v1976_v30, %v1983_v61 }
  0xd2   :  { %v2070_v27 = vsel %vm254_vm1, %v4590_v25, 0.0  ;;  %1280 = vmatpush.msra.mxu2 %v85_v32  ;;  %v66_v40 = vld [vmem:[%s6420_s1 + $0xd0] sm:$0xff]  ;;  %v1986_v35 = vmax.f32 %v4626_v37, %v1985_v62  ;;  %v3038_v44 = vpack.i.bf16 %v4601_v31, %v4572_v15  ;;  %v1034_v37 = vpop.permute.xlu1 %1033  ;;  %v2078_v22 = vsel %vm254_vm1, %v4658_v41, 0.0  ;;  %v63_v32 = vld [vmem:[%s6420_s1 + $0xb8] sm:$0xff] }
  0xd3   :  { %728 = vrot.lane.b32.xlu1 %v4418_v19, %s3223_s27  ;;  %v4617_v19 = vsel %vm6451_vm8, %v3959_v3, %v688_v6  ;;  %v1953_v20 = vadd.f32 %v1952_v5, %v1951_v57  ;;  %v2071_v29 = vadd.f32 %v2070_v27, %v2069_v8  ;;  %v2072_v5 = vsel %vm254_vm1, %v4609_v4, 0.0  ;;  %v65_v8 = vld [vmem:[%s6420_s1 + $0xc8] sm:$0xff]  ;;  %v99_v27 = vld [vmem:[%s6420_s1 + $0x1d8] sm:$0xf]  ;;  %1230 = vmatpush.msra.mxu1 %v66_v40  ;;  %v98_v30 = vld [vmem:[%s6420_s1 + $0x1d0] sm:$0xff] }
  0xd4   :  { %1860 = vrot.lane.b32.xlu0 %v4430_v16, %s3217_s23  ;;  %v1981_v16 = vsel %vm254_vm1, %v4473_v59, -inf  ;;  %v2074_v59 = vsel %vm254_vm1, %v4622_v49, 0.0  ;;  %v700_v57 = vrot.slane %v4307_v51, 1  ;;  %1281 = vmatpush.msra.mxu2 %v84_v45  ;;  %v2908_v40 = vld [vmem:[%s6421_s7 + $0xc8] sm:$0xff]  ;;  %v2909_v45 = vld [vmem:[%s6421_s7 + $0xd0] sm:$0xff] }
  0xd5   :  { %v1955_v63 = vadd.f32 %v4513_v54, %v1953_v20  ;;  %v1982_v0 = vmax.f32 %v4613_v42, %v1981_v16  ;;  %v4653_v54 = vsel %vm6451_vm8, %v688_v6, %v690_v2  ;;  %v2073_v38 = vadd.f32 %v2072_v5, %v2071_v29  ;;  %v83_v20 = vld [vmem:[%s6420_s1 + $0x158] sm:$0xff]  ;;  %2862 = vmatpush.msk.msra.mxu3 %vm216_vm10, %v99_v27  ;;  %v82_v29 = vld [vmem:[%s6420_s1 + $0x150] sm:$0xff]  ;;  %v97_v5 = vld [vmem:[%s6420_s1 + $0x1c8] sm:$0xff] }
  0xd6   :  { %v1041_v2 = vsel %vm6452_vm4, %v4498_v48, %v1032_v53  ;;  %v2076_v42 = vsel %vm254_vm1, %v4635_v24, 0.0  ;;  %v6461_v16 = vrot.slane %v4324_v34, 2  ;;  %1231 = vmatpush.msra.mxu1 %v65_v8  ;;  %1282 = vmatpush.msra.mxu2 %v83_v20  ;;  %v4746_v58 = vsel %vm6454_vm9, %v699_v56, %v700_v57 }
  0xd7   :  { %v1957_v6 = vadd.f32 %v4517_v12, %v1955_v63  ;;  %v2906_v12 = vld [vmem:[%s6421_s7 + $0xb8] sm:$0xff]  ;;  %v2075_v48 = vadd.f32 %v2074_v59, %v2073_v38  ;;  %v6463_v63 = vrot.slane %v4236_v33, 3  ;;  %v4740_v62 = vsel %vm164_vm5, %v1041_v2, 0.0  ;;  %1336 = vmatpush.msra.mxu3 %v98_v30 }
  0xd8   :  { %v4706_v53 = vsel %vm6453_vm11, %v6461_v16, %v4017_v13  ;;  %v2080_v59 = vsel %vm254_vm1, %v2906_v12, 0.0  ;;  %1232 = vmatpush.msra.mxu1 %v64_v14  ;;  %1283 = vmatpush.msra.mxu2 %v82_v29  ;;  %v2099_v8 = vsel %vm254_vm1, %v4563_v17, -inf  ;;  %v2100_v27 = vsel %vm254_vm1, %v4568_v7, -inf  ;;  %v61_v14 = vld [vmem:[%s6420_s1 + $0xa8] sm:$0xff] }
  0xd9   :  { %3034 = vrot.lane.b32.xlu2 %v3033_v18, %s3222_s5  ;;  %v1988_v18 = vmax.f32 %v1980_v36, %v4540_v39  ;;  %v1959_v39 = vadd.f32 %v4520_v47, %v1957_v6  ;;  %v4711_v36 = vld [vmem:[%s6421_s7 + $0xc0] sm:$0xff]  ;;  %v3058_v47 = vpack.i.bf16 %v4653_v54, %v4617_v19  ;;  %v2077_v61 = vadd.f32 %v2076_v42, %v2075_v48  ;;  %v1731_v42 = vpop.permute.xlu0 %1730  ;;  %v4916_v19 = vld [vmem:[%s6422_s8 + $0x28] sm:$0xff] }
  0xda   :  { %v2082_v56 = vsel %vm254_vm1, %v4711_v36, 0.0  ;;  %1337 = vmatpush.msra.mxu3 %v97_v5  ;;  %v2101_v20 = vsel %vm254_vm1, %v4590_v25, -inf  ;;  %v2105_v17 = vsel %vm254_vm1, %v4635_v24, -inf  ;;  %v2107_v7 = vsel %vm254_vm1, %v4658_v41, -inf  ;;  %1233 = vmatpush.msra.mxu1 %v63_v32 }
  0xdb   :  { %3044 = vrot.lane.b32.xlu1 %v3043_v26, %s3219_s24  ;;  %v6462_v26 = vpack.i.bf16 %v4405_v50, %v4395_v10  ;;  %v4735_v10 = vsel %vm179_vm7, %v3942_v52, %v6463_v63  ;;  %v4737_v50 = vmax.f32 %v1982_v0, %v1984_v23  ;;  %v4751_v38 = vmax.f32 %v1986_v35, %v1988_v18  ;;  %v81_v23 = vld [vmem:[%s6420_s1 + $0x148] sm:$0xff]  ;;  %v62_v35 = vld [vmem:[%s6420_s1 + $0xb0] sm:$0xff]  ;;  %v96_v18 = vld [vmem:[%s6420_s1 + $0x1c0] sm:$0xff] }
  0xdc   :  { %v1042_v0 = vsel %vm6452_vm4, %v1040_v21, %v1034_v37  ;;  %v2079_v6 = vadd.f32 %v2078_v22, %v2077_v61  ;;  %v1960_v2 = vmul.f32 0.0625, %v1959_v39  ;;  %v2103_v21 = vsel %vm254_vm1, %v4622_v49, -inf  ;;  %v80_v49 = vld [vmem:[%s6420_s1 + $0x140] sm:$0xff]  ;;  %1284 = vmatpush.msra.mxu2 %v81_v23  ;;  %v2910_v37 = vld [vmem:[%s6421_s7 + $0xd8] sm:$0xff]  ;;  %1234 = vmatpush.msra.mxu1 %v62_v35 }
  0xdd   :  { %3054 = vrot.lane.b32.xlu0 %v6462_v26, %s3222_s5  ;;  %v1047_v25 = vrot.slane %v4740_v62, 7  ;;  %v2084_v24 = vsel %vm254_vm1, %v2908_v40, 0.0  ;;  %v2102_v41 = vsel %vm254_vm1, %v4609_v4, -inf  ;;  %v2109_v39 = vsel %vm254_vm1, %v2906_v12, -inf  ;;  %1338 = vmatpush.msra.mxu3 %v96_v18  ;;  %v79_v4 = vld [vmem:[%s6420_s1 + $0x138] sm:$0xff]  ;;  %v2911_v26 = vld [vmem:[%s6421_s7 + $0xe0] sm:$0xff] }
  0xde   :  { %v2081_v48 = vadd.f32 %v2080_v59, %v2079_v6  ;;  %v2086_v16 = vsel %vm254_vm1, %v2909_v45, 0.0  ;;  %v2104_v22 = vmax.f32 %v2099_v8, %v2103_v21  ;;  %v1737_v61 = vsel %vm155_vm2, 0.0, %v1731_v42  ;;  %1285 = vmatpush.msra.mxu2 %v80_v49  ;;  %v95_v59 = vld [vmem:[%s6420_s1 + $0x1b8] sm:$0xff]  ;;  %1235 = vmatpush.msra.mxu1 %v61_v14  ;;  %v4851_v35 = vld [vmem:[%s6422_s8] sm:$0xff]  ;;  %v2913_v18 = vld [vmem:[%s6421_s7 + $0xf0] sm:$0xff] }
  0xdf   :  { %v2106_v29 = vmax.f32 %v2100_v27, %v2105_v17  ;;  %v2108_v5 = vmax.f32 %v2101_v20, %v2107_v7  ;;  %v2111_v63 = vsel %vm254_vm1, %v4711_v36, -inf  ;;  %v2110_v6 = vmax.f32 %v2102_v41, %v2109_v39  ;;  %v60_v36 = vld [vmem:[%s6420_s1 + $0xa0] sm:$0xff]  ;;  %v2912_v27 = vld [vmem:[%s6421_s7 + $0xe8] sm:$0xff]  ;;  %1339 = vmatpush.msra.mxu3 %v95_v59  ;;  %v2914_v49 = vld [vmem:[%s6421_s7 + $0xf8] sm:$0xff] }
  0xe0   :  { %v2115_v23 = vsel %vm254_vm1, %v2909_v45, -inf  ;;  %v4836_v42 = vsel %vm164_vm5, %v1042_v0, 0.0  ;;  %v2088_v8 = vsel %vm254_vm1, %v2910_v37, 0.0  ;;  %1286 = vmatpush.msra.mxu2 %v79_v4  ;;  %v94_v45 = vld [vmem:[%s6420_s1 + $0x1b0] sm:$0xff]  ;;  %v2112_v0 = vmax.f32 %v2104_v22, %v2111_v63  ;;  %1236 = vmatpush.msra.mxu1 %v60_v36  ;;  %v4860_v7 = vld [vmem:[%s6422_s8 + $0x8] sm:$0xff]  ;;  %v4996_v62 = vld [vmem:[%s6422_s8 + $0x60] sm:$0xff] }
  0xe1   :  { %736 = vrot.lane.b32.xlu2 %v4468_v9, %s3224_s19  ;;  %v2083_v9 = vadd.f32 %v2082_v56, %v2081_v48  ;;  %v2113_v56 = vsel %vm254_vm1, %v2908_v40, -inf  ;;  %v2117_v40 = vsel %vm254_vm1, %v2910_v37, -inf  ;;  %v2116_v20 = vmax.f32 %v2108_v5, %v2115_v23  ;;  %1340 = vmatpush.msra.mxu3 %v94_v45  ;;  %v59_v52 = vld [vmem:[%s6420_s1 + $0x98] sm:$0xff] }
  0xe2   :  { %v2114_v48 = vmax.f32 %v2106_v29, %v2113_v56  ;;  %v2119_v17 = vsel %vm254_vm1, %v2911_v26, -inf  ;;  %v2118_v41 = vmax.f32 %v2110_v6, %v2117_v40  ;;  %v2121_v39 = vsel %vm254_vm1, %v2912_v27, -inf  ;;  %1237 = vmatpush.msra.mxu1 %v59_v52 }
  0xe3   :  { %v4808_v12 = vpop.permute.xlu2 %185  ;;  %1993 = vrot.lane.b32.xlu1 %v1960_v2, %s3216_s17  ;;  %v2085_v32 = vadd.f32 %v2084_v24, %v2083_v9  ;;  %v78_v2 = vld [vmem:[%s6420_s1 + $0x130] sm:$0xff]  ;;  %v2123_v37 = vsel %vm254_vm1, %v2913_v18, -inf  ;;  %v1735_v9 = vpop.permute.xlu0 %1734  ;;  %v2092_v22 = vsel %vm254_vm1, %v2912_v27, 0.0  ;;  %v2125_v14 = vsel %vm254_vm1, %v2914_v49, -inf }
  0xe4   :  { %2851 = vmatmul.msk.f32.vlgmr.msra.gmra.mxu0 %vm4789_vm13, %v4808_v12  ;;  %1287 = vmatpush.msra.mxu2 %v78_v2  ;;  %v2094_v5 = vsel %vm254_vm1, %v2913_v18, 0.0  ;;  %v2120_v15 = vmax.f32 %v2112_v0, %v2119_v17  ;;  %v2213_v31 = vsel %vm254_vm1, %v4860_v7, 0.0  ;;  %v2122_v63 = vmax.f32 %v2114_v48, %v2121_v39 }
  0xe5   :  { %924 = vrot.lane.b32.xlu0 %v4545_v60, %s3224_s19  ;;  %v1991_v60 = vmax.f32 %v4737_v50, %v4751_v38  ;;  %v2087_v21 = vadd.f32 %v2086_v16, %v2085_v32  ;;  %v2090_v50 = vsel %vm254_vm1, %v2911_v26, 0.0  ;;  %v1739_v38 = vsel %vm1738_vm14, %v1737_v61, 0.0  ;;  %v4870_v16 = vld [vmem:[%s6422_s8 + $0x10] sm:$0xff]  ;;  %v4884_v26 = vld [vmem:[%s6422_s8 + $0x18] sm:$0xff]  ;;  %v4897_v32 = vld [vmem:[%s6422_s8 + $0x20] sm:$0xff] }
  0xe6   :  { %v4879_v4 = vsel %vm1740_vm15, %v1739_v38, %v1735_v9  ;;  %v2212_v61 = vsel %vm254_vm1, %v4851_v35, 0.0  ;;  %v2124_v59 = vmax.f32 %v2116_v20, %v2123_v37  ;;  %v2215_v56 = vsel %vm254_vm1, %v4870_v16, 0.0  ;;  %v4963_v37 = vld [vmem:[%s6422_s8 + $0x38] sm:$0xff]  ;;  %v4973_v9 = vld [vmem:[%s6422_s8 + $0x48] sm:$0xff] }
  0xe7   :  { %v2089_v24 = vadd.f32 %v2088_v8, %v2087_v21  ;;  %v2214_v6 = vadd.f32 %v2213_v31, %v2212_v61  ;;  %v2126_v2 = vmax.f32 %v2118_v41, %v2125_v14  ;;  %v2096_v8 = vsel %vm254_vm1, %v2914_v49, 0.0 }
  0xe8   :  { %v898_v40 = vrot.slane %v4461_v55, 4  ;;  %v899_v45 = vrot.slane %v4450_v28, 4  ;;  %v6466_v27 = vrot.slane %v4324_v34, 1  ;;  %v4931_v38 = vsel %vm169_vm6, 0.0, %v1047_v25  ;;  %v4939_v34 = vld [vmem:[%s6422_s8 + $0x30] sm:$0xff] }
  0xe9   :  { %3039 = vrot.lane.b32.xlu2 %v3038_v44, %s3221_s26  ;;  %v2091_v29 = vadd.f32 %v2090_v50, %v2089_v24  ;;  %v2216_v54 = vadd.f32 %v2215_v56, %v2214_v6  ;;  %v2219_v50 = vsel %vm254_vm1, %v4897_v32, 0.0  ;;  %6467 = vst [vmem:[#allocation9_spill] sm:$0xff] %v4931_v38  ;;  %v4933_v0 = vmax.f32 %v2120_v15, %v2122_v63  ;;  %v4991_v15 = vld [vmem:[%s6422_s8 + $0x58] sm:$0xff]  ;;  %v5009_v56 = vld [vmem:[%s6422_s8 + $0x68] sm:$0xff] }
  0xea   :  { %v4924_v21 = vsel %vm6454_vm9, %v700_v57, %v6466_v27  ;;  %v4941_v18 = vmax.f32 %v2124_v59, %v2126_v2  ;;  %v6434_v48 = vrot.slane %v4450_v28, 7  ;;  %v2221_v20 = vsel %vm254_vm1, %v4916_v19, 0.0  ;;  %v5056_v27 = vld [vmem:[%s6422_s8 + $0x90] sm:$0xff] }
  0xeb   :  { %v4891_v44 = vpop.permute.xlu2 %187  ;;  %1997 = vrot.lane.b32.xlu1 %v1991_v60, %s3217_s23  ;;  %v2093_v36 = vadd.f32 %v2092_v22, %v2091_v29  ;;  %v2217_v60 = vsel %vm254_vm1, %v4884_v26, 0.0  ;;  %v6468_v17 = vrot.slane %v4415_v46, 2  ;;  %v4953_v24 = vsel %vm216_vm10, %v898_v40, %v899_v45  ;;  %v5035_v40 = vld [vmem:[%s6422_s8 + $0x80] sm:$0xff] }
  0xec   :  { %v253_v23 = vsel %vm251_vm12, %v3945_v1, %v4891_v44  ;;  %v1048_v1 = vrot.slane %v4836_v42, 7  ;;  %v909_v42 = vrot.slane %v4461_v55, 7  ;;  %v2218_v51 = vadd.f32 %v2217_v60, %v2216_v54 }
  0xed   :  { %3059 = vrot.lane.b32.xlu0 %v3058_v47, %s3221_s26  ;;  %1191 = vmatmul.f32.gmra.mxu0 %v253_v23  ;;  %v2095_v47 = vadd.f32 %v2094_v5, %v2093_v36  ;;  %v923_v49 = vsel %vm6453_vm11, %v6468_v17, %v4017_v13  ;;  %v6469_v41 = vrot.slane %v4415_v46, 4  ;;  %v4986_v5 = vld [vmem:[%s6422_s8 + $0x50] sm:$0xff]  ;;  %v3048_v6 = vpack.i.bf16 %v4924_v21, %v4746_v58  ;;  %v5019_v36 = vld [vmem:[%s6422_s8 + $0x78] sm:$0xff] }
  0xee   :  { %v2220_v22 = vadd.f32 %v2219_v50, %v2218_v51  ;;  %v4978_v14 = vsel %vm169_vm6, %v1047_v25, %v1048_v1  ;;  %v4981_v61 = vsel %vm169_vm6, %v1048_v1, 0.0  ;;  %v2223_v25 = vsel %vm254_vm1, %v4939_v34, 0.0  ;;  %v5014_v23 = vld [vmem:[%s6422_s8 + $0x70] sm:$0xff]  ;;  %v5047_v1 = vld [vmem:[%s6422_s8 + $0xc0] sm:$0xff]  ;;  %v5061_v21 = vld [vmem:[%s6422_s8 + $0x98] sm:$0xff] }
  0xef   :  { %v2097_v57 = vadd.f32 %v2096_v8, %v2095_v47  ;;  %v4958_v39 = vsel %vm216_vm10, %v899_v45, %v6469_v41  ;;  %6470 = vst [vmem:[#allocation10_spill] sm:$0xff] %v4978_v14  ;;  %v2129_v58 = vmax.f32 %v4933_v0, %v4941_v18  ;;  %v5030_v8 = vsel %vm169_vm6, %v909_v42, %v6434_v48  ;;  %v5040_v45 = vld [vmem:[%s6422_s8 + $0x88] sm:$0xff]  ;;  %v5066_v50 = vld [vmem:[%s6422_s8 + $0xa0] sm:$0xff] }
  0xf0   :  { %v2222_v2 = vadd.f32 %v2221_v20, %v2220_v22  ;;  %v3068_v60 = vpack.i.bf16 %v4958_v39, %v4953_v24  ;;  %v2225_v54 = vsel %vm254_vm1, %v4963_v37, 0.0  ;;  %6471 = vst [vmem:[#allocation11_spill] sm:$0xff] %v5047_v1  ;;  %v5051_v47 = vsel %vm6452_vm4, %v4879_v4, 0.0  ;;  %v5075_v51 = vld [vmem:[%s6422_s8 + $0xa8] sm:$0xff] }
  0xf1   :  { %738 = vrot.lane.b32.xlu2 %v4706_v53, %s3224_s19  ;;  %v4968_v53 = vld [vmem:[%s6422_s8 + $0x40] sm:$0xff]  ;;  %v2098_v29 = vmul.f32 0.0625, %v2097_v57  ;;  %6472 = vst [vmem:[#allocation12_spill] sm:$0xff] %v5051_v47  ;;  %v2229_v42 = vsel %vm254_vm1, %v4973_v9, 0.0  ;;  %v5080_v57 = vld [vmem:[%s6422_s8 + $0xb0] sm:$0xff]  ;;  %v2231_v18 = vsel %vm254_vm1, %v4986_v5, 0.0 }
  0xf2   :  { %v2224_v0 = vadd.f32 %v2223_v25, %v2222_v2  ;;  %v2227_v4 = vsel %vm254_vm1, %v4968_v53, 0.0  ;;  %v2233_v20 = vsel %vm254_vm1, %v4991_v15, 0.0  ;;  %v5088_v17 = vsel %vm254_vm1, %v4996_v62, 0.0  ;;  %v5114_v25 = vld [vmem:[%s6422_s8 + $0xd0] sm:$0xff] }
  0xf3   :  { %v5002_v59 = vpop.permute.xlu2 %3009  ;;  %2131 = vrot.lane.b32.xlu1 %v2098_v29, %s3216_s17  ;;  %v5096_v41 = vsel %vm254_vm1, %v5014_v23, 0.0  ;;  %v5100_v39 = vsel %vm254_vm1, %v5019_v36, 0.0  ;;  %v5104_v22 = vsel %vm254_vm1, %v5035_v40, 0.0  ;;  %v5109_v29 = vld [vmem:[%s6422_s8 + $0xc8] sm:$0xff]  ;;  %6474 = vst [vmem:[#allocation14_spill] sm:$0xff] %v5114_v25  ;;  %v5118_v2 = vsel %vm254_vm1, %v5040_v45, 0.0 }
  0xf4   :  { %v2226_v24 = vadd.f32 %v2225_v54, %v2224_v0  ;;  %6473 = vst [vmem:[#allocation13_spill] sm:$0xff] %v5109_v29  ;;  %v5122_v54 = vsel %vm254_vm1, %v5056_v27, 0.0  ;;  %v5126_v0 = vsel %vm254_vm1, %v5061_v21, 0.0  ;;  %v5130_v63 = vsel %vm254_vm1, %v5066_v50, 0.0 }
  0xf5   :  { %926 = vrot.lane.b32.xlu0 %v923_v49, %s3224_s19  ;;  %v5092_v49 = vsel %vm254_vm1, %v5009_v56, 0.0  ;;  %6475 = vst [vmem:[#allocation15_spill] sm:$0xff] %v5130_v63  ;;  %v5135_v48 = vsel %vm254_vm1, %v5075_v51, 0.0  ;;  %v5139_v33 = vsel %vm254_vm1, %v5080_v57, 0.0  ;;  %v2390_v11 = vsel %vm254_vm1, %v5047_v1, 0.0 }
  0xf6   :  { %v2228_v31 = vadd.f32 %v2227_v4, %v2226_v24  ;;  %6476 = vst [vmem:[#allocation16_spill] sm:$0xff] %v5135_v48  ;;  %v2391_v4 = vsel %vm254_vm1, %v5109_v29, 0.0  ;;  %v5154_v24 = vsel %vm254_vm1, %v5114_v25, 0.0  ;;  %v1109_v1 = vrot.slane %v4978_v14, 2  ;;  %v93_v29 = vld [vmem:[%s6420_s1 + $0x1a8] sm:$0xff]  ;;  %v76_v14 = vld [vmem:[%s6420_s1 + $0x120] sm:$0xff] }
  0xf7   :  { %6477 = vst [vmem:[#allocation17_spill] sm:$0xff] %v5139_v33  ;;  %v77_v33 = vld [vmem:[%s6420_s1 + $0x128] sm:$0xff]  ;;  %v878_v25 = vrot.slane %v4450_v28, 6  ;;  %v2260_v13 = vsel %vm254_vm1, %v4851_v35, -inf  ;;  %v2261_v55 = vsel %vm254_vm1, %v4860_v7, -inf  ;;  %v2263_v48 = vsel %vm254_vm1, %v4884_v26, -inf  ;;  %1341 = vmatpush.msra.mxu3 %v93_v29 }
  0xf8   :  { %v2230_v47 = vadd.f32 %v2229_v42, %v2228_v31  ;;  %v58_v42 = vld [vmem:[%s6420_s1 + $0x90] sm:$0xff]  ;;  %1288 = vmatpush.msra.mxu2 %v77_v33  ;;  %v92_v31 = vld [vmem:[%s6420_s1 + $0x1a0] sm:$0xff]  ;;  %v2264_v63 = vsel %vm254_vm1, %v4897_v32, -inf  ;;  %v2266_v35 = vsel %vm254_vm1, %v4916_v19, -inf  ;;  %v57_v7 = vld [vmem:[%s6420_s1 + $0x88] sm:$0xff]  ;;  %v6478_v29 = vrot.slane %v4981_v61, 2 }
  0xf9   :  { %3049 = vrot.lane.b32.xlu2 %v3048_v6, %s3220_s25  ;;  %v5148_v6 = vld [vmem:[%s6422_s8 + $0xd8] sm:$0xff]  ;;  %v2265_v52 = vmax.f32 %v2260_v13, %v2264_v63  ;;  %v2267_v33 = vmax.f32 %v2261_v55, %v2266_v35  ;;  %1238 = vmatpush.msra.mxu1 %v58_v42  ;;  %v2272_v13 = vsel %vm254_vm1, %v4968_v53, -inf  ;;  %v5212_v55 = vld [vmem:[%s6422_s8 + $0xe0] sm:$0xff]  ;;  %v5223_v53 = vsel %vm6451_vm8, %v3959_v3, %v876_v43  ;;  %v5239_v42 = vld [vmem:[%s6422_s8 + $0xe8] sm:$0xff] }
  0xfa   :  { %1289 = vmatpush.msra.mxu2 %v76_v14  ;;  %v75_v32 = vld [vmem:[%s6420_s1 + $0x118] sm:$0xff]  ;;  %1342 = vmatpush.msra.mxu3 %v92_v31  ;;  %v56_v14 = vld [vmem:[%s6420_s1 + $0x80] sm:$0xff]  ;;  %v2282_v35 = vsel %vm254_vm1, %v5009_v56, -inf  ;;  %v6479_v56 = vrot.slane %v4415_v46, 7  ;;  %vm262_vm5 = vcmask 687104   ;;  %vm1132_vm4 = vcmask 752640  }
  0xfb   :  { %v5156_v38 = vpop.permute.xlu2 %245  ;;  %2135 = vrot.lane.b32.xlu1 %v2129_v58, %s3217_s23  ;;  %v2262_v58 = vsel %vm254_vm1, %v4870_v16, -inf  ;;  %v2268_v16 = vsel %vm254_vm1, %v4939_v34, -inf  ;;  %v91_v19 = vld [vmem:[%s6420_s1 + $0x198] sm:$0xff]  ;;  %v2392_v34 = vadd.f32 %v2391_v4, %v2390_v11  ;;  %v1111_v4 = vsel %vm6453_vm11, %v1109_v1, %v6478_v29  ;;  %1239 = vmatpush.msra.mxu1 %v57_v7 }
  0xfc   :  { %v2269_v63 = vmax.f32 %v2262_v58, %v2268_v16  ;;  %1290 = vmatpush.msra.mxu2 %v75_v32  ;;  %1343 = vmatpush.msra.mxu3 %v91_v19  ;;  %v2273_v1 = vmax.f32 %v2265_v52, %v2272_v13  ;;  %v6480_v52 = vrot.slane %v4450_v28, 7  ;;  %v2284_v13 = vsel %vm254_vm1, %v5014_v23, -inf }
  0xfd   :  { %3069 = vrot.lane.b32.xlu0 %v3068_v60, %s3222_s5  ;;  %v2232_v60 = vadd.f32 %v2231_v18, %v2230_v47  ;;  %v2270_v47 = vsel %vm254_vm1, %v4963_v37, -inf  ;;  %v2395_v37 = vsel %vm254_vm1, %v5148_v6, 0.0  ;;  %v2274_v18 = vsel %vm254_vm1, %v4973_v9, -inf  ;;  %1240 = vmatpush.msra.mxu1 %v56_v14  ;;  %v5290_v14 = vld [vmem:[%s6422_s8 + $0xf0] sm:$0xff] }
  0xfe   :  { %v2271_v31 = vmax.f32 %v2263_v48, %v2270_v47  ;;  %v2276_v9 = vsel %vm254_vm1, %v4986_v5, -inf  ;;  %v2275_v48 = vmax.f32 %v2267_v33, %v2274_v18  ;;  %v2278_v5 = vsel %vm254_vm1, %v4991_v15, -inf }
  0xff   :  { %v2234_v26 = vadd.f32 %v2233_v20, %v2232_v60  ;;  %v5226_v20 = vsel %vm6451_vm8, %v876_v43, %v878_v25  ;;  %v74_v43 = vld [vmem:[%s6420_s1 + $0x110] sm:$0xff]  ;;  %v2280_v60 = vsel %vm254_vm1, %v4996_v62, -inf  ;;  %v2277_v15 = vmax.f32 %v2269_v63, %v2276_v9  ;;  %v89_v62 = vld [vmem:[%s6420_s1 + $0x188] sm:$0xff] }
 0x100   :  { %v3073_v7 = vpack.i.bf16 %v5226_v20, %v5223_v53  ;;  %v5277_v33 = vsel %vm169_vm6, %v6480_v52, %v6479_v56  ;;  %v2394_v16 = vadd.f32 %v5154_v24, %v2392_v34  ;;  %v2399_v47 = vsel %vm254_vm1, %v5239_v42, 0.0  ;;  %1291 = vmatpush.msra.mxu2 %v74_v43  ;;  %v5295_v24 = vld [vmem:[%s6422_s8 + $0xb8] sm:$0xff] }
 0x101   :  { %914 = vrot.lane.b32.xlu2 %v5030_v8, %s3223_s27  ;;  %v2236_v11 = vadd.f32 %v5088_v17, %v2234_v26  ;;  %v90_v8 = vld [vmem:[%s6420_s1 + $0x190] sm:$0xff]  ;;  %v5251_v17 = vsel %vm254_vm1, %v5212_v55, 0.0  ;;  %v2279_v19 = vmax.f32 %v2271_v31, %v2278_v5  ;;  %v2281_v63 = vmax.f32 %v2273_v1, %v2280_v60  ;;  %v88_v31 = vld [vmem:[%s6420_s1 + $0x180] sm:$0xff] }
 0x102   :  { %1344 = vmatpush.msra.mxu3 %v90_v8  ;;  %v2283_v18 = vmax.f32 %v2275_v48, %v2282_v35  ;;  %v2286_v53 = vsel %vm254_vm1, %v5019_v36, -inf  ;;  %v2290_v29 = vsel %vm254_vm1, %v5040_v45, -inf  ;;  %v5314_v36 = vld [vmem:[%s6422_s8 + $0xf8] sm:$0xff]  ;;  %v2285_v45 = vmax.f32 %v2277_v15, %v2284_v13 }
 0x103   :  { %v5253_v25 = vpop.permute.xlu2 %345  ;;  %v2238_v58 = vadd.f32 %v5092_v49, %v2236_v11  ;;  %v73_v49 = vld [vmem:[%s6420_s1 + $0x108] sm:$0xff]  ;;  %v2288_v11 = vsel %vm254_vm1, %v5035_v40, -inf  ;;  %v5318_v40 = vsel %vm254_vm1, %v5295_v24, -inf  ;;  %v2401_v9 = vsel %vm254_vm1, %v5290_v14, 0.0 }
 0x104   :  { %2853 = vmatmul.msk.f32.gmra.mxu0 %vm4789_vm13, %v5253_v25  ;;  %1292 = vmatpush.msra.mxu2 %v73_v49  ;;  %v2287_v1 = vmax.f32 %v2279_v19, %v2286_v53  ;;  %v2292_v48 = vsel %vm254_vm1, %v5056_v27, -inf  ;;  %v2291_v60 = vmax.f32 %v2283_v18, %v2290_v29  ;;  %v2294_v27 = vsel %vm254_vm1, %v5061_v21, -inf  ;;  %v6482_v53 = vld [vmem:[#allocation15_spill] sm:$0xff]  ;;  %v6483_v29 = vld [vmem:[#allocation16_spill] sm:$0xff] }
 0x105   :  { %1113 = vrot.lane.b32.xlu0 %v1111_v4, %s3224_s19  ;;  %v2240_v26 = vadd.f32 %v5096_v41, %v2238_v58  ;;  %v5283_v32 = vpop.permute.xlu1 %3004  ;;  %1345 = vmatpush.msra.mxu3 %v89_v62  ;;  %v72_v4 = vld [vmem:[%s6420_s1 + $0x100] sm:$0xff]  ;;  %v2289_v58 = vmax.f32 %v2281_v63, %v2288_v11  ;;  %v2293_v15 = vmax.f32 %v2285_v45, %v2292_v48  ;;  %vm265_vm8 = vcmask 195584   ;;  %v6484_v45 = vld [vmem:[#allocation5_spill] sm:$0xff] }
 0x106   :  { %v3006_v41 = vunpack.i.l.bf16 %v5283_v32  ;;  %v3000_v34 = vpop.permute.xlu0 %2999  ;;  %1293 = vmatpush.msra.mxu2 %v72_v4  ;;  %v2298_v56 = vsel %vm254_vm1, %v5075_v51, -inf  ;;  %v2300_v21 = vsel %vm254_vm1, %v5080_v57, -inf }
 0x107   :  { %v2242_v23 = vadd.f32 %v5100_v39, %v2240_v26  ;;  %v3001_v20 = vunpack.i.l.bf16 %v3000_v34  ;;  %v2396_v39 = vadd.f32 %v2395_v37, %v2394_v16  ;;  %1346 = vmatpush.msra.mxu3 %v88_v31  ;;  %v2403_v37 = vsel %vm254_vm1, %v5314_v36, 0.0 }
 0x108   :  { %v3002_v35 = vunpack.i.h.bf16 %v3000_v34  ;;  %v2295_v16 = vmax.f32 %v2287_v1, %v2294_v27  ;;  %v2299_v63 = vmax.f32 %v2291_v60, %v2298_v56  ;;  %v888_v1 = vrot.slane %v4450_v28, 1  ;;  %v6487_v60 = vld [vmem:[#allocation17_spill] sm:$0xff] }
 0x109   :  { %v2244_v43 = vadd.f32 %v5104_v22, %v2242_v23  ;;  %682 = vrot.lane.b32.xlu2 %v4735_v10, %s3219_s24  ;;  %v255_v8 = vsel %vm254_vm1, %v4808_v12, %v3001_v20  ;;  %v3007_v10 = vunpack.i.h.bf16 %v5283_v32  ;;  %v2398_v49 = vadd.f32 %v5251_v17, %v2396_v39 }
 0x10a   :  { %v258_v5 = vsel %vm257_vm3, %v255_v8, %v3006_v41  ;;  %v256_v13 = vsel %vm254_vm1, %v4891_v44, %v3002_v35  ;;  %v5376_v44 = vld [vmem:[%s6422_s8 + $0x110] sm:$0xff]  ;;  %v2303_v20 = vmax.f32 %v2295_v16, %v5318_v40  ;;  %v6485_v39 = vrot.slane %v4981_v61, 2 }
 0x10b   :  { %v2246_v22 = vadd.f32 %v5118_v2, %v2244_v43  ;;  %1241 = vmatmul.f32.vlgmr.msra.gmra.mxu1 %v258_v5  ;;  %v5334_v12 = vpop.permute.xlu2 %3019  ;;  %v2296_v2 = vsel %vm254_vm1, %v5066_v50, -inf  ;;  %v5358_v50 = vld [vmem:[%s6422_s8 + $0x108] sm:$0xff]  ;;  %v2400_v51 = vadd.f32 %v2399_v47, %v2398_v49  ;;  %v2409_v5 = vsel %vm254_vm1, %v5376_v44, 0.0 }
 0x10c   :  { %v2297_v34 = vmax.f32 %v2289_v58, %v2296_v2  ;;  %v2407_v23 = vsel %vm254_vm1, %v5358_v50, 0.0  ;;  %v6486_v43 = vld [vmem:[#allocation8_spill] sm:$0xff] }
 0x10d   :  { %3074 = vrot.lane.b32.xlu0 %v3073_v7, %s3221_s26  ;;  %v2248_v62 = vadd.f32 %v5122_v54, %v2246_v22  ;;  %v236_v52 = vpop.permute.xlu1 %235  ;;  %v6481_v7 = vunpack.i.l.bf16 %v5002_v59  ;;  %v5353_v54 = vld [vmem:[%s6422_s8 + $0x100] sm:$0xff]  ;;  %v2402_v18 = vadd.f32 %v2401_v9, %v2400_v51  ;;  %v1112_v9 = vsel %vm6453_vm11, %v6485_v39, %v6484_v45 }
 0x10e   :  { %v234_v26 = vpop.permute.xlu0 %233  ;;  %v887_v8 = vrot.slane %v6486_v43, 1  ;;  %v5398_v48 = vmax.f32 %v2297_v34, %v2299_v63  ;;  %v5409_v22 = vld [vmem:[%s6422_s8 + $0x120] sm:$0xff]  ;;  %v6490_v63 = vld [vmem:[#allocation13_spill] sm:$0xff]  ;;  %v2441_v39 = vsel %vm254_vm1, %v5148_v6, -inf  ;;  %vm6499_vm11 = vcmask 351232  }
 0x10f   :  { %v260_v32 = vsel %vm108_vm0, %v3006_v41, %v6481_v7  ;;  %v2250_v17 = vadd.f32 %v5126_v0, %v2248_v62  ;;  %v266_v19 = vsel %vm265_vm8, %v234_v26, %v5156_v38  ;;  %v3012_v41 = vunpack.i.h.bf16 %v5002_v59  ;;  %v5381_v38 = vld [vmem:[%s6422_s8 + $0x118] sm:$0xff] }
 0x110   :  { %v263_v57 = vsel %vm262_vm5, %v260_v32, %v234_v26  ;;  %2863 = vmatmul.msk.f32.vlgmr.msra.gmra.mxu3 %vm1132_vm4, %v266_v19  ;;  %v2257_v0 = vsel %vm254_vm1, %v5295_v24, 0.0  ;;  %v2405_v59 = vsel %vm254_vm1, %v5353_v54, 0.0  ;;  %v2301_v24 = vmax.f32 %v2293_v15, %v2300_v21  ;;  %v6489_v19 = vld [vmem:[#allocation11_spill] sm:$0xff] }
 0x111   :  { %1294 = vmatmul.f32.vlgmr.msra.gmra.mxu2 %v263_v57  ;;  %v2252_v47 = vadd.f32 %v6482_v53, %v2250_v17  ;;  %916 = vrot.lane.b32.xlu2 %v5277_v33, %s3223_s27  ;;  %v259_v33 = vsel %vm257_vm3, %v256_v13, %v3007_v10  ;;  %v2404_v11 = vadd.f32 %v2403_v37, %v2402_v18  ;;  %v2411_v58 = vsel %vm254_vm1, %v5381_v38, 0.0 }
 0x112   :  { %v261_v35 = vsel %vm108_vm0, %v3007_v10, %v3012_v41  ;;  %v889_v27 = vsel %vm6454_vm9, %v887_v8, %v888_v1  ;;  %v6488_v15 = vrot.slane %v4415_v46, 1  ;;  %v3021_v62 = vunpack.i.l.bf16 %v5334_v12  ;;  %v2928_v46 = vld [vmem:[%s6422_s8 + $0x128] sm:$0xff]  ;;  %v5473_v8 = vld [vmem:[%s6422_s8 + $0x150] sm:$0xff] }
 0x113   :  { %v2254_v4 = vadd.f32 %v6483_v29, %v2252_v47  ;;  %1244 = vmatmul.f32.gmra.mxu1 %v259_v33  ;;  %v5390_v31 = vpop.permute.xlu2 %3024  ;;  %v2406_v40 = vadd.f32 %v2405_v59, %v2404_v11  ;;  %v5417_v2 = vmax.f32 %v2301_v24, %v2303_v20  ;;  %v264_v26 = vsel %vm262_vm5, %v261_v35, %v236_v52  ;;  %v6491_v47 = vld [vmem:[#allocation12_spill] sm:$0xff]  ;;  %v6492_v29 = vld [vmem:[#allocation14_spill] sm:$0xff] }
 0x114   :  { %v891_v49 = vsel %vm6454_vm9, %v888_v1, %v6488_v15  ;;  %v2413_v57 = vsel %vm254_vm1, %v5409_v22, 0.0  ;;  %v2438_v13 = vsel %vm254_vm1, %v6489_v19, -inf  ;;  %v2442_v41 = vsel %vm254_vm1, %v5212_v55, -inf  ;;  %v2929_v55 = vld [vmem:[%s6422_s8 + $0x130] sm:$0xff]  ;;  %v5461_v20 = vld [vmem:[%s6422_s8 + $0x148] sm:$0xff]  ;;  %v5478_v1 = vld [vmem:[%s6422_s8 + $0x158] sm:$0xff] }
 0x115   :  { %1115 = vrot.lane.b32.xlu0 %v1112_v9, %s3224_s19  ;;  %v2256_v37 = vadd.f32 %v6487_v60, %v2254_v4  ;;  %v2408_v56 = vadd.f32 %v2407_v23, %v2406_v40  ;;  %v5419_v16 = vpop.permute.xlu1 %3014  ;;  %v3063_v51 = vpack.i.bf16 %v891_v49, %v889_v27  ;;  %v2439_v18 = vsel %vm254_vm1, %v6490_v63, -inf  ;;  %v5494_v15 = vld [vmem:[%s6422_s8 + $0x160] sm:$0xff] }
 0x116   :  { %v248_v21 = vpop.permute.xlu0 %247  ;;  %v3016_v32 = vunpack.i.l.bf16 %v5419_v16  ;;  %v2444_v53 = vsel %vm254_vm1, %v5239_v42, -inf  ;;  %v3022_v59 = vunpack.i.h.bf16 %v5334_v12  ;;  %v5456_v42 = vld [vmem:[%s6422_s8 + $0x140] sm:$0xff]  ;;  %v2415_v33 = vsel %vm254_vm1, %v2928_v46, 0.0 }
 0x117   :  { %v2258_v7 = vadd.f32 %v2257_v0, %v2256_v37  ;;  %v267_v10 = vsel %vm265_vm8, %v236_v52, %v248_v21  ;;  %v2410_v17 = vadd.f32 %v2409_v5, %v2408_v56  ;;  %v1744_v0 = vrot.slane %v6491_v47, 7  ;;  %v6498_v12 = vld [vmem:[#allocation3_spill] sm:$0xff] }
 0x118   :  { %2864 = vmatmul.msk.f32.gmra.mxu3 %vm1132_vm4, %v267_v10  ;;  %v407_v52 = vsel %vm254_vm1, %v5253_v25, %v3016_v32  ;;  %v2930_v25 = vld [vmem:[%s6422_s8 + $0x138] sm:$0xff]  ;;  %v2440_v4 = vsel %vm254_vm1, %v6492_v29, -inf  ;;  %v2443_v9 = vmax.f32 %v2438_v13, %v2442_v41  ;;  %v2445_v5 = vmax.f32 %v2439_v18, %v2444_v53 }
 0x119   :  { %1297 = vmatmul.f32.gmra.mxu2 %v264_v26  ;;  %v2259_v34 = vmul.f32 0.041666668, %v2258_v7  ;;  %3064 = vrot.lane.b32.xlu2 %v3063_v51, %s3220_s25  ;;  %v2412_v23 = vadd.f32 %v2411_v58, %v2410_v17  ;;  %v409_v24 = vsel %vm257_vm3, %v407_v52, %v3021_v62  ;;  %v2446_v58 = vsel %vm254_vm1, %v5290_v14, -inf }
 0x11a   :  { %v2448_v60 = vsel %vm254_vm1, %v5314_v36, -inf  ;;  %v2306_v6 = vmax.f32 %v5398_v48, %v5417_v2  ;;  %v2417_v37 = vsel %vm254_vm1, %v2929_v55, 0.0  ;;  %v2450_v35 = vsel %vm254_vm1, %v5353_v54, -inf }
 0x11b   :  { %2308 = vrot.lane.b32.xlu1 %v2259_v34, %s3216_s17  ;;  %1247 = vmatmul.f32.gmra.mxu1 %v409_v24  ;;  %v5464_v11 = vpop.permute.xlu2 %389  ;;  %v2414_v40 = vadd.f32 %v2413_v57, %v2412_v23  ;;  %v2452_v27 = vsel %vm254_vm1, %v5358_v50, -inf  ;;  %v2419_v49 = vsel %vm254_vm1, %v2930_v25, 0.0  ;;  %v2421_v36 = vsel %vm254_vm1, %v5456_v42, 0.0  ;;  %v5506_v50 = vld [vmem:[%s6422_s8 + $0x168] sm:$0xff]  ;;  %v6493_v23 = vld [vmem:[#allocation9_spill] sm:$0xff]  ;;  %v6494_v24 = vld [vmem:[#allocation10_spill] sm:$0xff] }
 0x11c   :  { %v2423_v48 = vsel %vm254_vm1, %v5461_v20, 0.0  ;;  %v2425_v56 = vsel %vm254_vm1, %v5473_v8, 0.0  ;;  %v2427_v21 = vsel %vm254_vm1, %v5478_v1, 0.0  ;;  %v2447_v26 = vmax.f32 %v2440_v4, %v2446_v58  ;;  %v6496_v58 = vld [vmem:[#allocation4_spill] sm:$0xff] }
 0x11d   :  { %v2416_v14 = vadd.f32 %v2415_v33, %v2414_v40  ;;  %v5501_v2 = vpop.permute.xlu1 %401  ;;  %v2449_v7 = vmax.f32 %v2441_v39, %v2448_v60  ;;  %v5512_v10 = vmax.f32 %v2443_v9, %v2450_v35  ;;  %v5514_v51 = vmax.f32 %v2445_v5, %v2452_v27 }
 0x11e   :  { %v348_v54 = vpop.permute.xlu0 %347  ;;  %v2454_v17 = vsel %vm254_vm1, %v5376_v44, -inf  ;;  %v2429_v57 = vsel %vm254_vm1, %v5494_v15, 0.0  ;;  %v2456_v19 = vsel %vm254_vm1, %v5381_v38, -inf  ;;  %v2458_v13 = vsel %vm254_vm1, %v5409_v22, -inf }
 0x11f   :  { %v2418_v32 = vadd.f32 %v2417_v37, %v2416_v14  ;;  %v2460_v41 = vsel %vm254_vm1, %v2928_v46, -inf  ;;  %v3027_v34 = vunpack.i.h.bf16 %v5390_v31  ;;  %v3026_v52 = vunpack.i.l.bf16 %v5390_v31 }
 0x120   :  { %v2431_v18 = vsel %vm254_vm1, %v5506_v50, 0.0  ;;  %v3017_v44 = vunpack.i.h.bf16 %v5419_v16  ;;  %v2455_v53 = vmax.f32 %v2447_v26, %v2454_v17  ;;  %v1076_v38 = vrot.slane %v6493_v23, 1 }
 0x121   :  { %v2420_v63 = vadd.f32 %v2419_v49, %v2418_v32  ;;  %v1077_v33 = vrot.slane %v6494_v24, 1  ;;  %v2457_v29 = vmax.f32 %v2449_v7, %v2456_v19  ;;  %v2459_v4 = vmax.f32 %v5512_v10, %v2458_v13  ;;  %v2938_v10 = vld [vmem:[%s6422_s8 + $0x178] sm:$0xff] }
 0x122   :  { %v2461_v39 = vmax.f32 %v5514_v51, %v2460_v41  ;;  %v6495_v40 = vrot.slane %v4981_v61, 1  ;;  %v408_v16 = vsel %vm254_vm1, %v348_v54, %v3017_v44  ;;  %v406_v60 = vsel %vm251_vm12, %v6496_v58, %v348_v54 }
 0x123   :  { %2312 = vrot.lane.b32.xlu1 %v2306_v6, %s3217_s23  ;;  %v5533_v22 = vpop.permute.xlu2 %567  ;;  %v2422_v46 = vadd.f32 %v2421_v36, %v2420_v63  ;;  %v1078_v9 = vsel %vm6454_vm9, %v1076_v38, %v1077_v33  ;;  %v2462_v37 = vsel %vm254_vm1, %v2929_v55, -inf  ;;  %v2464_v35 = vsel %vm254_vm1, %v2930_v25, -inf  ;;  %1197 = vmatmul.f32.gmra.mxu0 %v406_v60  ;;  %v2937_v55 = vld [vmem:[%s6422_s8 + $0x170] sm:$0xff]  ;;  %s3225_s8 = smov 104  }
 0x124   :  { %v1080_v5 = vsel %vm6454_vm9, %v1077_v33, %v6495_v40  ;;  %v411_v36 = vsel %vm108_vm0, %v3021_v62, %v3026_v52  ;;  %v1098_v26 = vrot.slane %v6493_v23, 7  ;;  %v1099_v7 = vrot.slane %v6494_v24, 7 }
 0x125   :  { %v2424_v6 = vadd.f32 %v2423_v48, %v2422_v46  ;;  %v3083_v27 = vpack.i.bf16 %v1080_v5, %v1078_v9  ;;  %v5546_v14 = vpop.permute.xlu1 %557  ;;  %v410_v48 = vsel %vm257_vm3, %v408_v16, %v3022_v59  ;;  %v2466_v54 = vsel %vm254_vm1, %v5456_v42, -inf }
 0x126   :  { %v400_v49 = vpop.permute.xlu0 %399  ;;  %v413_v62 = vsel %vm262_vm5, %v411_v36, %v5464_v11  ;;  %1250 = vmatmul.f32.gmra.mxu1 %v410_v48  ;;  %v1087_v32 = vrot.slane %v6493_v23, 4  ;;  %v2463_v51 = vmax.f32 %v2455_v53, %v2462_v37  ;;  %v1088_v42 = vrot.slane %v6494_v24, 4 }
 0x127   :  { %v2426_v25 = vadd.f32 %v2425_v56, %v2424_v6  ;;  %3084 = vrot.lane.b32.xlu0 %v3083_v27, %s3220_s25  ;;  %1300 = vmatmul.f32.gmra.mxu2 %v413_v62  ;;  %v1100_v56 = vsel %vm169_vm6, %v1098_v26, %v1099_v7  ;;  %v415_v17 = vsel %vm265_vm8, %v5464_v11, %v400_v49  ;;  %v2468_v41 = vsel %vm254_vm1, %v5461_v20, -inf  ;;  %s3229_s25 = smov 28  }
 0x128   :  { %v2465_v13 = vmax.f32 %v2457_v29, %v2464_v35  ;;  %v2470_v52 = vsel %vm254_vm1, %v5473_v8, -inf  ;;  %1103 = vrot.lane.b32.xlu2 %v1100_v56, %s3223_s27  ;;  %2865 = vmatmul.msk.f32.gmra.mxu3 %vm1132_vm4, %v415_v17  ;;  %v2433_v63 = vsel %vm254_vm1, %v2937_v55, 0.0  ;;  %v2472_v44 = vsel %vm254_vm1, %v5478_v1, -inf }
 0x129   :  { %v2428_v19 = vadd.f32 %v2427_v21, %v2426_v25  ;;  %v5584_v53 = vsel %vm216_vm10, %v1087_v32, %v1088_v42  ;;  %v6497_v11 = vrot.slane %v4981_v61, 4  ;;  %v2435_v38 = vsel %vm254_vm1, %v2938_v10, 0.0 }
 0x12a   :  { %v2480_v33 = vsel %vm254_vm1, %v2938_v10, -inf  ;;  %v2467_v29 = vmax.f32 %v2459_v4, %v2466_v54  ;;  %v2469_v1 = vmax.f32 %v2461_v39, %v2468_v41  ;;  %v2471_v9 = vmax.f32 %v2463_v51, %v2470_v52 }
 0x12b   :  { %v5589_v21 = vsel %vm216_vm10, %v1088_v42, %v6497_v11  ;;  %v5591_v20 = vpop.permute.xlu2 %559  ;;  %v2430_v8 = vadd.f32 %v2429_v57, %v2428_v19  ;;  %v2474_v40 = vsel %vm254_vm1, %v5494_v15, -inf  ;;  %v2473_v16 = vmax.f32 %v2465_v13, %v2472_v44 }
 0x12c   :  { %v3088_v46 = vpack.i.bf16 %v5589_v21, %v5584_v53  ;;  %v2476_v58 = vsel %vm254_vm1, %v5506_v50, -inf  ;;  %v412_v6 = vsel %vm108_vm0, %v3022_v59, %v3027_v34  ;;  %v2478_v4 = vsel %vm254_vm1, %v2937_v55, -inf }
 0x12d   :  { %v2432_v5 = vadd.f32 %v2431_v18, %v2430_v8  ;;  %v5601_v60 = vpop.permute.xlu1 %3029  ;;  %v866_v39 = vrot.slane %v6486_v43, 3  ;;  %v5616_v50 = vsel %vm169_vm6, %v1744_v0, 0.0  ;;  %v2475_v31 = vmax.f32 %v2467_v29, %v2474_v40 }
 0x12e   :  { %v392_v57 = vpop.permute.xlu0 %391  ;;  %v2477_v35 = vmax.f32 %v2469_v1, %v2476_v58  ;;  %v2479_v27 = vmax.f32 %v2471_v9, %v2478_v4  ;;  %v2481_v49 = vmax.f32 %v2473_v16, %v2480_v33  ;;  %v1761_v36 = vrot.slane %v5616_v50, 1 }
 0x12f   :  { %v414_v15 = vsel %vm262_vm5, %v412_v6, %v392_v57  ;;  %v416_v18 = vsel %vm265_vm8, %v392_v57, %v5501_v2  ;;  %v2434_v37 = vadd.f32 %v2433_v63, %v2432_v5  ;;  %v867_v59 = vsel %vm179_vm7, %v6498_v12, %v866_v39 }
 0x130   :  { %1303 = vmatmul.f32.gmra.mxu2 %v414_v15  ;;  %870 = vrot.lane.b32.xlu2 %v867_v59, %s3219_s24  ;;  %v5625_v2 = vsel %vm169_vm6, 0.0, %v1744_v0  ;;  %v3031_v55 = vunpack.i.l.bf16 %v5601_v60  ;;  %v1101_v25 = vrot.slane %v4981_v61, 7  ;;  %v2482_v62 = vmax.f32 %v2475_v31, %v2477_v35 }
 0x131   :  { %v2436_v34 = vadd.f32 %v2435_v38, %v2434_v37  ;;  %2866 = vmatmul.msk.f32.gmra.mxu3 %vm1132_vm4, %v416_v18  ;;  %v2483_v32 = vmax.f32 %v2479_v27, %v2481_v49  ;;  %v1760_v0 = vrot.slane %v5625_v2, 1  ;;  %v1766_v56 = vrot.slane %v5625_v2, 4 }
 0x132   :  { %v1055_v42 = vrot.slane %v6493_v23, 3  ;;  %v868_v61 = vrot.slane %v4450_v28, 3  ;;  %v1767_v19 = vrot.slane %v5616_v50, 4  ;;  %v1102_v13 = vsel %vm169_vm6, %v1099_v7, %v1101_v25 }
 0x133   :  { %v3035_v26 = vpop.permute.xlu2 %3034  ;;  %v2437_v48 = vmul.f32 0.041666668, %v2436_v34  ;;  %v5645_v41 = vsel %vm6454_vm9, %v1760_v0, %v1761_v36  ;;  %v1772_v52 = vrot.slane %v5625_v2, 7  ;;  %v1773_v63 = vrot.slane %v5616_v50, 7 }
 0x134   :  { %v3036_v54 = vunpack.i.l.bf16 %v3035_v26  ;;  %v3037_v44 = vunpack.i.h.bf16 %v3035_v26  ;;  %v583_v11 = vsel %vm265_vm8, %v5546_v14, %v5533_v22  ;;  %v1057_v28 = vrot.slane %v6494_v24, 3 }
 0x135   :  { %2486 = vrot.lane.b32.xlu1 %v2437_v48, %s3216_s17  ;;  %v5631_v10 = vpop.permute.xlu1 %726  ;;  %v5654_v8 = vsel %vm216_vm10, %v1766_v56, %v1767_v19  ;;  %v2484_v38 = vmax.f32 %v2482_v62, %v2483_v32  ;;  %v5659_v7 = vsel %vm169_vm6, %v1772_v52, %v1773_v63  ;;  %v3032_v33 = vunpack.i.h.bf16 %v5601_v60  ;;  %s3226_s17 = smov 52  }
 0x136   :  { %v570_v51 = vpop.permute.xlu0 %569  ;;  %v579_v47 = vsel %vm108_vm0, %v3031_v55, %v3036_v54  ;;  %v869_v1 = vsel %vm179_vm7, %v866_v39, %v868_v61  ;;  %v1058_v22 = vsel %vm179_vm7, %v1055_v42, %v1057_v28  ;;  %v1754_v53 = vrot.slane %v5625_v2, 6  ;;  %v6502_v61 = vld [vmem:[#allocation6_spill] sm:$0xff] }
 0x137   :  { %v581_v17 = vsel %vm262_vm5, %v579_v47, %v5546_v14  ;;  %v580_v14 = vsel %vm108_vm0, %v3032_v33, %v3037_v44  ;;  %v3078_v5 = vpack.i.bf16 %v1058_v22, %v869_v1  ;;  %v584_v60 = vsel %vm265_vm8, %v5591_v20, %v570_v51 }
 0x138   :  { %1306 = vmatmul.f32.gmra.mxu2 %v581_v17  ;;  %1105 = vrot.lane.b32.xlu2 %v1102_v13, %s3223_s27  ;;  %v582_v16 = vsel %vm262_vm5, %v580_v14, %v5591_v20  ;;  %v1749_v21 = vrot.slane %v5625_v2, 3  ;;  %v1056_v26 = vsel %vm179_vm7, %v6498_v12, %v1055_v42  ;;  %v1065_v63 = vrot.slane %v6493_v23, 6 }
 0x139   :  { %2867 = vmatmul.msk.f32.gmra.mxu3 %vm1132_vm4, %v583_v11  ;;  %v1067_v44 = vrot.slane %v6494_v24, 6 }
 0x13a   :  { %v1750_v54 = vsel %vm179_vm7, %v6498_v12, %v1749_v21 }
 0x13b   :  { %v737_v29 = vpop.permute.xlu2 %736 }
 0x13c   :  { %v752_v59 = vsel %vm265_vm8, %v5631_v10, %v737_v29 }
 0x13d   :  { %2490 = vrot.lane.b32.xlu1 %v2484_v38, %s3217_s23  ;;  %v514_v9 = vpop.permute.xlu1 %513  ;;  %s3227_s23 = smov 80  }
 0x13e   :  { %v1857_v40 = vpop.permute.xlu0 %1856  ;;  %2855 = vmatmul.msk.f32.gmra.mxu0 %vm4789_vm13, %v514_v9 }
 0x13f   :  { %v1863_v58 = vsel %vm155_vm2, 0.0, %v1857_v40 }
 0x140   :  { %1309 = vmatmul.f32.gmra.mxu2 %v582_v16  ;;  %3079 = vrot.lane.b32.xlu2 %v3078_v5, %s3219_s24  ;;  %v1864_v6 = vsel %vm1738_vm14, %v1863_v58, 0.0 }
 0x141   :  { %2868 = vmatmul.msk.f32.gmra.mxu3 %vm1132_vm4, %v584_v60 }
 0x143   :  { %v3040_v57 = vpop.permute.xlu2 %3039 }
 0x144   :  { %v3041_v4 = vunpack.i.l.bf16 %v3040_v57  ;;  %v3042_v32 = vunpack.i.h.bf16 %v3040_v57 }
 0x145   :  { %3089 = vrot.lane.b32.xlu1 %v3088_v46, %s3222_s5  ;;  %v5680_v39 = vpop.permute.xlu1 %728 }
 0x146   :  { %v1861_v15 = vpop.permute.xlu0 %1860  ;;  %v575_v18 = vsel %vm254_vm1, %v514_v9, %v3041_v4 }
 0x147   :  { %v1865_v20 = vsel %vm1740_vm15, %v1864_v6, %v1861_v15  ;;  %v577_v37 = vsel %vm257_vm3, %v575_v18, %v3031_v55 }
 0x148   :  { %v1866_v31 = vsel %vm6499_vm11, %v1865_v20, 0.0  ;;  %1253 = vmatmul.f32.gmra.mxu1 %v577_v37  ;;  %vm6500_vm11 = vcmask 1041408  }
 0x149   :  { %v1868_v35 = vrot.slane %v1866_v31, 7  ;;  %2869 = vmatmul.msk.f32.gmra.mxu3 %vm1132_vm4, %v752_v59  ;;  %v1755_v2 = vsel %vm6500_vm11, %v3959_v3, %v1754_v53  ;;  %vm6501_vm9 = vmmov %vm6500_vm11 }
 0x14a   :  { %v1066_v24 = vsel %vm6501_vm9, %v3959_v3, %v1065_v63  ;;  %vm6503_vm11 = vmmov %vm6501_vm9 }
 0x14b   :  { %v5692_v46 = vsel %vm169_vm6, 0.0, %v1868_v35  ;;  %v739_v34 = vpop.permute.xlu2 %738  ;;  %v5695_v27 = vsel %vm169_vm6, %v1868_v35, 0.0 }
 0x14c   :  { %v1878_v49 = vrot.slane %v5692_v46, 6  ;;  %v1873_v36 = vrot.slane %v5692_v46, 3  ;;  %v1890_v47 = vrot.slane %v5692_v46, 4  ;;  %v1891_v0 = vrot.slane %v5695_v27, 4 }
 0x14d   :  { %1059 = vrot.lane.b32.xlu1 %v1056_v26, %s3219_s24  ;;  %v5702_v48 = vpop.permute.xlu1 %3044  ;;  %v753_v17 = vsel %vm265_vm8, %v5680_v39, %v739_v34  ;;  %v1896_v40 = vrot.slane %v5692_v46, 7  ;;  %v1897_v5 = vrot.slane %v5695_v27, 7  ;;  %s3228_s24 = smov 4   ;;  %v1885_v53 = vrot.slane %v5695_v27, 1 }
 0x14e   :  { %v1879_v25 = vsel %vm6501_vm9, %v3959_v3, %v1878_v49  ;;  %v1874_v62 = vsel %vm179_vm7, %v6498_v12, %v1873_v36  ;;  %v3046_v51 = vunpack.i.l.bf16 %v5702_v48  ;;  %v1892_v28 = vsel %vm216_vm10, %v1890_v47, %v1891_v0 }
 0x14f   :  { %v3055_v55 = vpop.permute.xlu0 %3054  ;;  %v3098_v56 = vpack.i.bf16 %v1879_v25, %v1755_v2  ;;  %v3093_v42 = vpack.i.bf16 %v1874_v62, %v1750_v54  ;;  %v1898_v4 = vsel %vm169_vm6, %v1896_v40, %v1897_v5  ;;  %vm6504_vm9 = vcmask 351232  }
 0x150   :  { %v574_v19 = vsel %vm251_vm12, %v6502_v61, %v3046_v51  ;;  %v576_v13 = vsel %vm254_vm1, %v3046_v51, %v3042_v32  ;;  %v3056_v38 = vunpack.i.l.bf16 %v3055_v55  ;;  %v3057_v60 = vunpack.i.h.bf16 %v3055_v55 }
 0x151   :  { %2870 = vmatmul.msk.f32.gmra.mxu3 %vm1132_vm4, %v753_v17  ;;  %3099 = vrot.lane.b32.xlu0 %v3098_v56, %s3225_s8  ;;  %v578_v52 = vsel %vm257_vm3, %v576_v13, %v3032_v33  ;;  %v1068_v33 = vsel %vm6503_vm11, %v1065_v63, %v1067_v44  ;;  %v1884_v34 = vrot.slane %v5692_v46, 1  ;;  %vm6505_vm11 = vcmask 1046528   ;;  %v6507_v63 = vld [vmem:[#allocation7_spill] sm:$0xff] }
 0x152   :  { %3094 = vrot.lane.b32.xlu2 %v3093_v42, %s3226_s17  ;;  %1203 = vmatmul.f32.gmra.mxu0 %v574_v19  ;;  %v3103_v58 = vpack.i.bf16 %v1068_v33, %v1066_v24  ;;  %v3047_v56 = vunpack.i.h.bf16 %v5702_v48 }
 0x153   :  { %v5726_v11 = vpop.permute.xlu2 %3049  ;;  %1256 = vmatmul.f32.gmra.mxu1 %v578_v52  ;;  %v1886_v62 = vsel %vm6505_vm11, %v1884_v34, %v1885_v53 }
 0x154   :  { %v3051_v29 = vunpack.i.l.bf16 %v5726_v11  ;;  %v3052_v16 = vunpack.i.h.bf16 %v5726_v11  ;;  %v743_v44 = vsel %vm251_vm12, %v6507_v63, %v3047_v56 }
 0x155   :  { %v1994_v1 = vpop.permute.xlu1 %1993  ;;  %1893 = vrot.lane.b32.xlu1 %v1892_v28, %s3227_s23 }
 0x156   :  { %v748_v14 = vsel %vm108_vm0, %v3051_v29, %v3056_v38  ;;  %v2000_v57 = vsel %vm155_vm2, 0.0, %v1994_v1  ;;  %v749_v15 = vsel %vm108_vm0, %v3052_v16, %v3057_v60 }
 0x157   :  { %v925_v22 = vpop.permute.xlu0 %924  ;;  %v750_v9 = vsel %vm262_vm5, %v748_v14, %v5631_v10  ;;  %v2001_v18 = vsel %vm1738_vm14, %v2000_v57, 0.0  ;;  %v751_v35 = vsel %vm262_vm5, %v749_v15, %v5680_v39 }
 0x158   :  { %1312 = vmatmul.f32.gmra.mxu2 %v750_v9 }
 0x15a   :  { %3104 = vrot.lane.b32.xlu2 %v3103_v58, %s3221_s26  ;;  %s3230_s26 = smov 56  }
 0x15b   :  { %v5742_v6 = vpop.permute.xlu2 %914 }
 0x15c   :  { %v940_v10 = vsel %vm265_vm8, %v5742_v6, %v925_v22 }
 0x15d   :  { %2871 = vmatmul.msk.f32.gmra.mxu3 %vm1132_vm4, %v940_v10  ;;  %v1998_v20 = vpop.permute.xlu1 %1997  ;;  %1899 = vrot.lane.b32.xlu1 %v1898_v4, %s3228_s24 }
 0x15e   :  { %v2002_v31 = vsel %vm1740_vm15, %v2001_v18, %v1998_v20 }
 0x15f   :  { %v3060_v37 = vpop.permute.xlu0 %3059  ;;  %v2003_v59 = vsel %vm6504_vm9, %v2002_v31, 0.0  ;;  %vm6506_vm9 = vmmov %vm6505_vm11  ;;  %vm6508_vm11 = vcmask 351232  }
 0x160   :  { %1315 = vmatmul.f32.gmra.mxu2 %v751_v35  ;;  %v2005_v21 = vrot.slane %v2003_v59, 7  ;;  %v3061_v49 = vunpack.i.l.bf16 %v3060_v37  ;;  %v3062_v51 = vunpack.i.h.bf16 %v3060_v37 }
 0x162   :  { %v5758_v36 = vsel %vm169_vm6, 0.0, %v2005_v21  ;;  %v5761_v26 = vsel %vm169_vm6, %v2005_v21, 0.0  ;;  %v745_v19 = vsel %vm254_vm1, %v3047_v56, %v3062_v51 }
 0x163   :  { %v683_v55 = vpop.permute.xlu2 %682  ;;  %v2022_v2 = vrot.slane %v5761_v26, 1  ;;  %v2033_v25 = vrot.slane %v5758_v36, 7  ;;  %v2034_v54 = vrot.slane %v5761_v26, 7  ;;  %v2021_v32 = vrot.slane %v5758_v36, 1 }
 0x164   :  { %v744_v39 = vsel %vm254_vm1, %v683_v55, %v3061_v49  ;;  %2857 = vmatmul.msk.f32.gmra.mxu0 %vm4789_vm13, %v683_v55  ;;  %v747_v11 = vsel %vm257_vm3, %v745_v19, %v3052_v16  ;;  %v2015_v33 = vrot.slane %v5758_v36, 6  ;;  %v2010_v14 = vrot.slane %v5758_v36, 3 }
 0x165   :  { %v746_v46 = vsel %vm257_vm3, %v744_v39, %v3051_v29  ;;  %v2132_v47 = vpop.permute.xlu1 %2131  ;;  %v2035_v0 = vsel %vm169_vm6, %v2033_v25, %v2034_v54  ;;  %v2023_v17 = vsel %vm6506_vm9, %v2021_v32, %v2022_v2  ;;  %vm6509_vm9 = vcmask 1041408  }
 0x166   :  { %1259 = vmatmul.f32.gmra.mxu1 %v746_v46  ;;  %2036 = vrot.lane.b32.xlu1 %v2035_v0, %s3228_s24  ;;  %v3108_v61 = vpack.i.bf16 %v2023_v17, %v1886_v62  ;;  %v2138_v13 = vsel %vm155_vm2, 0.0, %v2132_v47  ;;  %v2016_v15 = vsel %vm6509_vm9, %v3959_v3, %v2015_v33  ;;  %v2011_v18 = vsel %vm179_vm7, %v6498_v12, %v2010_v14 }
 0x167   :  { %v927_v42 = vpop.permute.xlu0 %926  ;;  %v2139_v28 = vsel %vm1738_vm14, %v2138_v13, 0.0  ;;  %v2027_v39 = vrot.slane %v5758_v36, 4  ;;  %v2028_v25 = vrot.slane %v5761_v26, 4  ;;  %v1902_v54 = vrot.slane %v5695_v27, 2 }
 0x168   :  { %3109 = vrot.lane.b32.xlu0 %v3108_v61, %s3229_s25  ;;  %v2039_v0 = vrot.slane %v5761_v26, 2  ;;  %v5850_v26 = vstv %s6423_s0 }
 0x169   :  { %v2029_v51 = vsel %vm216_vm10, %v2027_v39, %v2028_v25 }
 0x16b   :  { %v917_v52 = vpop.permute.xlu2 %916 }
 0x16c   :  { %1209 = vmatmul.f32.gmra.mxu0 %v743_v44  ;;  %v941_v48 = vsel %vm265_vm8, %v917_v52, %v927_v42 }
 0x16d   :  { %2872 = vmatmul.msk.f32.gmra.mxu3 %vm1132_vm4, %v941_v48  ;;  %v2136_v38 = vpop.permute.xlu1 %2135 }
 0x16e   :  { %1262 = vmatmul.f32.gmra.mxu1 %v747_v11  ;;  %v2140_v29 = vsel %vm1740_vm15, %v2139_v28, %v2136_v38 }
 0x16f   :  { %v2141_v1 = vsel %vm6508_vm11, %v2140_v29, 0.0  ;;  %v3070_v24 = vpop.permute.xlu0 %3069  ;;  %vm6510_vm11 = vmmov %vm6509_vm9  ;;  %vm6511_vm9 = vcmask 1045504  }
 0x170   :  { %v2143_v22 = vrot.slane %v2141_v1, 7  ;;  %v3071_v16 = vunpack.i.l.bf16 %v3070_v24  ;;  %v3072_v49 = vunpack.i.h.bf16 %v3070_v24  ;;  %v1903_v47 = vsel %vm6511_vm9, %v1902_v54, %v6484_v45 }
 0x172   :  { %v5790_v9 = vsel %vm169_vm6, 0.0, %v2143_v22  ;;  %v5793_v40 = vsel %vm169_vm6, %v2143_v22, 0.0 }
 0x173   :  { %v5795_v5 = vpop.permute.xlu2 %3064  ;;  %v2165_v60 = vrot.slane %v5790_v9, 4  ;;  %v2166_v57 = vrot.slane %v5793_v40, 4  ;;  %v2153_v4 = vrot.slane %v5790_v9, 6  ;;  %v2148_v10 = vrot.slane %v5790_v9, 3 }
 0x174   :  { %v3066_v58 = vunpack.i.l.bf16 %v5795_v5  ;;  %v3067_v53 = vunpack.i.h.bf16 %v5795_v5  ;;  %v2171_v55 = vrot.slane %v5790_v9, 7  ;;  %v2172_v2 = vrot.slane %v5793_v40, 7  ;;  %v1655_v5 = vld [vmem:[%s6424_s2 + $0xf8] sm:$0xff] }
 0x175   :  { %v2167_v37 = vsel %vm216_vm10, %v2165_v60, %v2166_v57  ;;  %v2154_v31 = vsel %vm6510_vm11, %v3959_v3, %v2153_v4  ;;  %v2149_v35 = vsel %vm179_vm7, %v6498_v12, %v2148_v10  ;;  %vm6512_vm11 = vmmov %vm6511_vm9  ;;  %vm6513_vm9 = vcmask 351232   ;;  %2952 = vmatpush.msrb.mxu2 %v1655_v5  ;;  %2600 = vmatpush.msrb.mxu0 %v1655_v5 }
 0x176   :  { %v936_v20 = vsel %vm108_vm0, %v3066_v58, %v3071_v16  ;;  %2168 = vrot.lane.b32.xlu1 %v2167_v37, %s3227_s23  ;;  %v3118_v21 = vpack.i.bf16 %v2154_v31, %v2016_v15  ;;  %v3113_v34 = vpack.i.bf16 %v2149_v35, %v2011_v18  ;;  %v2173_v62 = vsel %vm169_vm6, %v2171_v55, %v2172_v2 }
 0x177   :  { %v938_v59 = vsel %vm262_vm5, %v936_v20, %v5742_v6  ;;  %v937_v6 = vsel %vm108_vm0, %v3067_v53, %v3072_v49  ;;  %v1114_v46 = vpop.permute.xlu0 %1113  ;;  %v2040_v42 = vsel %vm6512_vm11, %v2039_v0, %v6484_v45  ;;  %v2160_v10 = vrot.slane %v5793_v40, 1 }
 0x178   :  { %1318 = vmatmul.f32.gmra.mxu2 %v938_v59  ;;  %3119 = vrot.lane.b32.xlu0 %v3118_v21, %s3225_s8  ;;  %v939_v32 = vsel %vm262_vm5, %v937_v6, %v917_v52  ;;  %v1189_v52 = vpop.f32.mrf.mxu0  ;;  %v2159_v15 = vrot.slane %v5790_v9, 1 }
 0x179   :  { %3114 = vrot.lane.b32.xlu2 %v3113_v34, %s3226_s17  ;;  %v1190_v11 = vadd.f32 %v1189_v52, %v5850_v26 }
 0x17e   :  { %2174 = vrot.lane.b32.xlu1 %v2173_v62, %s3228_s24 }
 0x17f   :  { %v3075_v56 = vpop.permute.xlu0 %3074 }
 0x180   :  { %1321 = vmatmul.f32.gmra.mxu2 %v939_v32  ;;  %2030 = vrot.lane.b32.xlu0 %v2029_v51, %s3227_s23  ;;  %v3076_v17 = vunpack.i.l.bf16 %v3075_v56  ;;  %v1192_v57 = vpop.f32.mrf.mxu0  ;;  %v3077_v34 = vunpack.i.h.bf16 %v3075_v56 }
 0x181   :  { %1904 = vrot.lane.b32.xlu2 %v1903_v47, %s3230_s26  ;;  %v1193_v35 = vadd.f32 %v1192_v57, %v5850_v26 }
 0x182   :  { %v5834_v36 = vpop.permute.xlu2 %1103 }
 0x183   :  { %v1129_v27 = vsel %vm265_vm8, %v5834_v36, %v1114_v46 }
 0x184   :  { %2873 = vmatmul.msk.f32.gmra.mxu3 %vm1132_vm4, %v1129_v27  ;;  %v1639_v27 = vld [vmem:[%s6424_s2 + $0x78] sm:$0xff] }
 0x185   :  { %2565 = vmatpush.msrb.mxu3 %v1639_v27 }
 0x187   :  { %v1116_v1 = vpop.permute.xlu0 %1115 }
 0x188   :  { %2041 = vrot.lane.b32.xlu0 %v2040_v42, %s3230_s26  ;;  %v1242_v44 = vpop.f32.mrf.mxu1 }
 0x189   :  { %v1243_v22 = vadd.f32 %v1242_v44, %v1190_v11 }
 0x18a   :  { %v871_v61 = vpop.permute.xlu2 %870 }
 0x18b   :  { %v932_v13 = vsel %vm254_vm1, %v871_v61, %v3076_v17  ;;  %2859 = vmatmul.msk.f32.gmra.mxu0 %vm4789_vm13, %v871_v61  ;;  %v1638_v17 = vld [vmem:[%s6424_s2 + $0x70] sm:$0xff]  ;;  %v1195_v61 = vpop.f32.mrf.mxu0 }
 0x18c   :  { %v934_v63 = vsel %vm257_vm3, %v932_v13, %v3066_v58  ;;  %2566 = vmatpush.msrb.mxu3 %v1638_v17  ;;  %v1196_v52 = vadd.f32 %v1195_v61, %v5850_v26 }
 0x18d   :  { %v2309_v19 = vpop.permute.xlu1 %2308  ;;  %1265 = vmatmul.f32.gmra.mxu1 %v934_v63 }
 0x18e   :  { %v2315_v48 = vsel %vm155_vm2, 0.0, %v2309_v19 }
 0x18f   :  { %v2316_v38 = vsel %vm1738_vm14, %v2315_v48, 0.0 }
 0x190   :  { %v1245_v31 = vpop.f32.mrf.mxu1 }
 0x191   :  { %v1246_v6 = vadd.f32 %v1245_v31, %v1193_v35 }
 0x192   :  { %v5854_v28 = vpop.permute.xlu2 %1105 }
 0x193   :  { %v1130_v33 = vsel %vm265_vm8, %v5854_v28, %v1116_v1  ;;  %v1348_v60 = vpop.f32.mrf.mxu3 }
 0x194   :  { %v1295_v14 = vpop.f32.mrf.mxu2  ;;  %2874 = vmatmul.msk.f32.gmra.mxu3 %vm1132_vm4, %v1130_v33  ;;  %vm6514_vm4 = vcmask 1046528  }
 0x195   :  { %v2313_v29 = vpop.permute.xlu1 %2312  ;;  %v1296_v58 = vadd.f32 %v1295_v14, %v1243_v22  ;;  %v2161_v9 = vsel %vm6514_vm4, %v2159_v15, %v2160_v10  ;;  %vm6515_vm8 = vmmov %vm6514_vm4  ;;  %v1654_v14 = vld [vmem:[%s6424_s2 + $0xf0] sm:$0xff] }
 0x196   :  { %v2317_v24 = vsel %vm1740_vm15, %v2316_v38, %v2313_v29  ;;  %2953 = vmatpush.msrb.mxu2 %v1654_v14  ;;  %2601 = vmatpush.msrb.mxu0 %v1654_v14 }
 0x197   :  { %v2318_v16 = vsel %vm6513_vm9, %v2317_v24, 0.0  ;;  %v1349_v18 = vadd.f32 %v1348_v60, %v1296_v58  ;;  %v5913_v58 = vld [vmem:[%s6424_s2 + $0x168] sm:$0xf]  ;;  %v1635_v60 = vld [vmem:[%s6424_s2 + $0x58] sm:$0xff] }
 0x198   :  { %v2320_v4 = vrot.slane %v2318_v16, 7  ;;  %v1248_v13 = vpop.f32.mrf.mxu1  ;;  %v1636_v16 = vld [vmem:[%s6424_s2 + $0x60] sm:$0xff]  ;;  %2968 = vmatpush.msk.msrb.mxu1 %vm216_vm10, %v5913_v58 }
 0x199   :  { %v2875_v49 = vmul.f32 -1.442695, %v1349_v18  ;;  %v1249_v44 = vadd.f32 %v1248_v13, %v1196_v52  ;;  %v5901_v22 = vpop.permute.xlu0 %3084 }
 0x19a   :  { %v5865_v20 = vsel %vm169_vm6, 0.0, %v2320_v4  ;;  %v5868_v37 = vsel %vm169_vm6, %v2320_v4, 0.0  ;;  %v5873_v55 = vpop.permute.xlu2 %3079  ;;  %v3087_v35 = vunpack.i.h.bf16 %v5901_v22 }
 0x19b   :  { %v2337_v59 = vrot.slane %v5868_v37, 1  ;;  %v2336_v21 = vrot.slane %v5865_v20, 1  ;;  %v3081_v39 = vunpack.i.l.bf16 %v5873_v55  ;;  %3143 = vpow2.f32 %v2875_v49  ;;  %v1351_v47 = vpop.f32.mrf.mxu3 }
 0x19c   :  { %v1298_v54 = vpop.f32.mrf.mxu2 }
 0x19d   :  { %v2338_v2 = vsel %vm6515_vm8, %v2336_v21, %v2337_v59  ;;  %v931_v46 = vsel %vm251_vm12, %v6486_v43, %v3081_v39  ;;  %v933_v62 = vsel %vm254_vm1, %v3081_v39, %v3077_v34  ;;  %v1299_v32 = vadd.f32 %v1298_v54, %v1246_v6 }
 0x19e   :  { %v3123_v25 = vpack.i.bf16 %v2338_v2, %v2161_v9  ;;  %1215 = vmatmul.f32.gmra.mxu0 %v931_v46  ;;  %v935_v51 = vsel %vm257_vm3, %v933_v62, %v3067_v53  ;;  %v1637_v53 = vld [vmem:[%s6424_s2 + $0x68] sm:$0xff]  ;;  %v3086_v59 = vunpack.i.l.bf16 %v5901_v22  ;;  %v2330_v39 = vrot.slane %v5865_v20, 6  ;;  %v6134_v22 = vld [vmem:[%s6424_s2 + $0x138] sm:$0xff] }
 0x19f   :  { %1268 = vmatmul.f32.gmra.mxu1 %v935_v51  ;;  %v1352_v0 = vadd.f32 %v1351_v47, %v1299_v32  ;;  %2567 = vmatpush.msrb.mxu3 %v1637_v53  ;;  %v2354_v54 = vrot.slane %v5868_v37, 2  ;;  %vm6519_vm8 = vcmask 1041408  }
 0x1a0   :  { %3124 = vrot.lane.b32.xlu2 %v3123_v25, %s3229_s25  ;;  %v2325_v25 = vrot.slane %v5865_v20, 3  ;;  %v1198_v51 = vpop.f32.mrf.mxu0 }
 0x1a1   :  { %v2876_v56 = vmul.f32 -1.442695, %v1352_v0  ;;  %v3144_v43 = vpop.eup %3143  ;;  %2568 = vmatpush.msrb.mxu3 %v1636_v16 }
 0x1a2   :  { %v1420_v42 = vadd.f32 1.0, %v3144_v43  ;;  %v1653_v43 = vld [vmem:[%s6424_s2 + $0xe8] sm:$0xff] }
 0x1a3   :  { %3145 = vpow2.f32 %v2876_v56  ;;  %2569 = vmatpush.msrb.mxu3 %v1635_v60  ;;  %2954 = vmatpush.msrb.mxu2 %v1653_v43 }
 0x1a4   :  { %3147 = vrcp.f32 %v1420_v42  ;;  %v1441_v15 = vand.u32 2147483647, %v1420_v42  ;;  %v1443_v21 = vand.u32 2147483648, %v1420_v42  ;;  %2602 = vmatpush.msrb.mxu0 %v1653_v43 }
 0x1a6   :  { %vm5932_vm11 = vcmp.eq.f32.partialorder %v1441_v15, 8.507059e+37  ;;  %v1444_v0 = vor.u32 1.1754944e-38, %v1443_v21 }
 0x1a7   :  { %v2487_v19 = vpop.permute.xlu1 %2486 }
 0x1a8   :  { %v2493_v29 = vsel %vm155_vm2, 0.0, %v2487_v19  ;;  %vm6516_vm2 = vmmov %vm6513_vm9 }
 0x1a9   :  { %v3146_v63 = vpop.eup %3145  ;;  %v2494_v57 = vsel %vm1738_vm14, %v2493_v29, 0.0 }
 0x1aa   :  { %v5898_v48 = vadd.f32 1.0, %v3146_v63  ;;  %v1301_v11 = vpop.f32.mrf.mxu2  ;;  %v3148_v38 = vpop.eup %3147  ;;  %v1199_v63 = vadd.f32 %v1198_v51, %v5850_v26  ;;  %v6003_v51 = vld [vmem:[%s6424_s2 + $0x160] sm:$0xff] }
 0x1ab   :  { %v1354_v1 = vpop.f32.mrf.mxu3  ;;  %v1433_v24 = vmul.f32 %v3148_v38, %v1420_v42  ;;  %v1302_v33 = vadd.f32 %v1301_v11, %v1249_v44  ;;  %vm1438_vm14 = vweird.f32 %v3148_v38  ;;  %2969 = vmatpush.msrb.mxu1 %v6003_v51 }
 0x1ac   :  { %3149 = vrcp.f32 %v5898_v48  ;;  %v5924_v34 = vpop.permute.xlu2 %3094  ;;  %v1458_v60 = vand.u32 2147483648, %v5898_v48 }
 0x1ad   :  { %v1434_v10 = vsub.f32 1.0, %v1433_v24  ;;  %v1355_v18 = vadd.f32 %v1354_v1, %v1302_v33  ;;  %v2326_v1 = vsel %vm179_vm7, %v6498_v12, %v2325_v25  ;;  %v1251_v24 = vpop.f32.mrf.mxu1  ;;  %v2343_v25 = vrot.slane %v5868_v37, 4 }
 0x1af   :  { %v2491_v4 = vpop.permute.xlu1 %2490  ;;  %v1435_v9 = vmul.f32 %v3148_v38, %v1434_v10  ;;  %v2877_v2 = vmul.f32 -1.442695, %v1355_v18  ;;  %v1252_v18 = vadd.f32 %v1251_v24, %v1199_v63  ;;  %v6058_v24 = vld [vmem:[%s6424_s2 + $0x150] sm:$0xff] }
 0x1b0   :  { %v2495_v31 = vsel %vm1740_vm15, %v2494_v57, %v2491_v4  ;;  %vm1437_vm15 = vweird.f32 %v1420_v42  ;;  %v1634_v42 = vld [vmem:[%s6424_s2 + $0x50] sm:$0xff] }
 0x1b1   :  { %v2496_v49 = vsel %vm6516_vm2, %v2495_v31, 0.0  ;;  %v1436_v62 = vadd.f32 %v3148_v38, %v1435_v9  ;;  %3151 = vpow2.f32 %v2877_v2  ;;  %vm1439_vm9 = vmor %vm1437_vm15, %vm1438_vm14  ;;  %2570 = vmatpush.msrb.mxu3 %v1634_v42  ;;  %v1652_v42 = vld [vmem:[%s6424_s2 + $0xe0] sm:$0xff] }
 0x1b2   :  { %v2498_v6 = vrot.slane %v2496_v49, 7  ;;  %v5930_v46 = vpop.eup %3149  ;;  %vm6520_vm2 = vmmov %vm6519_vm8  ;;  %2955 = vmatpush.msrb.mxu2 %v1652_v42  ;;  %2603 = vmatpush.msrb.mxu0 %v1652_v42 }
 0x1b3   :  { %v1448_v56 = vmul.f32 %v5930_v46, %v5898_v48  ;;  %v1440_v5 = vsel %vm1439_vm9, %v3148_v38, %v1436_v62  ;;  %v2331_v38 = vsel %vm6519_vm8, %v3959_v3, %v2330_v39  ;;  %vm1453_vm14 = vweird.f32 %v5930_v46 }
 0x1b4   :  { %v5937_v47 = vsel %vm169_vm6, 0.0, %v2498_v6  ;;  %v5940_v27 = vsel %vm169_vm6, %v2498_v6, 0.0  ;;  %v1445_v19 = vsel %vm5932_vm11, %v1444_v0, %v1440_v5  ;;  %v5983_v21 = vpop.permute.xlu2 %3104  ;;  %v1459_v6 = vor.u32 1.1754944e-38, %v1458_v60  ;;  %v1632_v0 = vld [vmem:[%s6424_s2 + $0x40] sm:$0xff]  ;;  %v1357_v43 = vpop.f32.mrf.mxu3 }
 0x1b5   :  { %v2515_v17 = vrot.slane %v5940_v27, 1  ;;  %v2514_v53 = vrot.slane %v5937_v47, 1  ;;  %v2508_v61 = vrot.slane %v5937_v47, 6  ;;  %v2503_v13 = vrot.slane %v5937_v47, 3  ;;  %1612 = vst.msk [vmem:[%s6425_s9] sm:$0xff] %vm108_vm0, %v1445_v19 }
 0x1b6   :  { %v1449_v52 = vsub.f32 1.0, %v1448_v56  ;;  %v2342_v39 = vrot.slane %v5865_v20, 4  ;;  %vm6521_vm9 = vcmask 1045504   ;;  %v2349_v60 = vrot.slane %v5868_v37, 7 }
 0x1b7   :  { %v3090_v44 = vpop.permute.xlu1 %3089  ;;  %v2516_v11 = vsel %vm6514_vm4, %v2514_v53, %v2515_v17  ;;  %v2509_v29 = vsel %vm6520_vm2, %v3959_v3, %v2508_v61  ;;  %v3152_v57 = vpop.eup %3151  ;;  %v2504_v4 = vsel %vm179_vm7, %v6498_v12, %v2503_v13  ;;  %v1456_v3 = vand.u32 2147483647, %v5898_v48  ;;  %v1651_v61 = vld [vmem:[%s6424_s2 + $0xd8] sm:$0xff] }
 0x1b8   :  { %v3091_v33 = vunpack.i.l.bf16 %v3090_v44  ;;  %v3138_v14 = vpack.i.bf16 %v2516_v11, %v5645_v41  ;;  %v3133_v16 = vpack.i.bf16 %v2509_v29, %v2331_v38  ;;  %v1450_v10 = vmul.f32 %v5930_v46, %v1449_v52  ;;  %v1304_v12 = vpop.f32.mrf.mxu2  ;;  %v1631_v13 = vld [vmem:[%s6424_s2 + $0x38] sm:$0xff]  ;;  %2956 = vmatpush.msrb.mxu2 %v1651_v61  ;;  %2604 = vmatpush.msrb.mxu0 %v1651_v61 }
 0x1b9   :  { %v3128_v15 = vpack.i.bf16 %v2504_v4, %v2326_v1  ;;  %v5981_v31 = vadd.f32 1.0, %v3152_v57  ;;  %v3092_v49 = vunpack.i.h.bf16 %v3090_v44  ;;  %vm1452_vm7 = vweird.f32 %v5898_v48  ;;  %v1633_v48 = vld [vmem:[%s6424_s2 + $0x48] sm:$0xff] }
 0x1ba   :  { %3139 = vrot.lane.b32.xlu1 %v3138_v14, %s3229_s25  ;;  %3134 = vrot.lane.b32.xlu0 %v3133_v16, %s3225_s8  ;;  %v1125_v41 = vsel %vm108_vm0, %v3086_v59, %v3091_v33  ;;  %v1451_v2 = vadd.f32 %v5930_v46, %v1450_v10  ;;  %vm1454_vm15 = vmor %vm1452_vm7, %vm1453_vm14  ;;  %vm1457_vm11 = vcmp.eq.f32.partialorder %v1456_v3, 8.507059e+37  ;;  %v1305_v32 = vadd.f32 %v1304_v12, %v1252_v18  ;;  %v1629_v57 = vld [vmem:[%s6424_s2 + $0x28] sm:$0xff]  ;;  %v1628_v12 = vld [vmem:[%s6424_s2 + $0x20] sm:$0xff] }
 0x1bb   :  { %v1127_v9 = vsel %vm262_vm5, %v1125_v41, %v5834_v36  ;;  %3129 = vrot.lane.b32.xlu2 %v3128_v15, %s3226_s17  ;;  %3153 = vrcp.f32 %v5981_v31  ;;  %v3106_v36 = vunpack.i.l.bf16 %v5983_v21  ;;  %2571 = vmatpush.msrb.mxu3 %v1633_v48  ;;  %v1126_v5 = vsel %vm108_vm0, %v3087_v35, %v3092_v49  ;;  %v1201_v52 = vpop.f32.mrf.mxu0  ;;  %vm6523_vm14 = vmmov %vm6521_vm9 }
 0x1bc   :  { %1324 = vmatmul.f32.gmra.mxu2 %v1127_v9  ;;  %v1455_v62 = vsel %vm1454_vm15, %v5930_v46, %v1451_v2  ;;  %v2177_v46 = vrot.slane %v5793_v40, 2  ;;  %v1358_v53 = vadd.f32 %v1357_v43, %v1305_v32  ;;  %v6023_v40 = vld [vmem:[%s6424_s2 + $0x158] sm:$0xff]  ;;  %v2355_v63 = vsel %vm6521_vm9, %v2354_v54, %v6484_v45  ;;  %v1649_v2 = vld [vmem:[%s6424_s2 + $0xc8] sm:$0xff] }
 0x1bd   :  { %v1460_v56 = vsel %vm1457_vm11, %v1459_v6, %v1455_v62  ;;  %2572 = vmatpush.msrb.mxu3 %v1632_v0  ;;  %v2344_v44 = vsel %vm216_vm10, %v2342_v39, %v2343_v25  ;;  %2970 = vmatpush.msrb.mxu1 %v6023_v40  ;;  %v3082_v29 = vunpack.i.h.bf16 %v5873_v55  ;;  %v1128_v1 = vsel %vm262_vm5, %v1126_v5, %v5854_v28  ;;  %v6067_v28 = vld [vmem:[%s6424_s2 + $0xd0] sm:$0xff]  ;;  %v6095_v6 = vld [vmem:[%s6424_s2 + $0x148] sm:$0xff]  ;;  %v1360_v25 = vpop.f32.mrf.mxu3  ;;  %v1627_v62 = vld [vmem:[%s6424_s2 + $0x18] sm:$0xff] }
 0x1be   :  { %1613 = vst.msk [vmem:[%s6425_s9 + $0x8] sm:$0xff] %vm108_vm0, %v1460_v56  ;;  %v2878_v11 = vmul.f32 -1.442695, %v1358_v53  ;;  %v3107_v33 = vunpack.i.h.bf16 %v5983_v21  ;;  %v1202_v14 = vadd.f32 %v1201_v52, %v5850_v26  ;;  %v2348_v16 = vrot.slane %v5865_v20, 7  ;;  %2957 = vmatpush.msrb.mxu2 %v6067_v28  ;;  %v1626_v5 = vld [vmem:[%s6424_s2 + $0x10] sm:$0xff]  ;;  %2605 = vmatpush.msrb.mxu0 %v6067_v28  ;;  %vm6526_vm11 = vmmov %vm6521_vm9 }
 0x1bf   :  { %v1060_v17 = vpop.permute.xlu1 %1059  ;;  %2573 = vmatpush.msrb.mxu3 %v1631_v13  ;;  %v2526_v10 = vrot.slane %v5937_v47, 7  ;;  %v2527_v3 = vrot.slane %v5940_v27, 7  ;;  %2971 = vmatpush.msrb.mxu1 %v6058_v24  ;;  %v1120_v18 = vsel %vm251_vm12, %v6493_v23, %v3082_v29  ;;  %v1471_v20 = vand.u32 2147483647, %v5981_v31  ;;  %v1625_v13 = vld [vmem:[%s6424_s2 + $0x8] sm:$0xff] }
 0x1c0   :  { %2861 = vmatmul.msk.f32.gmra.mxu0 %vm4789_vm13, %v1060_v17  ;;  %v1121_v19 = vsel %vm254_vm1, %v1060_v17, %v3106_v36  ;;  %vm6522_vm13 = vmmov %vm6521_vm9  ;;  %3155 = vpow2.f32 %v2878_v11  ;;  %v1473_v37 = vand.u32 2147483648, %v5981_v31  ;;  %v1307_v21 = vpop.f32.mrf.mxu2  ;;  %v1122_v9 = vsel %vm254_vm1, %v3082_v29, %v3107_v33  ;;  %2958 = vmatpush.msrb.mxu2 %v1649_v2 }
 0x1c1   :  { %v1123_v30 = vsel %vm257_vm3, %v1121_v19, %v3086_v59  ;;  %v6043_v38 = vpop.eup %3153  ;;  %v2178_v54 = vsel %vm6522_vm13, %v2177_v46, %v6484_v45  ;;  %v1630_v59 = vld [vmem:[%s6424_s2 + $0x30] sm:$0xff]  ;;  %v2350_v39 = vsel %vm169_vm6, %v2348_v16, %v2349_v60  ;;  %vm1783_vm12 = vcmask 424960   ;;  %2972 = vmatpush.msrb.mxu1 %v6095_v6  ;;  %v6110_v46 = vld [vmem:[%s6424_s2 + $0x140] sm:$0xff]  ;;  %2606 = vmatpush.msrb.mxu0 %v1649_v2  ;;  %v1645_v2 = vld [vmem:[%s6424_s2 + $0xa8] sm:$0xff] }
 0x1c2   :  { %2356 = vrot.lane.b32.xlu1 %v2355_v63, %s3230_s26  ;;  %2345 = vrot.lane.b32.xlu0 %v2344_v44, %s3227_s23  ;;  %v1463_v55 = vmul.f32 %v6043_v38, %v5981_v31  ;;  %vm1468_vm5 = vweird.f32 %v6043_v38  ;;  %v2528_v48 = vsel %vm169_vm6, %v2526_v10, %v2527_v3  ;;  %vm1467_vm4 = vweird.f32 %v5981_v31  ;;  %v1624_v63 = vld [vmem:[%s6424_s2] sm:$0xff]  ;;  %v6173_v3 = vld [vmem:[%s6424_s2 + $0x130] sm:$0xff] }
 0x1c3   :  { %1271 = vmatmul.f32.gmra.mxu1 %v1123_v30  ;;  %2179 = vrot.lane.b32.xlu2 %v2178_v54, %s3230_s26  ;;  %v6101_v36 = vpop.permute.xlu0 %3099  ;;  %v3096_v43 = vunpack.i.l.bf16 %v5924_v34  ;;  %vm1469_vm6 = vmor %vm1467_vm4, %vm1468_vm5  ;;  %v1474_v31 = vor.u32 1.1754944e-38, %v1473_v37  ;;  %v1124_v17 = vsel %vm257_vm3, %v1122_v9, %v3087_v35  ;;  %vm1472_vm8 = vcmp.eq.f32.partialorder %v1471_v20, 8.507059e+37  ;;  %v1646_v37 = vld [vmem:[%s6424_s2 + $0xb0] sm:$0xff] }
 0x1c4   :  { %1327 = vmatmul.f32.gmra.mxu2 %v1128_v1  ;;  %v1464_v15 = vsub.f32 1.0, %v1463_v55  ;;  %2574 = vmatpush.msrb.mxu3 %v1630_v59  ;;  %v3101_v61 = vunpack.i.l.bf16 %v6101_v36  ;;  %vm1785_vm3 = vcmask 850944   ;;  %v2520_v44 = vrot.slane %v5937_v47, 4 }
 0x1c5   :  { %v1254_v4 = vpop.f32.mrf.mxu1  ;;  %2973 = vmatpush.msrb.mxu1 %v6110_v46  ;;  %v1784_v52 = vsel %vm1783_vm12, 0.0, %v3096_v43  ;;  %v2521_v11 = vrot.slane %v5940_v27, 4  ;;  %v3097_v16 = vunpack.i.h.bf16 %v5924_v34  ;;  %v2532_v60 = vrot.slane %v5940_v27, 2  ;;  %v6181_v34 = vld [vmem:[%s6424_s2 + $0x128] sm:$0xff]  ;;  %v1363_v20 = vpop.f32.mrf.mxu3  ;;  %v1644_v43 = vld [vmem:[%s6424_s2 + $0xa0] sm:$0xff] }
 0x1c6   :  { %v1255_v41 = vadd.f32 %v1254_v4, %v1202_v14  ;;  %v1465_v49 = vmul.f32 %v6043_v38, %v1464_v15  ;;  %2575 = vmatpush.msrb.mxu3 %v1629_v57  ;;  %v3156_v32 = vpop.eup %3155  ;;  %v1786_v30 = vsel %vm1785_vm3, %v1784_v52, %v3101_v61  ;;  %v3102_v10 = vunpack.i.h.bf16 %v6101_v36  ;;  %v1647_v15 = vld [vmem:[%s6424_s2 + $0xb8] sm:$0xff]  ;;  %v6251_v52 = vld [vmem:[%s6424_s2 + $0x108] sm:$0xff] }
 0x1c7   :  { %v6118_v42 = vadd.f32 1.0, %v3156_v32  ;;  %2974 = vmatpush.msrb.mxu1 %v6134_v22  ;;  %v2522_v55 = vsel %vm216_vm10, %v2520_v44, %v2521_v11  ;;  %v6162_v28 = vpop.permute.xlu1 %1893  ;;  %v2533_v9 = vsel %vm6523_vm14, %v2532_v60, %v6484_v45  ;;  %vm1791_vm13 = vcmask 31744   ;;  %v1642_v44 = vld [vmem:[%s6424_s2 + $0x90] sm:$0xff] }
 0x1c8   :  { %v1308_v23 = vadd.f32 %v1307_v21, %v1255_v41  ;;  %1221 = vmatmul.f32.gmra.mxu0 %v1120_v18  ;;  %v1466_v0 = vadd.f32 %v6043_v38, %v1465_v49  ;;  %2576 = vmatpush.msrb.mxu3 %v1628_v12  ;;  %v1310_v14 = vpop.f32.mrf.mxu2  ;;  %v1778_v18 = vrot.slane %v5616_v50, 2  ;;  %v1907_v50 = vsel %vm1783_vm12, 0.0, %v3097_v16 }
 0x1c9   :  { %3157 = vrcp.f32 %v6118_v42  ;;  %v1488_v41 = vand.u32 2147483648, %v6118_v42  ;;  %2975 = vmatpush.msrb.mxu1 %v6173_v3  ;;  %v1486_v12 = vand.u32 2147483647, %v6118_v42  ;;  %vm1482_vm7 = vweird.f32 %v6118_v42 }
 0x1ca   :  { %v1361_v56 = vadd.f32 %v1360_v25, %v1308_v23  ;;  %2529 = vrot.lane.b32.xlu1 %v2528_v48, %s3228_s24  ;;  %1769 = vrot.lane.b32.xlu0 %v5654_v8, %s3227_s23  ;;  %v1648_v8 = vld [vmem:[%s6424_s2 + $0xc0] sm:$0xff]  ;;  %v1470_v53 = vsel %vm1469_vm6, %v6043_v38, %v1466_v0  ;;  %v1908_v25 = vsel %vm1785_vm3, %v1907_v50, %v3102_v10  ;;  %vm1787_vm5 = vcmask 228352  }
 0x1cb   :  { %1274 = vmatmul.f32.gmra.mxu1 %v1124_v17  ;;  %2577 = vmatpush.msrb.mxu3 %v1627_v62  ;;  %v1475_v35 = vsel %vm1472_vm8, %v1474_v31, %v1470_v53  ;;  %v6200_v23 = vld [vmem:[%s6424_s2 + $0x120] sm:$0xff]  ;;  %v1489_v48 = vor.u32 1.1754944e-38, %v1488_v41  ;;  %v1779_v0 = vsel %vm6526_vm11, %v1778_v18, %v6484_v45  ;;  %vm1487_vm9 = vcmp.eq.f32.partialorder %v1486_v12, 8.507059e+37 }
 0x1cc   :  { %v2879_v19 = vmul.f32 -1.442695, %v1361_v56  ;;  %2351 = vrot.lane.b32.xlu2 %v2350_v39, %s3228_s24  ;;  %1614 = vst.msk [vmem:[%s6425_s9 + $0x10] sm:$0xff] %vm108_vm0, %v1475_v35  ;;  %2959 = vmatpush.msrb.mxu2 %v1648_v8  ;;  %v6220_v56 = vld [vmem:[%s6424_s2 + $0x118] sm:$0xff]  ;;  %vm1793_vm4 = vcmask 457728   ;;  %vm2543_vm6 = vcmask 883712  }
 0x1cd   :  { %2578 = vmatpush.msrb.mxu3 %v1626_v5  ;;  %2607 = vmatpush.msrb.mxu0 %v1648_v8  ;;  %v6234_v5 = vld [vmem:[%s6424_s2 + $0x110] sm:$0xff]  ;;  %v1643_v8 = vld [vmem:[%s6424_s2 + $0x98] sm:$0xff]  ;;  %vm1789_vm8 = vcmask 654336  }
 0x1ce   :  { %3159 = vpow2.f32 %v2879_v19  ;;  %2960 = vmatpush.msrb.mxu2 %v1647_v15  ;;  %2976 = vmatpush.msrb.mxu1 %v6181_v34 }
 0x1cf   :  { %2579 = vmatpush.msrb.mxu3 %v1625_v13  ;;  %v1204_v38 = vpop.f32.mrf.mxu0  ;;  %v3158_v1 = vpop.eup %3157  ;;  %2608 = vmatpush.msrb.mxu0 %v1647_v15 }
 0x1d0   :  { %v1205_v29 = vadd.f32 %v1204_v38, %v5850_v26  ;;  %v1257_v54 = vpop.f32.mrf.mxu1  ;;  %v1478_v33 = vmul.f32 %v3158_v1, %v6118_v42  ;;  %vm1483_vm2 = vweird.f32 %v3158_v1  ;;  %2961 = vmatpush.msrb.mxu2 %v1646_v37  ;;  %2977 = vmatpush.msrb.mxu1 %v6200_v23  ;;  %v1900_v35 = vpop.permute.xlu1 %1899 }
 0x1d1   :  { %2580 = vmatpush.msrb.mxu3 %v1624_v63  ;;  %2609 = vmatpush.msrb.mxu0 %v1646_v37  ;;  %vm6210_vm15 = vmor %vm1482_vm7, %vm1483_vm2  ;;  %v1911_v13 = vsel %vm1791_vm13, %v6162_v28, %v1900_v35 }
 0x1d2   :  { %1775 = vrot.lane.b32.xlu0 %v5659_v7, %s3228_s24  ;;  %2581 = vmatmul.f32.vlgmr.msrb.gmra.mxu3 %v1786_v30  ;;  %v1258_v59 = vadd.f32 %v1257_v54, %v1205_v29  ;;  %v1479_v4 = vsub.f32 1.0, %v1478_v33  ;;  %v6262_v29 = vld [vmem:[%s6424_s2 + $0x100] sm:$0xff]  ;;  %v1641_v54 = vld [vmem:[%s6424_s2 + $0x88] sm:$0xff] }
 0x1d3   :  { %v6183_v27 = vpop.permute.xlu2 %3114  ;;  %2962 = vmatpush.msrb.mxu2 %v1645_v2  ;;  %2610 = vmatpush.msrb.mxu0 %v1645_v2 }
 0x1d4   :  { %v3160_v47 = vpop.eup %3159  ;;  %2523 = vrot.lane.b32.xlu2 %v2522_v55, %s3227_s23  ;;  %v1311_v7 = vadd.f32 %v1310_v14, %v1258_v59  ;;  %v1480_v21 = vmul.f32 %v3158_v1, %v1479_v4  ;;  %2978 = vmatpush.msrb.mxu1 %v6220_v56 }
 0x1d5   :  { %v6167_v57 = vadd.f32 1.0, %v3160_v47  ;;  %2963 = vmatpush.msrb.mxu2 %v1644_v43  ;;  %2611 = vmatpush.msrb.mxu0 %v1644_v43 }
 0x1d6   :  { %v1364_v49 = vadd.f32 %v1363_v20, %v1311_v7  ;;  %v1481_v39 = vadd.f32 %v3158_v1, %v1480_v21  ;;  %2979 = vmatpush.msrb.mxu1 %v6234_v5  ;;  %v1640_v7 = vld [vmem:[%s6424_s2 + $0x80] sm:$0xff]  ;;  %v1366_v20 = vpop.f32.mrf.mxu3 }
 0x1d7   :  { %3161 = vrcp.f32 %v6167_v57  ;;  %v1501_v30 = vand.u32 2147483647, %v6167_v57  ;;  %2964 = vmatpush.msrb.mxu2 %v1643_v8  ;;  %v1503_v38 = vand.u32 2147483648, %v6167_v57  ;;  %2612 = vmatpush.msrb.mxu0 %v1643_v8  ;;  %vm1497_vm14 = vweird.f32 %v6167_v57 }
 0x1d8   :  { %v2880_v62 = vmul.f32 -1.442695, %v1364_v49  ;;  %v1485_v31 = vsel %vm6210_vm15, %v3158_v1, %v1481_v39  ;;  %2980 = vmatpush.msrb.mxu1 %v6251_v52  ;;  %v3116_v49 = vunpack.i.l.bf16 %v6183_v27 }
 0x1d9   :  { %v1490_v17 = vsel %vm1487_vm9, %v1489_v48, %v1485_v31  ;;  %2965 = vmatpush.msrb.mxu2 %v1642_v44  ;;  %2613 = vmatpush.msrb.mxu0 %v1642_v44  ;;  %v1504_v18 = vor.u32 1.1754944e-38, %v1503_v38  ;;  %vm1502_vm15 = vcmp.eq.f32.partialorder %v1501_v30, 8.507059e+37 }
 0x1da   :  { %2534 = vrot.lane.b32.xlu0 %v2533_v9, %s3230_s26  ;;  %2584 = vmatmul.f32.gmra.mxu3 %v1908_v25  ;;  %3163 = vpow2.f32 %v2880_v62  ;;  %v6228_v45 = vpop.permute.xlu0 %3109  ;;  %1615 = vst.msk [vmem:[%s6425_s9 + $0x18] sm:$0xff] %vm108_vm0, %v1490_v17  ;;  %v2044_v31 = vsel %vm1783_vm12, 0.0, %v3116_v49 }
 0x1db   :  { %v3111_v53 = vunpack.i.l.bf16 %v6228_v45  ;;  %v1905_v63 = vpop.permute.xlu2 %1904  ;;  %v1313_v60 = vpop.f32.mrf.mxu2  ;;  %2981 = vmatpush.msrb.mxu1 %v6262_v29  ;;  %2966 = vmatpush.msrb.mxu2 %v1641_v54 }
 0x1dc   :  { %1780 = vrot.lane.b32.xlu2 %v1779_v0, %s3230_s26  ;;  %v1912_v33 = vsel %vm1793_vm4, %v1911_v13, %v1905_v63  ;;  %2614 = vmatpush.msrb.mxu0 %v1641_v54  ;;  %v3117_v63 = vunpack.i.h.bf16 %v6183_v27  ;;  %v2037_v27 = vpop.permute.xlu1 %2036 }
 0x1dd   :  { %v3162_v42 = vpop.eup %3161  ;;  %v1909_v1 = vsel %vm1787_vm5, %v3102_v10, %v3111_v53  ;;  %2941 = vmatmul.msk.f32.vlgmr.msrb.gmra.mxu1 %vm2543_vm6, %v1912_v33  ;;  %2967 = vmatpush.msrb.mxu2 %v1640_v7 }
 0x1de   :  { %v1493_v19 = vmul.f32 %v3162_v42, %v6167_v57  ;;  %vm1498_vm2 = vweird.f32 %v3162_v42  ;;  %v1910_v15 = vsel %vm1789_vm8, %v1909_v1, %v6162_v28  ;;  %2615 = vmatpush.msrb.mxu0 %v1640_v7 }
 0x1df   :  { %vm1499_vm7 = vmor %vm1497_vm14, %vm1498_vm2  ;;  %2619 = vmatmul.f32.vlgmr.msrb.gmra.mxu2 %v1910_v15 }
 0x1e0   :  { %v1494_v11 = vsub.f32 1.0, %v1493_v19  ;;  %v3164_v47 = vpop.eup %3163  ;;  %2939 = vmatpush.msk.msra.mxu0 %vm216_vm10, %v5913_v58 }
 0x1e1   :  { %v1207_v59 = vpop.f32.mrf.mxu0  ;;  %v6273_v16 = vadd.f32 1.0, %v3164_v47 }
 0x1e2   :  { %v1495_v55 = vmul.f32 %v3162_v42, %v1494_v11  ;;  %v1208_v14 = vadd.f32 %v1207_v59, %v5850_v26  ;;  %2638 = vmatpush.msra.mxu0 %v6003_v51  ;;  %v1369_v51 = vpop.f32.mrf.mxu3 }
 0x1e3   :  { %v1260_v4 = vpop.f32.mrf.mxu1  ;;  %3165 = vrcp.f32 %v6273_v16  ;;  %v1316_v48 = vpop.f32.mrf.mxu2  ;;  %v1516_v53 = vand.u32 2147483647, %v6273_v16  ;;  %vm1512_vm11 = vweird.f32 %v6273_v16 }
 0x1e4   :  { %v1496_v10 = vadd.f32 %v3162_v42, %v1495_v55  ;;  %v1261_v41 = vadd.f32 %v1260_v4, %v1208_v14  ;;  %2639 = vmatpush.msra.mxu0 %v6023_v40 }
 0x1e5   :  { %vm1517_vm2 = vcmp.eq.f32.partialorder %v1516_v53, 8.507059e+37 }
 0x1e6   :  { %v1500_v37 = vsel %vm1499_vm7, %v3162_v42, %v1496_v10  ;;  %v1314_v57 = vadd.f32 %v1313_v60, %v1261_v41  ;;  %2640 = vmatpush.msra.mxu0 %v6058_v24  ;;  %v1518_v42 = vand.u32 2147483648, %v6273_v16 }
 0x1e7   :  { %v1505_v21 = vsel %vm1502_vm15, %v1504_v18, %v1500_v37 }
 0x1e8   :  { %1616 = vst.msk [vmem:[%s6426_s10] sm:$0xff] %vm108_vm0, %v1505_v21  ;;  %v1367_v28 = vadd.f32 %v1366_v20, %v1314_v57  ;;  %2641 = vmatpush.msra.mxu0 %v6095_v6  ;;  %v1519_v24 = vor.u32 1.1754944e-38, %v1518_v42  ;;  %v3112_v6 = vunpack.i.h.bf16 %v6228_v45  ;;  %v2169_v10 = vpop.permute.xlu1 %2168 }
 0x1e9   :  { %v1210_v12 = vpop.f32.mrf.mxu0  ;;  %v3166_v2 = vpop.eup %3165 }
 0x1ea   :  { %v2881_v9 = vmul.f32 -1.442695, %v1367_v28  ;;  %v1211_v50 = vadd.f32 %v1210_v12, %v5850_v26  ;;  %v1508_v25 = vmul.f32 %v3166_v2, %v6273_v16  ;;  %v3120_v62 = vpop.permute.xlu0 %3119  ;;  %vm1513_vm10 = vweird.f32 %v3166_v2  ;;  %2642 = vmatpush.msra.mxu0 %v6110_v46 }
 0x1eb   :  { %v1263_v39 = vpop.f32.mrf.mxu1  ;;  %v3121_v0 = vunpack.i.l.bf16 %v3120_v62  ;;  %vm1514_vm9 = vmor %vm1512_vm11, %vm1513_vm10  ;;  %v3122_v30 = vunpack.i.h.bf16 %v3120_v62  ;;  %v2182_v46 = vsel %vm1783_vm12, 0.0, %v3117_v63 }
 0x1ec   :  { %3167 = vpow2.f32 %v2881_v9  ;;  %v1264_v32 = vadd.f32 %v1263_v39, %v1211_v50  ;;  %v1509_v58 = vsub.f32 1.0, %v1508_v25  ;;  %2643 = vmatpush.msra.mxu0 %v6134_v22 }
 0x1ed   :  { %v2045_v17 = vsel %vm1785_vm3, %v2044_v31, %v3121_v0  ;;  %v2046_v1 = vsel %vm1787_vm5, %v3121_v0, %v3112_v6  ;;  %v2183_v59 = vsel %vm1785_vm3, %v2182_v46, %v3122_v30 }
 0x1ee   :  { %v1317_v43 = vadd.f32 %v1316_v48, %v1264_v32  ;;  %v1510_v8 = vmul.f32 %v3166_v2, %v1509_v58  ;;  %2587 = vmatmul.f32.gmra.mxu3 %v2045_v17  ;;  %2644 = vmatpush.msra.mxu0 %v6173_v3  ;;  %v1372_v58 = vpop.f32.mrf.mxu3 }
 0x1f0   :  { %v1370_v19 = vadd.f32 %v1369_v51, %v1317_v43  ;;  %v1511_v35 = vadd.f32 %v3166_v2, %v1510_v8  ;;  %2645 = vmatpush.msra.mxu0 %v6181_v34  ;;  %v2175_v17 = vpop.permute.xlu1 %2174 }
 0x1f2   :  { %v3168_v40 = vpop.eup %3167  ;;  %v2882_v13 = vmul.f32 -1.442695, %v1370_v19  ;;  %v1515_v11 = vsel %vm1514_vm9, %v3166_v2, %v1511_v35  ;;  %v2031_v54 = vpop.permute.xlu0 %2030  ;;  %2646 = vmatpush.msra.mxu0 %v6200_v23 }
 0x1f3   :  { %v1426_v44 = vadd.f32 1.0, %v3168_v40  ;;  %v1520_v38 = vsel %vm1517_vm2, %v1519_v24, %v1515_v11  ;;  %v2047_v22 = vsel %vm1789_vm8, %v2046_v1, %v2031_v54  ;;  %v2048_v23 = vsel %vm1791_vm13, %v2031_v54, %v2037_v27 }
 0x1f4   :  { %3169 = vpow2.f32 %v2882_v13  ;;  %1617 = vst.msk [vmem:[%s6426_s10 + $0x8] sm:$0xff] %vm108_vm0, %v1520_v38  ;;  %2622 = vmatmul.f32.gmra.mxu2 %v2047_v22  ;;  %2647 = vmatpush.msra.mxu0 %v6220_v56  ;;  %v2186_v40 = vsel %vm1791_vm13, %v2169_v10, %v2175_v17 }
 0x1f5   :  { %3171 = vrcp.f32 %v1426_v44  ;;  %v1533_v34 = vand.u32 2147483648, %v1426_v44  ;;  %v1531_v4 = vand.u32 2147483647, %v1426_v44  ;;  %vm1527_vm7 = vweird.f32 %v1426_v44 }
 0x1f6   :  { %2590 = vmatmul.f32.gmra.mxu3 %v2183_v59  ;;  %2648 = vmatpush.msra.mxu0 %v6234_v5  ;;  %v1375_v38 = vpop.f32.mrf.mxu3 }
 0x1f7   :  { %v1534_v20 = vor.u32 1.1754944e-38, %v1533_v34  ;;  %vm1532_vm10 = vcmp.eq.f32.partialorder %v1531_v4, 8.507059e+37 }
 0x1f8   :  { %2649 = vmatpush.msra.mxu0 %v6251_v52 }
 0x1fa   :  { %v3170_v47 = vpop.eup %3169  ;;  %v6317_v55 = vpop.permute.xlu2 %3124  ;;  %2650 = vmatpush.msra.mxu0 %v6262_v29 }
 0x1fb   :  { %v3172_v3 = vpop.eup %3171  ;;  %v1427_v45 = vadd.f32 1.0, %v3170_v47  ;;  %v3126_v14 = vunpack.i.l.bf16 %v6317_v55  ;;  %v2042_v15 = vpop.permute.xlu0 %2041 }
 0x1fc   :  { %v1523_v33 = vmul.f32 %v3172_v3, %v1426_v44  ;;  %vm1528_vm14 = vweird.f32 %v3172_v3  ;;  %v2049_v41 = vsel %vm1793_vm4, %v2048_v23, %v2042_v15  ;;  %v1319_v48 = vpop.f32.mrf.mxu2 }
 0x1fd   :  { %3173 = vrcp.f32 %v1427_v45  ;;  %v2184_v60 = vsel %vm1787_vm5, %v3122_v30, %v3126_v14  ;;  %2942 = vmatmul.msk.f32.gmra.mxu1 %vm2543_vm6, %v2049_v41  ;;  %vm1529_vm15 = vmor %vm1527_vm7, %vm1528_vm14  ;;  %v1548_v28 = vand.u32 2147483648, %v1427_v45  ;;  %v1546_v49 = vand.u32 2147483647, %v1427_v45 }
 0x1fe   :  { %v1524_v16 = vsub.f32 1.0, %v1523_v33  ;;  %v2185_v56 = vsel %vm1789_vm8, %v2184_v60, %v2169_v10  ;;  %vm1542_vm9 = vweird.f32 %v1427_v45 }
 0x1ff   :  { %2625 = vmatmul.f32.gmra.mxu2 %v2185_v56  ;;  %v1549_v2 = vor.u32 1.1754944e-38, %v1548_v28  ;;  %vm1547_vm14 = vcmp.eq.f32.partialorder %v1546_v49, 8.507059e+37  ;;  %v3127_v56 = vunpack.i.h.bf16 %v6317_v55 }
 0x200   :  { %v1525_v7 = vmul.f32 %v3172_v3, %v1524_v16 }
 0x202   :  { %v1526_v18 = vadd.f32 %v3172_v3, %v1525_v7 }
 0x203   :  { %v3174_v5 = vpop.eup %3173 }
 0x204   :  { %v1530_v37 = vsel %vm1529_vm15, %v3172_v3, %v1526_v18  ;;  %v1538_v57 = vmul.f32 %v3174_v5, %v1427_v45  ;;  %vm1543_vm11 = vweird.f32 %v3174_v5  ;;  %v1322_v44 = vpop.f32.mrf.mxu2 }
 0x205   :  { %v1535_v21 = vsel %vm1532_vm10, %v1534_v20, %v1530_v37  ;;  %vm1544_vm2 = vmor %vm1542_vm9, %vm1543_vm11 }
 0x206   :  { %1618 = vst.msk [vmem:[%s6426_s10 + $0x10] sm:$0xff] %vm108_vm0, %v1535_v21  ;;  %v1539_v52 = vsub.f32 1.0, %v1538_v57 }
 0x208   :  { %v1540_v12 = vmul.f32 %v3174_v5, %v1539_v52  ;;  %v1213_v50 = vpop.f32.mrf.mxu0 }
 0x209   :  { %v1214_v29 = vadd.f32 %v1213_v50, %v5850_v26 }
 0x20a   :  { %v1541_v9 = vadd.f32 %v3174_v5, %v1540_v12  ;;  %v1266_v25 = vpop.f32.mrf.mxu1 }
 0x20b   :  { %v1267_v32 = vadd.f32 %v1266_v25, %v1214_v29 }
 0x20c   :  { %v1545_v39 = vsel %vm1544_vm2, %v3174_v5, %v1541_v9 }
 0x20d   :  { %v1550_v62 = vsel %vm1547_vm14, %v1549_v2, %v1545_v39  ;;  %v1320_v0 = vadd.f32 %v1319_v48, %v1267_v32 }
 0x20e   :  { %1619 = vst.msk [vmem:[%s6426_s10 + $0x18] sm:$0xff] %vm108_vm0, %v1550_v62 }
 0x20f   :  { %v1373_v43 = vadd.f32 %v1372_v58, %v1320_v0 }
 0x211   :  { %v2883_v31 = vmul.f32 -1.442695, %v1373_v43 }
 0x213   :  { %3175 = vpow2.f32 %v2883_v31 }
 0x215   :  { %v3130_v42 = vpop.permute.xlu2 %3129 }
 0x216   :  { %v3131_v3 = vunpack.i.l.bf16 %v3130_v42  ;;  %v3132_v41 = vunpack.i.h.bf16 %v3130_v42 }
 0x218   :  { %v2359_v4 = vsel %vm1783_vm12, 0.0, %v3131_v3  ;;  %v2537_v49 = vsel %vm1783_vm12, 0.0, %v3132_v41 }
 0x219   :  { %v3176_v51 = vpop.eup %3175 }
 0x21a   :  { %v1428_v8 = vadd.f32 1.0, %v3176_v51 }
 0x21b   :  { %v1216_v53 = vpop.f32.mrf.mxu0 }
 0x21c   :  { %3177 = vrcp.f32 %v1428_v8  ;;  %v1269_v19 = vpop.f32.mrf.mxu1  ;;  %v1217_v13 = vadd.f32 %v1216_v53, %v5850_v26  ;;  %v1563_v1 = vand.u32 2147483648, %v1428_v8  ;;  %v1561_v22 = vand.u32 2147483647, %v1428_v8 }
 0x21d   :  { %v2180_v35 = vpop.permute.xlu2 %2179  ;;  %vm1557_vm15 = vweird.f32 %v1428_v8 }
 0x21e   :  { %v2187_v24 = vsel %vm1793_vm4, %v2186_v40, %v2180_v35  ;;  %v1270_v63 = vadd.f32 %v1269_v19, %v1217_v13  ;;  %v1564_v45 = vor.u32 1.1754944e-38, %v1563_v1  ;;  %vm1562_vm11 = vcmp.eq.f32.partialorder %v1561_v22, 8.507059e+37  ;;  %v1378_v35 = vpop.f32.mrf.mxu3 }
 0x21f   :  { %2943 = vmatmul.msk.f32.gmra.mxu1 %vm2543_vm6, %v2187_v24 }
 0x220   :  { %v1323_v11 = vadd.f32 %v1322_v44, %v1270_v63 }
 0x222   :  { %v3178_v30 = vpop.eup %3177  ;;  %v1376_v46 = vadd.f32 %v1375_v38, %v1323_v11 }
 0x223   :  { %v1553_v6 = vmul.f32 %v3178_v30, %v1428_v8  ;;  %vm1558_vm7 = vweird.f32 %v3178_v30 }
 0x224   :  { %v2884_v54 = vmul.f32 -1.442695, %v1376_v46  ;;  %vm1559_vm10 = vmor %vm1557_vm15, %vm1558_vm7 }
 0x225   :  { %v1554_v27 = vsub.f32 1.0, %v1553_v6 }
 0x226   :  { %3179 = vpow2.f32 %v2884_v54  ;;  %v2352_v15 = vpop.permute.xlu2 %2351  ;;  %v1381_v22 = vpop.f32.mrf.mxu3 }
 0x227   :  { %v1555_v59 = vmul.f32 %v3178_v30, %v1554_v27 }
 0x229   :  { %v1556_v47 = vadd.f32 %v3178_v30, %v1555_v59 }
 0x22b   :  { %v1560_v33 = vsel %vm1559_vm10, %v3178_v30, %v1556_v47 }
 0x22c   :  { %v3140_v14 = vpop.permute.xlu1 %3139  ;;  %v3135_v16 = vpop.permute.xlu0 %3134  ;;  %v1565_v34 = vsel %vm1562_vm11, %v1564_v45, %v1560_v33 }
 0x22d   :  { %v3180_v60 = vpop.eup %3179  ;;  %1620 = vst.msk [vmem:[%s6427_s11] sm:$0xff] %vm108_vm0, %v1565_v34  ;;  %v3136_v7 = vunpack.i.l.bf16 %v3135_v16  ;;  %v3137_v18 = vunpack.i.h.bf16 %v3135_v16  ;;  %v3142_v52 = vunpack.i.h.bf16 %v3140_v14  ;;  %v3141_v55 = vunpack.i.l.bf16 %v3140_v14 }
 0x22e   :  { %v1429_v10 = vadd.f32 1.0, %v3180_v60  ;;  %v2524_v39 = vpop.permute.xlu2 %2523 }
 0x22f   :  { %v2360_v23 = vsel %vm1785_vm3, %v2359_v4, %v3136_v7  ;;  %v2361_v37 = vsel %vm1787_vm5, %v3136_v7, %v3127_v56  ;;  %v2538_v50 = vsel %vm1785_vm3, %v2537_v49, %v3137_v18  ;;  %v2539_v29 = vsel %vm1787_vm5, %v3137_v18, %v3142_v52 }
 0x230   :  { %2593 = vmatmul.f32.gmra.mxu3 %v2360_v23  ;;  %3181 = vrcp.f32 %v1429_v10  ;;  %v1578_v25 = vand.u32 2147483648, %v1429_v10  ;;  %v1576_v32 = vand.u32 2147483647, %v1429_v10  ;;  %v1788_v0 = vsel %vm1787_vm5, %v3101_v61, %v3141_v55 }
 0x231   :  { %v2540_v31 = vsel %vm1789_vm8, %v2539_v29, %v2524_v39  ;;  %vm1572_vm12 = vweird.f32 %v1429_v10 }
 0x232   :  { %v1579_v51 = vor.u32 1.1754944e-38, %v1578_v25  ;;  %vm1577_vm2 = vcmp.eq.f32.partialorder %v1576_v32, 8.507059e+37 }
 0x234   :  { %v2357_v5 = vpop.permute.xlu1 %2356  ;;  %v2346_v20 = vpop.permute.xlu0 %2345 }
 0x235   :  { %v2363_v57 = vsel %vm1791_vm13, %v2346_v20, %v2352_v15  ;;  %v2362_v21 = vsel %vm1789_vm8, %v2361_v37, %v2346_v20 }
 0x236   :  { %2628 = vmatmul.f32.gmra.mxu2 %v2362_v21  ;;  %v2364_v28 = vsel %vm1793_vm4, %v2363_v57, %v2357_v5  ;;  %v3182_v12 = vpop.eup %3181  ;;  %v1781_v24 = vpop.permute.xlu2 %1780 }
 0x237   :  { %2944 = vmatmul.msk.f32.gmra.mxu1 %vm2543_vm6, %v2364_v28  ;;  %v1568_v9 = vmul.f32 %v3182_v12, %v1429_v10  ;;  %vm1573_vm9 = vweird.f32 %v3182_v12 }
 0x238   :  { %2596 = vmatmul.f32.gmra.mxu3 %v2538_v50  ;;  %vm1574_vm3 = vmor %vm1572_vm12, %vm1573_vm9 }
 0x239   :  { %v1569_v2 = vsub.f32 1.0, %v1568_v9 }
 0x23b   :  { %v1570_v62 = vmul.f32 %v3182_v12, %v1569_v2 }
 0x23c   :  { %v1770_v48 = vpop.permute.xlu0 %1769  ;;  %v2530_v27 = vpop.permute.xlu1 %2529 }
 0x23d   :  { %v1219_v58 = vpop.f32.mrf.mxu0  ;;  %v1790_v43 = vsel %vm1789_vm8, %v1788_v0, %v1770_v48  ;;  %v1571_v42 = vadd.f32 %v3182_v12, %v1570_v62  ;;  %v2541_v47 = vsel %vm1791_vm13, %v2524_v39, %v2530_v27 }
 0x23e   :  { %2616 = vmatmul.f32.vlgmr.msrb.gmra.mxu0 %v1790_v43  ;;  %2631 = vmatmul.f32.gmra.mxu2 %v2540_v31  ;;  %v1220_v17 = vadd.f32 %v1219_v58, %v5850_v26 }
 0x23f   :  { %v1575_v8 = vsel %vm1574_vm3, %v3182_v12, %v1571_v42  ;;  %v1325_v53 = vpop.f32.mrf.mxu2 }
 0x240   :  { %v1272_v19 = vpop.f32.mrf.mxu1  ;;  %v1580_v36 = vsel %vm1577_vm2, %v1579_v51, %v1575_v8 }
 0x241   :  { %v1273_v40 = vadd.f32 %v1272_v19, %v1220_v17  ;;  %1621 = vst.msk [vmem:[%s6427_s11 + $0x8] sm:$0xff] %vm108_vm0, %v1580_v36 }
 0x243   :  { %v1326_v61 = vadd.f32 %v1325_v53, %v1273_v40 }
 0x244   :  { %v1776_v13 = vpop.permute.xlu0 %1775 }
 0x245   :  { %v1792_v63 = vsel %vm1791_vm13, %v1770_v48, %v1776_v13  ;;  %v1222_v44 = vpop.f32.mrf.mxu0  ;;  %v1379_v11 = vadd.f32 %v1378_v35, %v1326_v61 }
 0x246   :  { %v1794_v30 = vsel %vm1793_vm4, %v1792_v63, %v1781_v24  ;;  %v1223_v38 = vadd.f32 %v1222_v44, %v5850_v26 }
 0x247   :  { %2940 = vmatmul.msk.f32.vlgmr.msra.gmra.mxu0 %vm2543_vm6, %v1794_v30  ;;  %v2885_v6 = vmul.f32 -1.442695, %v1379_v11  ;;  %v1328_v1 = vpop.f32.mrf.mxu2 }
 0x248   :  { %v1275_v46 = vpop.f32.mrf.mxu1 }
 0x249   :  { %3183 = vpow2.f32 %v2885_v6  ;;  %v1276_v54 = vadd.f32 %v1275_v46, %v1223_v38 }
 0x24b   :  { %v1329_v59 = vadd.f32 %v1328_v1, %v1276_v54 }
 0x24c   :  { %v2535_v3 = vpop.permute.xlu0 %2534 }
 0x24d   :  { %v2542_v45 = vsel %vm1793_vm4, %v2541_v47, %v2535_v3  ;;  %v1382_v33 = vadd.f32 %v1381_v22, %v1329_v59 }
 0x24e   :  { %2945 = vmatmul.msk.f32.gmra.mxu1 %vm2543_vm6, %v2542_v45 }
 0x24f   :  { %v3184_v14 = vpop.eup %3183  ;;  %v2886_v16 = vmul.f32 -1.442695, %v1382_v33 }
 0x250   :  { %v1430_v34 = vadd.f32 1.0, %v3184_v14 }
 0x251   :  { %3185 = vpow2.f32 %v2886_v16 }
 0x252   :  { %3187 = vrcp.f32 %v1430_v34  ;;  %v1593_v56 = vand.u32 2147483648, %v1430_v34  ;;  %v1591_v18 = vand.u32 2147483647, %v1430_v34  ;;  %vm1587_vm5 = vweird.f32 %v1430_v34 }
 0x254   :  { %v1594_v37 = vor.u32 1.1754944e-38, %v1593_v56  ;;  %vm1592_vm6 = vcmp.eq.f32.partialorder %v1591_v18, 8.507059e+37 }
 0x255   :  { %v6375_v15 = vpop.f32.mrf.mxu3 }
 0x257   :  { %v3186_v60 = vpop.eup %3185 }
 0x258   :  { %v3188_v7 = vpop.eup %3187  ;;  %v1431_v4 = vadd.f32 1.0, %v3186_v60 }
 0x259   :  { %v1583_v10 = vmul.f32 %v3188_v7, %v1430_v34  ;;  %vm1588_vm13 = vweird.f32 %v3188_v7 }
 0x25a   :  { %3189 = vrcp.f32 %v1431_v4  ;;  %vm1589_vm4 = vmor %vm1587_vm5, %vm1588_vm13  ;;  %v1608_v12 = vand.u32 2147483648, %v1431_v4  ;;  %v1606_v55 = vand.u32 2147483647, %v1431_v4  ;;  %vm1602_vm14 = vweird.f32 %v1431_v4  ;;  %v2655_v48 = vpop.f32.mrf.mxu1 }
 0x25b   :  { %v1584_v23 = vsub.f32 1.0, %v1583_v10 }
 0x25c   :  { %v1609_v2 = vor.u32 1.1754944e-38, %v1608_v12  ;;  %vm1607_vm15 = vcmp.eq.f32.partialorder %v1606_v55, 8.507059e+37 }
 0x25d   :  { %v1585_v41 = vmul.f32 %v3188_v7, %v1584_v23  ;;  %v2585_v9 = vpop.f32.mrf.mxu3 }
 0x25e   :  { %v2586_v29 = vadd.f32 %v2585_v9, %v5850_v26 }
 0x25f   :  { %v1586_v5 = vadd.f32 %v3188_v7, %v1585_v41 }
 0x260   :  { %v3190_v20 = vpop.eup %3189 }
 0x261   :  { %v1590_v57 = vsel %vm1589_vm4, %v3188_v7, %v1586_v5  ;;  %v1598_v21 = vmul.f32 %v3190_v20, %v1431_v4  ;;  %vm1603_vm8 = vweird.f32 %v3190_v20 }
 0x262   :  { %v1595_v52 = vsel %vm1592_vm6, %v1594_v37, %v1590_v57  ;;  %vm1604_vm7 = vmor %vm1602_vm14, %vm1603_vm8  ;;  %v2620_v25 = vpop.f32.mrf.mxu2 }
 0x263   :  { %1622 = vst.msk [vmem:[%s6427_s11 + $0x10] sm:$0xff] %vm108_vm0, %v1595_v52  ;;  %v1599_v28 = vsub.f32 1.0, %v1598_v21  ;;  %v2621_v32 = vadd.f32 %v2620_v25, %v2586_v29 }
 0x265   :  { %v1600_v49 = vmul.f32 %v3190_v20, %v1599_v28  ;;  %v2656_v0 = vadd.f32 %v2655_v48, %v2621_v32  ;;  %v2583_v32 = vadd.f32 %v6375_v15, %v5850_v26 }
 0x267   :  { %v1601_v50 = vadd.f32 %v3190_v20, %v1600_v49  ;;  %v2947_v58 = vmul.f32 -1.442695, %v2656_v0 }
 0x269   :  { %v1605_v39 = vsel %vm1604_vm7, %v3190_v20, %v1601_v50  ;;  %3191 = vpow2.f32 %v2947_v58 }
 0x26a   :  { %v1610_v62 = vsel %vm1607_vm15, %v1609_v2, %v1605_v39 }
 0x26b   :  { %1623 = vst.msk [vmem:[%s6427_s11 + $0x18] sm:$0xff] %vm108_vm0, %v1610_v62 }
 0x26f   :  { %v3192_v43 = vpop.eup %3191 }
 0x270   :  { %v2689_v31 = vadd.f32 1.0, %v3192_v43 }
 0x271   :  { %v2588_v42 = vpop.f32.mrf.mxu3 }
 0x272   :  { %3193 = vrcp.f32 %v2689_v31  ;;  %v2589_v51 = vadd.f32 %v2588_v42, %v5850_v26  ;;  %v2720_v13 = vand.u32 2147483648, %v2689_v31  ;;  %v2718_v63 = vand.u32 2147483647, %v2689_v31 }
 0x273   :  { %vm2714_vm10 = vweird.f32 %v2689_v31 }
 0x274   :  { %v2721_v11 = vor.u32 1.1754944e-38, %v2720_v13  ;;  %vm2719_vm9 = vcmp.eq.f32.partialorder %v2718_v63, 8.507059e+37 }
 0x277   :  { %v2623_v17 = vpop.f32.mrf.mxu2 }
 0x278   :  { %v2624_v8 = vadd.f32 %v2623_v17, %v2589_v51  ;;  %v3194_v19 = vpop.eup %3193 }
 0x279   :  { %v2710_v40 = vmul.f32 %v3194_v19, %v2689_v31  ;;  %vm2715_vm0 = vweird.f32 %v3194_v19  ;;  %v2591_v1 = vpop.f32.mrf.mxu3 }
 0x27a   :  { %v2658_v53 = vpop.f32.mrf.mxu1  ;;  %vm2716_vm11 = vmor %vm2714_vm10, %vm2715_vm0  ;;  %v2592_v33 = vadd.f32 %v2591_v1, %v5850_v26 }
 0x27b   :  { %v2659_v36 = vadd.f32 %v2658_v53, %v2624_v8  ;;  %v2711_v35 = vsub.f32 1.0, %v2710_v40 }
 0x27d   :  { %v2948_v61 = vmul.f32 -1.442695, %v2659_v36  ;;  %v2712_v24 = vmul.f32 %v3194_v19, %v2711_v35 }
 0x27f   :  { %3195 = vpow2.f32 %v2948_v61  ;;  %v2713_v44 = vadd.f32 %v3194_v19, %v2712_v24 }
 0x281   :  { %v2717_v30 = vsel %vm2716_vm11, %v3194_v19, %v2713_v44 }
 0x282   :  { %v2722_v6 = vsel %vm2719_vm9, %v2721_v11, %v2717_v30  ;;  %v2626_v45 = vpop.f32.mrf.mxu2 }
 0x283   :  { %2785 = vst.msk [vmem:[%s6428_s12 + $0x8] sm:$0xff] %vm254_vm1, %v2722_v6  ;;  %v2627_v34 = vadd.f32 %v2626_v45, %v2592_v33 }
 0x285   :  { %v3196_v38 = vpop.eup %3195 }
 0x286   :  { %v2690_v46 = vadd.f32 1.0, %v3196_v38 }
 0x288   :  { %3197 = vrcp.f32 %v2690_v46  ;;  %v2735_v22 = vand.u32 2147483648, %v2690_v46  ;;  %v2733_v3 = vand.u32 2147483647, %v2690_v46  ;;  %vm2729_vm3 = vweird.f32 %v2690_v46 }
 0x28a   :  { %v2736_v16 = vor.u32 1.1754944e-38, %v2735_v22  ;;  %vm2734_vm13 = vcmp.eq.f32.partialorder %v2733_v3, 8.507059e+37 }
 0x28e   :  { %v3198_v27 = vpop.eup %3197 }
 0x28f   :  { %v2725_v54 = vmul.f32 %v3198_v27, %v2690_v46  ;;  %vm2730_vm12 = vweird.f32 %v3198_v27 }
 0x290   :  { %vm2731_vm2 = vmor %vm2729_vm3, %vm2730_vm12 }
 0x291   :  { %v2726_v59 = vsub.f32 1.0, %v2725_v54 }
 0x293   :  { %v2727_v47 = vmul.f32 %v3198_v27, %v2726_v59 }
 0x295   :  { %v2728_v14 = vadd.f32 %v3198_v27, %v2727_v47 }
 0x297   :  { %v2732_v60 = vsel %vm2731_vm2, %v3198_v27, %v2728_v14 }
 0x298   :  { %v2737_v7 = vsel %vm2734_vm13, %v2736_v16, %v2732_v60 }
 0x299   :  { %2786 = vst.msk [vmem:[%s6429_s13] sm:$0xff] %vm254_vm1, %v2737_v7 }
 0x29c   :  { %v2661_v4 = vpop.f32.mrf.mxu1 }
 0x29d   :  { %v2662_v10 = vadd.f32 %v2661_v4, %v2627_v34 }
 0x29f   :  { %v2949_v23 = vmul.f32 -1.442695, %v2662_v10 }
 0x2a1   :  { %3199 = vpow2.f32 %v2949_v23 }
 0x2a7   :  { %v3200_v56 = vpop.eup %3199 }
 0x2a8   :  { %v2691_v41 = vadd.f32 1.0, %v3200_v56 }
 0x2aa   :  { %3201 = vrcp.f32 %v2691_v41  ;;  %v2750_v37 = vand.u32 2147483648, %v2691_v41  ;;  %v2748_v52 = vand.u32 2147483647, %v2691_v41  ;;  %vm2744_vm4 = vweird.f32 %v2691_v41 }
 0x2ac   :  { %v2751_v49 = vor.u32 1.1754944e-38, %v2750_v37  ;;  %vm2749_vm8 = vcmp.eq.f32.partialorder %v2748_v52, 8.507059e+37 }
 0x2b0   :  { %v3202_v18 = vpop.eup %3201 }
 0x2b1   :  { %v2740_v5 = vmul.f32 %v3202_v18, %v2691_v41  ;;  %vm2745_vm5 = vweird.f32 %v3202_v18 }
 0x2b2   :  { %vm2746_vm6 = vmor %vm2744_vm4, %vm2745_vm5 }
 0x2b3   :  { %v2741_v20 = vsub.f32 1.0, %v2740_v5  ;;  %v2594_v57 = vpop.f32.mrf.mxu3 }
 0x2b4   :  { %v2595_v12 = vadd.f32 %v2594_v57, %v5850_v26  ;;  %v2664_v29 = vpop.f32.mrf.mxu1 }
 0x2b5   :  { %v2742_v21 = vmul.f32 %v3202_v18, %v2741_v20 }
 0x2b7   :  { %v2743_v28 = vadd.f32 %v3202_v18, %v2742_v21 }
 0x2b9   :  { %v2629_v55 = vpop.f32.mrf.mxu2  ;;  %v2747_v9 = vsel %vm2746_vm6, %v3202_v18, %v2743_v28 }
 0x2ba   :  { %v2630_v50 = vadd.f32 %v2629_v55, %v2595_v12  ;;  %v2752_v2 = vsel %vm2749_vm8, %v2751_v49, %v2747_v9 }
 0x2bb   :  { %v2617_v39 = vpop.f32.mrf.mxu0  ;;  %2787 = vst.msk [vmem:[%s6429_s13 + $0x8] sm:$0xff] %vm254_vm1, %v2752_v2  ;;  %v2597_v58 = vpop.f32.mrf.mxu3 }
 0x2bc   :  { %v2665_v25 = vadd.f32 %v2664_v29, %v2630_v50  ;;  %v2618_v48 = vadd.f32 %v2617_v39, %v2583_v32  ;;  %v2598_v8 = vadd.f32 %v2597_v58, %v5850_v26 }
 0x2be   :  { %v2950_v62 = vmul.f32 -1.442695, %v2665_v25 }
 0x2c0   :  { %3203 = vpow2.f32 %v2950_v62 }
 0x2c1   :  { %v2632_v51 = vpop.f32.mrf.mxu2 }
 0x2c2   :  { %v2633_v53 = vadd.f32 %v2632_v51, %v2598_v8 }
 0x2c4   :  { %v2652_v0 = vpop.f32.mrf.mxu0 }
 0x2c5   :  { %v2653_v43 = vadd.f32 %v2652_v0, %v2618_v48 }
 0x2c6   :  { %v3204_v31 = vpop.eup %3203 }
 0x2c7   :  { %v2692_v42 = vadd.f32 1.0, %v3204_v31  ;;  %v2946_v17 = vmul.f32 -1.442695, %v2653_v43 }
 0x2c9   :  { %3205 = vrcp.f32 %v2692_v42  ;;  %v2765_v63 = vand.u32 2147483648, %v2692_v42  ;;  %v2763_v11 = vand.u32 2147483647, %v2692_v42  ;;  %vm2759_vm7 = vweird.f32 %v2692_v42 }
 0x2ca   :  { %3207 = vpow2.f32 %v2946_v17 }
 0x2cb   :  { %v2667_v19 = vpop.f32.mrf.mxu1  ;;  %v2766_v26 = vor.u32 1.1754944e-38, %v2765_v63  ;;  %vm2764_vm0 = vcmp.eq.f32.partialorder %v2763_v11, 8.507059e+37 }
 0x2cc   :  { %v2668_v36 = vadd.f32 %v2667_v19, %v2633_v53 }
 0x2ce   :  { %v2951_v40 = vmul.f32 -1.442695, %v2668_v36 }
 0x2cf   :  { %v3206_v61 = vpop.eup %3205 }
 0x2d0   :  { %v3208_v35 = vpop.eup %3207  ;;  %v2755_v13 = vmul.f32 %v3206_v61, %v2692_v42  ;;  %3209 = vpow2.f32 %v2951_v40  ;;  %vm2760_vm14 = vweird.f32 %v3206_v61 }
 0x2d1   :  { %v2688_v15 = vadd.f32 1.0, %v3208_v35  ;;  %vm2761_vm15 = vmor %vm2759_vm7, %vm2760_vm14 }
 0x2d2   :  { %v2756_v24 = vsub.f32 1.0, %v2755_v13 }
 0x2d3   :  { %3211 = vrcp.f32 %v2688_v15  ;;  %v2705_v22 = vand.u32 2147483648, %v2688_v15  ;;  %v2703_v3 = vand.u32 2147483647, %v2688_v15  ;;  %vm2699_vm11 = vweird.f32 %v2688_v15 }
 0x2d4   :  { %v2757_v44 = vmul.f32 %v3206_v61, %v2756_v24 }
 0x2d5   :  { %v2706_v16 = vor.u32 1.1754944e-38, %v2705_v22  ;;  %vm2704_vm12 = vcmp.eq.f32.partialorder %v2703_v3, 8.507059e+37 }
 0x2d6   :  { %v3210_v30 = vpop.eup %3209  ;;  %v2758_v38 = vadd.f32 %v3206_v61, %v2757_v44 }
 0x2d7   :  { %v2693_v6 = vadd.f32 1.0, %v3210_v30 }
 0x2d8   :  { %v2762_v46 = vsel %vm2761_vm15, %v3206_v61, %v2758_v38 }
 0x2d9   :  { %v3212_v27 = vpop.eup %3211  ;;  %v2767_v54 = vsel %vm2764_vm0, %v2766_v26, %v2762_v46  ;;  %3213 = vrcp.f32 %v2693_v6  ;;  %v2780_v4 = vand.u32 2147483648, %v2693_v6  ;;  %v2778_v23 = vand.u32 2147483647, %v2693_v6 }
 0x2da   :  { %2788 = vst.msk [vmem:[%s6430_s14] sm:$0xff] %vm254_vm1, %v2767_v54  ;;  %v2695_v1 = vmul.f32 %v3212_v27, %v2688_v15  ;;  %vm2700_vm10 = vweird.f32 %v3212_v27  ;;  %vm2774_vm2 = vweird.f32 %v2693_v6 }
 0x2db   :  { %vm2701_vm9 = vmor %vm2699_vm11, %vm2700_vm10  ;;  %v2781_v41 = vor.u32 1.1754944e-38, %v2780_v4  ;;  %vm2779_vm5 = vcmp.eq.f32.partialorder %v2778_v23, 8.507059e+37 }
 0x2dc   :  { %v2696_v59 = vsub.f32 1.0, %v2695_v1 }
 0x2de   :  { %v2697_v47 = vmul.f32 %v3212_v27, %v2696_v59 }
 0x2df   :  { %v3214_v45 = vpop.eup %3213 }
 0x2e0   :  { %v2698_v33 = vadd.f32 %v3212_v27, %v2697_v47  ;;  %v2770_v14 = vmul.f32 %v3214_v45, %v2693_v6  ;;  %vm2775_vm3 = vweird.f32 %v3214_v45 }
 0x2e1   :  { %vm2776_vm13 = vmor %vm2774_vm2, %vm2775_vm3 }
 0x2e2   :  { %v2702_v34 = vsel %vm2701_vm9, %v3212_v27, %v2698_v33  ;;  %v2771_v60 = vsub.f32 1.0, %v2770_v14 }
 0x2e3   :  { %v2707_v7 = vsel %vm2704_vm12, %v2706_v16, %v2702_v34 }
 0x2e4   :  { %2784 = vst.msk [vmem:[%s6428_s12] sm:$0xff] %vm254_vm1, %v2707_v7  ;;  %v2772_v10 = vmul.f32 %v3214_v45, %v2771_v60 }
 0x2e6   :  { %v2773_v56 = vadd.f32 %v3214_v45, %v2772_v10 }
 0x2e8   :  { %v2777_v18 = vsel %vm2776_vm13, %v3214_v45, %v2773_v56 }
 0x2e9   :  { %v2782_v5 = vsel %vm2779_vm5, %v2781_v41, %v2777_v18 }
 0x2ea   :  { %2789 = vst.msk [vmem:[%s6430_s14 + $0x8] sm:$0xff] %vm254_vm1, %v2782_v5 }

</bundles_post_ra>
